<compile_context>
chip_gen: v7x
topology: tpu7x:2x2x1
jax: 0.10.0
libtpu: 0.0.40
codegen_flags: <defaults>
</compile_context>

<pallas_src>
import math
import functools

import jax
import jax.numpy as jnp
from jax.experimental import pallas as pl
from jax.experimental.pallas import tpu as pltpu

# ---- config (small, consistent with TMoE.__init__) ----
EMSIZE = 32      # config.emsize
NHEADS = 4       # config.nheads
NHID = 64        # config.nhid
NLAYERS = 2      # config.nlayers (layer 0: dense encoder layer, layer 1: Switch/MoE layer)
N_EXPERT = 4     # config.n_expert
CAPACITY_FACTOR = 1.0
MIN_CAPACITY = 4
LN_EPS = 1e-5
HEAD_DIM = EMSIZE // NHEADS


# ---------------- in-kernel helpers (pure functions of loaded VMEM values) ----------------

def _layernorm(y, g, b):
    mu = jnp.mean(y, axis=-1, keepdims=True)
    var = jnp.mean(jnp.square(y - mu), axis=-1, keepdims=True)   # biased var (PyTorch LayerNorm)
    return (y - mu) * jax.lax.rsqrt(var + LN_EPS) * g + b


def _self_attention(x, in_w, in_b, out_w, out_b, batch, seq):
    """torch.nn.MultiheadAttention(E, H, batch_first=True), no mask, eval mode."""
    qkv = jnp.dot(x, in_w, preferred_element_type=jnp.float32) + in_b        # (T, 3E)
    scale = 1.0 / math.sqrt(HEAD_DIM)
    batch_rows = []
    for b in range(batch):                       # static tiny loops: B*H = 8 heads total
        r0 = b * seq
        proj = None
        for h in range(NHEADS):
            c = h * HEAD_DIM
            q = qkv[r0:r0 + seq, c:c + HEAD_DIM] * scale                      # (S, Dh)
            k = qkv[r0:r0 + seq, EMSIZE + c:EMSIZE + c + HEAD_DIM]
            v = qkv[r0:r0 + seq, 2 * EMSIZE + c:2 * EMSIZE + c + HEAD_DIM]
            s = jax.lax.dot_general(q, k, (((1,), (1,)), ((), ())),
                                    preferred_element_type=jnp.float32)       # (S, S)
            s = s - jnp.max(s, axis=-1, keepdims=True)
            p = jnp.exp(s)
            p = p * pl.reciprocal(jnp.sum(p, axis=-1, keepdims=True), approx=True)
            o_h = jnp.dot(p, v, preferred_element_type=jnp.float32)           # (S, Dh)
            # head-concat + out_proj folded:  concat_h(o_h) @ W = sum_h o_h @ W[h*Dh:(h+1)*Dh]
            contrib = jnp.dot(o_h, out_w[c:c + HEAD_DIM, :],
                              preferred_element_type=jnp.float32)             # (S, E)
            proj = contrib if proj is None else proj + contrib
        batch_rows.append(proj)
    return jnp.concatenate(batch_rows, axis=0) + out_b                        # (T, E)


def _switch_moe(x, gate_w, w1c, b1c, w2c, b2m, capacity):
    """DeepSpeed top-1 gating (k=1, drop-to-capacity) + experts as one wide matmul.
    RSample gate noise and the aux load-balancing loss are training-only and skipped."""
    # TODO(synk): DeepSpeed's optional random-token-selection (use_rts) tie-breaking is skipped;
    # tokens are kept deterministically in arrival order up to capacity (GShard-style).
    T = x.shape[0]
    NE = N_EXPERT

    logits = jnp.dot(x, gate_w, preferred_element_type=jnp.float32)           # (T, NE)
    logits = logits - jnp.max(logits, axis=-1, keepdims=True)
    eg = jnp.exp(logits)
    gates = eg * pl.reciprocal(jnp.sum(eg, axis=-1, keepdims=True), approx=True)

    # deterministic first-max argmax via column iota (no jnp.argmax in-kernel)
    col = jax.lax.broadcasted_iota(jnp.int32, (T, NE), 1).astype(jnp.float32)
    mx = jnp.max(gates, axis=-1, keepdims=True)
    sel = jnp.min(jnp.where(gates == mx, col, float(NE)), axis=-1, keepdims=True)
    mask1 = (col == sel).astype(jnp.float32)                                  # (T, NE) one-hot

    # position of each token within its expert queue: cumsum(mask1, axis=0) - 1,
    # realized as a lower-triangular (T,T) matmul (MXU-friendly, no axis-0 scan).
    rT = jax.lax.broadcasted_iota(jnp.int32, (T, T), 0)
    cT = jax.lax.broadcasted_iota(jnp.int32, (T, T), 1)
    tril = (rT >= cT).astype(jnp.float32)
    locations = jnp.dot(tril, mask1, preferred_element_type=jnp.float32) - 1.0
    mask1 = mask1 * (locations < float(capacity)).astype(jnp.float32)

    gate_val = jnp.sum(gates * mask1, axis=-1, keepdims=True)                 # (T, 1)
    combine = gate_val * mask1                                                # (T, NE)

    # experts: h = relu(x @ concat_e(w1) + concat_e(b1))  -> (T, NE*NHID) lane-dense
    h = jnp.maximum(jnp.dot(x, w1c, preferred_element_type=jnp.float32) + b1c, 0.0)
    # expand combine to per-expert NHID blocks via a block one-hot map (built from iota)
    er = jax.lax.broadcasted_iota(jnp.int32, (NE, NE * NHID), 0)
    ec = jax.lax.broadcasted_iota(jnp.int32, (NE, NE * NHID), 1)
    emap = ((ec >= er * NHID) & (ec < (er + 1) * NHID)).astype(jnp.float32)   # (NE, NE*NHID)
    comb_exp = jnp.dot(combine, emap, preferred_element_type=jnp.float32)     # (T, NE*NHID)
    y = jnp.dot(h * comb_exp, w2c, preferred_element_type=jnp.float32)        # (T, E)
    y = y + jnp.dot(combine, b2m, preferred_element_type=jnp.float32)         # gated expert bias
    return y


# ---------------- the single fused kernel ----------------

def _tmoe_kernel(*refs, kinds, batch, seq, capacity):
    out_ref = refs[-1]
    it = iter(refs[:-1])
    x = next(it)[...].astype(jnp.float32)                                     # (T, E)

    for kind in kinds:                                                        # static over layers
        in_w = next(it)[...]; in_b = next(it)[...]
        out_w = next(it)[...]; out_b = next(it)[...]
        ln1_g = next(it)[...]; ln1_b = next(it)[...]
        ln2_g = next(it)[...]; ln2_b = next(it)[...]

        # post-norm: x = norm1(x + SA(x))
        a = _self_attention(x, in_w, in_b, out_w, out_b, batch, seq)
        x = _layernorm(x + a, ln1_g, ln1_b)

        if kind == 0:       # dense TransformerEncoderLayer FFN (ReLU)
            w1 = next(it)[...]; b1 = next(it)[...]
            w2 = next(it)[...]; b2 = next(it)[...]
            h = jnp.maximum(jnp.dot(x, w1, preferred_element_type=jnp.float32) + b1, 0.0)
            f = jnp.dot(h, w2, preferred_element_type=jnp.float32) + b2
        else:               # Switch-MoE layer
            gate_w = next(it)[...]
            w1c = next(it)[...]; b1c = next(it)[...]
            w2c = next(it)[...]; b2m = next(it)[...]
            f = _switch_moe(x, gate_w, w1c, b1c, w2c, b2m, capacity)

        # x = norm2(x + FFN/MoE(x))
        x = _layernorm(x + f, ln2_g, ln2_b)

    # torch.sum(x) folded into the same kernel (no separate launch / HBM roundtrip)
    out_ref[...] = jnp.sum(x, axis=(0, 1), keepdims=True)


# ---------------- wrapper ----------------

def _flatten_params(params):
    """Flatten per-layer params into the fixed kernel argument order; concatenate the MoE
    expert weights into single wide matmul operands (done once at trace time)."""
    flat, kinds = [], []
    for i, p in enumerate(params):
        flat += [p['in_w'], p['in_b'].reshape(1, -1),
                 p['out_w'], p['out_b'].reshape(1, -1),
                 p['ln1_g'].reshape(1, -1), p['ln1_b'].reshape(1, -1),
                 p['ln2_g'].reshape(1, -1), p['ln2_b'].reshape(1, -1)]
        if i % 2 == 0:
            kinds.append(0)
            flat += [p['lin1_w'], p['lin1_b'].reshape(1, -1),
                     p['lin2_w'], p['lin2_b'].reshape(1, -1)]
        else:
            kinds.append(1)
            w1c = jnp.concatenate([p['w1'][e] for e in range(N_EXPERT)], axis=1)   # (E, NE*NHID)
            b1c = p['b1'].reshape(1, N_EXPERT * NHID)                              # (1, NE*NHID)
            w2c = p['w2'].reshape(N_EXPERT * NHID, EMSIZE)                         # (NE*NHID, E)
            b2m = p['b2'].reshape(N_EXPERT, EMSIZE)                                # (NE, E)
            flat += [p['gate_w'], w1c, b1c, w2c, b2m]
    return flat, tuple(kinds)


def tmoe_forward(x, y, params):
    del y  # unused by the PyTorch forward as well
    B, S, E = x.shape
    T = B * S
    capacity = max(int(math.ceil(T / N_EXPERT * CAPACITY_FACTOR)), MIN_CAPACITY)
    flat, kinds = _flatten_params(params)
    inputs = [x.reshape(T, E)] + flat

    # advisory cost estimate (scheduling hygiene)
    flops = 0
    for kind in kinds:
        flops += 2 * T * E * (3 * E) + 2 * T * E * E          # in/out projections
        flops += B * NHEADS * 4 * S * S * HEAD_DIM            # attention score + PV
        if kind == 0:
            flops += 4 * T * E * NHID                         # dense FFN
        else:
            flops += 2 * T * E * N_EXPERT + 4 * T * E * N_EXPERT * NHID + 2 * T * T * N_EXPERT
    transcendentals = len(kinds) * (B * NHEADS * S * S + 3 * T) + T * N_EXPERT
    bytes_accessed = sum(int(a.size) * a.dtype.itemsize for a in inputs) + 4

    kernel = functools.partial(_tmoe_kernel, kinds=kinds, batch=B, seq=S, capacity=capacity)
    out = pl.pallas_call(
        kernel,
        out_shape=jax.ShapeDtypeStruct((1, 1), jnp.float32),
        in_specs=[pl.BlockSpec(memory_space=pltpu.MemorySpace.VMEM)] * len(inputs),
        out_specs=pl.BlockSpec(memory_space=pltpu.MemorySpace.VMEM),
        compiler_params=pltpu.CompilerParams(vmem_limit_bytes=32 * 1024 * 1024),
        cost_estimate=pl.CostEstimate(flops=int(flops),
                                      transcendentals=int(transcendentals),
                                      bytes_accessed=int(bytes_accessed)),
    )(*inputs)
    return out[0, 0]


# ---------------- deterministic parameter init ----------------

def _nrm(key, shape, scale=0.05):
    return scale * jax.random.normal(key, shape, jnp.float32)


def init_params(key):
    params = []
    for i in range(NLAYERS):
        key, *ks = jax.random.split(key, 16)
        p = {
            'in_w': _nrm(ks[0], (EMSIZE, 3 * EMSIZE)),
            'in_b': _nrm(ks[1], (3 * EMSIZE,)),
            'out_w': _nrm(ks[2], (EMSIZE, EMSIZE)),
            'out_b': _nrm(ks[3], (EMSIZE,)),
            'ln1_g': jnp.ones((EMSIZE,), jnp.float32),
            'ln1_b': jnp.zeros((EMSIZE,), jnp.float32),
            'ln2_g': jnp.ones((EMSIZE,), jnp.float32),
            'ln2_b': jnp.zeros((EMSIZE,), jnp.float32),
        }
        if i % 2 == 0:
            p.update({
                'lin1_w': _nrm(ks[4], (EMSIZE, NHID)),
                'lin1_b': _nrm(ks[5], (NHID,)),
                'lin2_w': _nrm(ks[6], (NHID, EMSIZE)),
                'lin2_b': _nrm(ks[7], (EMSIZE,)),
            })
        else:
            p.update({
                'gate_w': _nrm(ks[4], (EMSIZE, N_EXPERT)),
                'w1': _nrm(ks[5], (N_EXPERT, EMSIZE, NHID)),
                'b1': _nrm(ks[6], (N_EXPERT, 1, NHID)),
                'w2': _nrm(ks[7], (N_EXPERT, NHID, EMSIZE)),
                'b2': _nrm(ks[8], (N_EXPERT, 1, EMSIZE)),
            })
        params.append(p)
    return params


if __name__ == "__main__":
    key = jax.random.PRNGKey(0)
    kx, kp = jax.random.split(key)
    B, S = 2, 8
    x = jax.random.normal(kx, (B, S, EMSIZE), jnp.float32)
    y = jnp.zeros((B, S), jnp.int32)   # unused by the forward, kept for signature parity
    params = init_params(kp)

    out = jax.jit(lambda xx, yy: tmoe_forward(xx, yy, params))(x, y)
    jax.block_until_ready(out)
    assert out.shape == () and bool(jnp.isfinite(out))
    print("KERNEL_OK")
</pallas_src>

<mosaic_0001>
module attributes {stable_mosaic.version = 11 : i64} {
  func.func @_tmoe_kernel(%arg0: memref<16x32xf32, #tpu.memory_space<vmem>>, %arg1: memref<32x96xf32, #tpu.memory_space<vmem>>, %arg2: memref<1x96xf32, #tpu.memory_space<vmem>>, %arg3: memref<32x32xf32, #tpu.memory_space<vmem>>, %arg4: memref<1x32xf32, #tpu.memory_space<vmem>>, %arg5: memref<1x32xf32, #tpu.memory_space<vmem>>, %arg6: memref<1x32xf32, #tpu.memory_space<vmem>>, %arg7: memref<1x32xf32, #tpu.memory_space<vmem>>, %arg8: memref<1x32xf32, #tpu.memory_space<vmem>>, %arg9: memref<32x64xf32, #tpu.memory_space<vmem>>, %arg10: memref<1x64xf32, #tpu.memory_space<vmem>>, %arg11: memref<64x32xf32, #tpu.memory_space<vmem>>, %arg12: memref<1x32xf32, #tpu.memory_space<vmem>>, %arg13: memref<32x96xf32, #tpu.memory_space<vmem>>, %arg14: memref<1x96xf32, #tpu.memory_space<vmem>>, %arg15: memref<32x32xf32, #tpu.memory_space<vmem>>, %arg16: memref<1x32xf32, #tpu.memory_space<vmem>>, %arg17: memref<1x32xf32, #tpu.memory_space<vmem>>, %arg18: memref<1x32xf32, #tpu.memory_space<vmem>>, %arg19: memref<1x32xf32, #tpu.memory_space<vmem>>, %arg20: memref<1x32xf32, #tpu.memory_space<vmem>>, %arg21: memref<32x4xf32, #tpu.memory_space<vmem>>, %arg22: memref<32x256xf32, #tpu.memory_space<vmem>>, %arg23: memref<1x256xf32, #tpu.memory_space<vmem>>, %arg24: memref<256x32xf32, #tpu.memory_space<vmem>>, %arg25: memref<4x32xf32, #tpu.memory_space<vmem>>, %arg26: memref<1x1xf32, #tpu.memory_space<vmem>>) attributes {dimension_semantics = [], scalar_prefetch = 0 : i64, scratch_operands = 0 : i64, tpu.core_type = #tpu.core_type<tc>} {
    %c0 = arith.constant 0 : index
    %c0_0 = arith.constant 0 : index
    %0 = vector.load %arg0[%c0, %c0_0] : memref<16x32xf32, #tpu.memory_space<vmem>>, vector<16x32xf32>
    %c0_1 = arith.constant 0 : index
    %c0_2 = arith.constant 0 : index
    %1 = vector.load %arg1[%c0_1, %c0_2] : memref<32x96xf32, #tpu.memory_space<vmem>>, vector<32x96xf32>
    %c0_3 = arith.constant 0 : index
    %c0_4 = arith.constant 0 : index
    %2 = vector.load %arg2[%c0_3, %c0_4] : memref<1x96xf32, #tpu.memory_space<vmem>>, vector<1x96xf32>
    %c0_5 = arith.constant 0 : index
    %c0_6 = arith.constant 0 : index
    %3 = vector.load %arg3[%c0_5, %c0_6] : memref<32x32xf32, #tpu.memory_space<vmem>>, vector<32x32xf32>
    %c0_7 = arith.constant 0 : index
    %c0_8 = arith.constant 0 : index
    %4 = vector.load %arg4[%c0_7, %c0_8] : memref<1x32xf32, #tpu.memory_space<vmem>>, vector<1x32xf32>
    %c0_9 = arith.constant 0 : index
    %c0_10 = arith.constant 0 : index
    %5 = vector.load %arg5[%c0_9, %c0_10] : memref<1x32xf32, #tpu.memory_space<vmem>>, vector<1x32xf32>
    %c0_11 = arith.constant 0 : index
    %c0_12 = arith.constant 0 : index
    %6 = vector.load %arg6[%c0_11, %c0_12] : memref<1x32xf32, #tpu.memory_space<vmem>>, vector<1x32xf32>
    %c0_13 = arith.constant 0 : index
    %c0_14 = arith.constant 0 : index
    %7 = vector.load %arg7[%c0_13, %c0_14] : memref<1x32xf32, #tpu.memory_space<vmem>>, vector<1x32xf32>
    %c0_15 = arith.constant 0 : index
    %c0_16 = arith.constant 0 : index
    %8 = vector.load %arg8[%c0_15, %c0_16] : memref<1x32xf32, #tpu.memory_space<vmem>>, vector<1x32xf32>
    %cst = arith.constant dense<0.000000e+00> : vector<16x96xf32>
    %9 = tpu.matmul %0, %1, %cst {dimension_numbers = #tpu.dot_dimension_numbers<[1], [0], [0], [1], [0, 0, 1, 1], [], []>} : vector<16x32xf32>, vector<32x96xf32>, vector<16x96xf32> -> vector<16x96xf32>
    %10 = vector.broadcast %2 : vector<1x96xf32> to vector<16x96xf32>
    %11 = arith.addf %9, %10 : vector<16x96xf32>
    %12 = vector.extract_strided_slice %11 {offsets = [0, 0], sizes = [8, 8], strides = [1, 1]} : vector<16x96xf32> to vector<8x8xf32>
    %cst_17 = arith.constant 0.353553385 : f32
    %13 = vector.broadcast %cst_17 : f32 to vector<8x8xf32>
    %14 = arith.mulf %12, %13 : vector<8x8xf32>
    %15 = vector.extract_strided_slice %11 {offsets = [0, 32], sizes = [8, 8], strides = [1, 1]} : vector<16x96xf32> to vector<8x8xf32>
    %16 = vector.extract_strided_slice %11 {offsets = [0, 64], sizes = [8, 8], strides = [1, 1]} : vector<16x96xf32> to vector<8x8xf32>
    %cst_18 = arith.constant dense<0.000000e+00> : vector<8x8xf32>
    %17 = tpu.matmul %14, %15, %cst_18 {dimension_numbers = #tpu.dot_dimension_numbers<[1], [1], [0], [0], [0, 0, 1, 0], [], []>} : vector<8x8xf32>, vector<8x8xf32>, vector<8x8xf32> -> vector<8x8xf32>
    %cst_19 = arith.constant dense<0xFF800000> : vector<8xf32>
    %18 = vector.multi_reduction <maximumf>, %17, %cst_19 [1] : vector<8x8xf32> to vector<8xf32>
    %19 = vector.shape_cast %18 : vector<8xf32> to vector<8x1xf32>
    %20 = vector.broadcast %19 : vector<8x1xf32> to vector<8x8xf32>
    %21 = arith.subf %17, %20 : vector<8x8xf32>
    %22 = math.exp %21 : vector<8x8xf32>
    %cst_20 = arith.constant dense<0.000000e+00> : vector<8xf32>
    %23 = vector.multi_reduction <add>, %22, %cst_20 [1] : vector<8x8xf32> to vector<8xf32>
    %24 = vector.shape_cast %23 : vector<8xf32> to vector<8x1xf32>
    %25 = tpu.reciprocal %24 {approx = true} : vector<8x1xf32> -> vector<8x1xf32>
    %26 = vector.broadcast %25 : vector<8x1xf32> to vector<8x8xf32>
    %27 = arith.mulf %22, %26 : vector<8x8xf32>
    %cst_21 = arith.constant dense<0.000000e+00> : vector<8x8xf32>
    %28 = tpu.matmul %27, %16, %cst_21 {dimension_numbers = #tpu.dot_dimension_numbers<[1], [0], [0], [1], [0, 0, 1, 1], [], []>} : vector<8x8xf32>, vector<8x8xf32>, vector<8x8xf32> -> vector<8x8xf32>
    %29 = vector.extract_strided_slice %3 {offsets = [0, 0], sizes = [8, 32], strides = [1, 1]} : vector<32x32xf32> to vector<8x32xf32>
    %cst_22 = arith.constant dense<0.000000e+00> : vector<8x32xf32>
    %30 = tpu.matmul %28, %29, %cst_22 {dimension_numbers = #tpu.dot_dimension_numbers<[1], [0], [0], [1], [0, 0, 1, 1], [], []>} : vector<8x8xf32>, vector<8x32xf32>, vector<8x32xf32> -> vector<8x32xf32>
    %31 = vector.extract_strided_slice %11 {offsets = [0, 8], sizes = [8, 8], strides = [1, 1]} : vector<16x96xf32> to vector<8x8xf32>
    %cst_23 = arith.constant 0.353553385 : f32
    %32 = vector.broadcast %cst_23 : f32 to vector<8x8xf32>
    %33 = arith.mulf %31, %32 : vector<8x8xf32>
    %34 = vector.extract_strided_slice %11 {offsets = [0, 40], sizes = [8, 8], strides = [1, 1]} : vector<16x96xf32> to vector<8x8xf32>
    %35 = vector.extract_strided_slice %11 {offsets = [0, 72], sizes = [8, 8], strides = [1, 1]} : vector<16x96xf32> to vector<8x8xf32>
    %cst_24 = arith.constant dense<0.000000e+00> : vector<8x8xf32>
    %36 = tpu.matmul %33, %34, %cst_24 {dimension_numbers = #tpu.dot_dimension_numbers<[1], [1], [0], [0], [0, 0, 1, 0], [], []>} : vector<8x8xf32>, vector<8x8xf32>, vector<8x8xf32> -> vector<8x8xf32>
    %cst_25 = arith.constant dense<0xFF800000> : vector<8xf32>
    %37 = vector.multi_reduction <maximumf>, %36, %cst_25 [1] : vector<8x8xf32> to vector<8xf32>
    %38 = vector.shape_cast %37 : vector<8xf32> to vector<8x1xf32>
    %39 = vector.broadcast %38 : vector<8x1xf32> to vector<8x8xf32>
    %40 = arith.subf %36, %39 : vector<8x8xf32>
    %41 = math.exp %40 : vector<8x8xf32>
    %cst_26 = arith.constant dense<0.000000e+00> : vector<8xf32>
    %42 = vector.multi_reduction <add>, %41, %cst_26 [1] : vector<8x8xf32> to vector<8xf32>
    %43 = vector.shape_cast %42 : vector<8xf32> to vector<8x1xf32>
    %44 = tpu.reciprocal %43 {approx = true} : vector<8x1xf32> -> vector<8x1xf32>
    %45 = vector.broadcast %44 : vector<8x1xf32> to vector<8x8xf32>
    %46 = arith.mulf %41, %45 : vector<8x8xf32>
    %cst_27 = arith.constant dense<0.000000e+00> : vector<8x8xf32>
    %47 = tpu.matmul %46, %35, %cst_27 {dimension_numbers = #tpu.dot_dimension_numbers<[1], [0], [0], [1], [0, 0, 1, 1], [], []>} : vector<8x8xf32>, vector<8x8xf32>, vector<8x8xf32> -> vector<8x8xf32>
    %48 = vector.extract_strided_slice %3 {offsets = [8, 0], sizes = [8, 32], strides = [1, 1]} : vector<32x32xf32> to vector<8x32xf32>
    %cst_28 = arith.constant dense<0.000000e+00> : vector<8x32xf32>
    %49 = tpu.matmul %47, %48, %cst_28 {dimension_numbers = #tpu.dot_dimension_numbers<[1], [0], [0], [1], [0, 0, 1, 1], [], []>} : vector<8x8xf32>, vector<8x32xf32>, vector<8x32xf32> -> vector<8x32xf32>
    %50 = arith.addf %30, %49 : vector<8x32xf32>
    %51 = vector.extract_strided_slice %11 {offsets = [0, 16], sizes = [8, 8], strides = [1, 1]} : vector<16x96xf32> to vector<8x8xf32>
    %cst_29 = arith.constant 0.353553385 : f32
    %52 = vector.broadcast %cst_29 : f32 to vector<8x8xf32>
    %53 = arith.mulf %51, %52 : vector<8x8xf32>
    %54 = vector.extract_strided_slice %11 {offsets = [0, 48], sizes = [8, 8], strides = [1, 1]} : vector<16x96xf32> to vector<8x8xf32>
    %55 = vector.extract_strided_slice %11 {offsets = [0, 80], sizes = [8, 8], strides = [1, 1]} : vector<16x96xf32> to vector<8x8xf32>
    %cst_30 = arith.constant dense<0.000000e+00> : vector<8x8xf32>
    %56 = tpu.matmul %53, %54, %cst_30 {dimension_numbers = #tpu.dot_dimension_numbers<[1], [1], [0], [0], [0, 0, 1, 0], [], []>} : vector<8x8xf32>, vector<8x8xf32>, vector<8x8xf32> -> vector<8x8xf32>
    %cst_31 = arith.constant dense<0xFF800000> : vector<8xf32>
    %57 = vector.multi_reduction <maximumf>, %56, %cst_31 [1] : vector<8x8xf32> to vector<8xf32>
    %58 = vector.shape_cast %57 : vector<8xf32> to vector<8x1xf32>
    %59 = vector.broadcast %58 : vector<8x1xf32> to vector<8x8xf32>
    %60 = arith.subf %56, %59 : vector<8x8xf32>
    %61 = math.exp %60 : vector<8x8xf32>
    %cst_32 = arith.constant dense<0.000000e+00> : vector<8xf32>
    %62 = vector.multi_reduction <add>, %61, %cst_32 [1] : vector<8x8xf32> to vector<8xf32>
    %63 = vector.shape_cast %62 : vector<8xf32> to vector<8x1xf32>
    %64 = tpu.reciprocal %63 {approx = true} : vector<8x1xf32> -> vector<8x1xf32>
    %65 = vector.broadcast %64 : vector<8x1xf32> to vector<8x8xf32>
    %66 = arith.mulf %61, %65 : vector<8x8xf32>
    %cst_33 = arith.constant dense<0.000000e+00> : vector<8x8xf32>
    %67 = tpu.matmul %66, %55, %cst_33 {dimension_numbers = #tpu.dot_dimension_numbers<[1], [0], [0], [1], [0, 0, 1, 1], [], []>} : vector<8x8xf32>, vector<8x8xf32>, vector<8x8xf32> -> vector<8x8xf32>
    %68 = vector.extract_strided_slice %3 {offsets = [16, 0], sizes = [8, 32], strides = [1, 1]} : vector<32x32xf32> to vector<8x32xf32>
    %cst_34 = arith.constant dense<0.000000e+00> : vector<8x32xf32>
    %69 = tpu.matmul %67, %68, %cst_34 {dimension_numbers = #tpu.dot_dimension_numbers<[1], [0], [0], [1], [0, 0, 1, 1], [], []>} : vector<8x8xf32>, vector<8x32xf32>, vector<8x32xf32> -> vector<8x32xf32>
    %70 = arith.addf %50, %69 : vector<8x32xf32>
    %71 = vector.extract_strided_slice %11 {offsets = [0, 24], sizes = [8, 8], strides = [1, 1]} : vector<16x96xf32> to vector<8x8xf32>
    %cst_35 = arith.constant 0.353553385 : f32
    %72 = vector.broadcast %cst_35 : f32 to vector<8x8xf32>
    %73 = arith.mulf %71, %72 : vector<8x8xf32>
    %74 = vector.extract_strided_slice %11 {offsets = [0, 56], sizes = [8, 8], strides = [1, 1]} : vector<16x96xf32> to vector<8x8xf32>
    %75 = vector.extract_strided_slice %11 {offsets = [0, 88], sizes = [8, 8], strides = [1, 1]} : vector<16x96xf32> to vector<8x8xf32>
    %cst_36 = arith.constant dense<0.000000e+00> : vector<8x8xf32>
    %76 = tpu.matmul %73, %74, %cst_36 {dimension_numbers = #tpu.dot_dimension_numbers<[1], [1], [0], [0], [0, 0, 1, 0], [], []>} : vector<8x8xf32>, vector<8x8xf32>, vector<8x8xf32> -> vector<8x8xf32>
    %cst_37 = arith.constant dense<0xFF800000> : vector<8xf32>
    %77 = vector.multi_reduction <maximumf>, %76, %cst_37 [1] : vector<8x8xf32> to vector<8xf32>
    %78 = vector.shape_cast %77 : vector<8xf32> to vector<8x1xf32>
    %79 = vector.broadcast %78 : vector<8x1xf32> to vector<8x8xf32>
    %80 = arith.subf %76, %79 : vector<8x8xf32>
    %81 = math.exp %80 : vector<8x8xf32>
    %cst_38 = arith.constant dense<0.000000e+00> : vector<8xf32>
    %82 = vector.multi_reduction <add>, %81, %cst_38 [1] : vector<8x8xf32> to vector<8xf32>
    %83 = vector.shape_cast %82 : vector<8xf32> to vector<8x1xf32>
    %84 = tpu.reciprocal %83 {approx = true} : vector<8x1xf32> -> vector<8x1xf32>
    %85 = vector.broadcast %84 : vector<8x1xf32> to vector<8x8xf32>
    %86 = arith.mulf %81, %85 : vector<8x8xf32>
    %cst_39 = arith.constant dense<0.000000e+00> : vector<8x8xf32>
    %87 = tpu.matmul %86, %75, %cst_39 {dimension_numbers = #tpu.dot_dimension_numbers<[1], [0], [0], [1], [0, 0, 1, 1], [], []>} : vector<8x8xf32>, vector<8x8xf32>, vector<8x8xf32> -> vector<8x8xf32>
    %88 = vector.extract_strided_slice %3 {offsets = [24, 0], sizes = [8, 32], strides = [1, 1]} : vector<32x32xf32> to vector<8x32xf32>
    %cst_40 = arith.constant dense<0.000000e+00> : vector<8x32xf32>
    %89 = tpu.matmul %87, %88, %cst_40 {dimension_numbers = #tpu.dot_dimension_numbers<[1], [0], [0], [1], [0, 0, 1, 1], [], []>} : vector<8x8xf32>, vector<8x32xf32>, vector<8x32xf32> -> vector<8x32xf32>
    %90 = arith.addf %70, %89 : vector<8x32xf32>
    %91 = vector.extract_strided_slice %11 {offsets = [8, 0], sizes = [8, 8], strides = [1, 1]} : vector<16x96xf32> to vector<8x8xf32>
    %cst_41 = arith.constant 0.353553385 : f32
    %92 = vector.broadcast %cst_41 : f32 to vector<8x8xf32>
    %93 = arith.mulf %91, %92 : vector<8x8xf32>
    %94 = vector.extract_strided_slice %11 {offsets = [8, 32], sizes = [8, 8], strides = [1, 1]} : vector<16x96xf32> to vector<8x8xf32>
    %95 = vector.extract_strided_slice %11 {offsets = [8, 64], sizes = [8, 8], strides = [1, 1]} : vector<16x96xf32> to vector<8x8xf32>
    %cst_42 = arith.constant dense<0.000000e+00> : vector<8x8xf32>
    %96 = tpu.matmul %93, %94, %cst_42 {dimension_numbers = #tpu.dot_dimension_numbers<[1], [1], [0], [0], [0, 0, 1, 0], [], []>} : vector<8x8xf32>, vector<8x8xf32>, vector<8x8xf32> -> vector<8x8xf32>
    %cst_43 = arith.constant dense<0xFF800000> : vector<8xf32>
    %97 = vector.multi_reduction <maximumf>, %96, %cst_43 [1] : vector<8x8xf32> to vector<8xf32>
    %98 = vector.shape_cast %97 : vector<8xf32> to vector<8x1xf32>
    %99 = vector.broadcast %98 : vector<8x1xf32> to vector<8x8xf32>
    %100 = arith.subf %96, %99 : vector<8x8xf32>
    %101 = math.exp %100 : vector<8x8xf32>
    %cst_44 = arith.constant dense<0.000000e+00> : vector<8xf32>
    %102 = vector.multi_reduction <add>, %101, %cst_44 [1] : vector<8x8xf32> to vector<8xf32>
    %103 = vector.shape_cast %102 : vector<8xf32> to vector<8x1xf32>
    %104 = tpu.reciprocal %103 {approx = true} : vector<8x1xf32> -> vector<8x1xf32>
    %105 = vector.broadcast %104 : vector<8x1xf32> to vector<8x8xf32>
    %106 = arith.mulf %101, %105 : vector<8x8xf32>
    %cst_45 = arith.constant dense<0.000000e+00> : vector<8x8xf32>
    %107 = tpu.matmul %106, %95, %cst_45 {dimension_numbers = #tpu.dot_dimension_numbers<[1], [0], [0], [1], [0, 0, 1, 1], [], []>} : vector<8x8xf32>, vector<8x8xf32>, vector<8x8xf32> -> vector<8x8xf32>
    %108 = vector.extract_strided_slice %3 {offsets = [0, 0], sizes = [8, 32], strides = [1, 1]} : vector<32x32xf32> to vector<8x32xf32>
    %cst_46 = arith.constant dense<0.000000e+00> : vector<8x32xf32>
    %109 = tpu.matmul %107, %108, %cst_46 {dimension_numbers = #tpu.dot_dimension_numbers<[1], [0], [0], [1], [0, 0, 1, 1], [], []>} : vector<8x8xf32>, vector<8x32xf32>, vector<8x32xf32> -> vector<8x32xf32>
    %110 = vector.extract_strided_slice %11 {offsets = [8, 8], sizes = [8, 8], strides = [1, 1]} : vector<16x96xf32> to vector<8x8xf32>
    %cst_47 = arith.constant 0.353553385 : f32
    %111 = vector.broadcast %cst_47 : f32 to vector<8x8xf32>
    %112 = arith.mulf %110, %111 : vector<8x8xf32>
    %113 = vector.extract_strided_slice %11 {offsets = [8, 40], sizes = [8, 8], strides = [1, 1]} : vector<16x96xf32> to vector<8x8xf32>
    %114 = vector.extract_strided_slice %11 {offsets = [8, 72], sizes = [8, 8], strides = [1, 1]} : vector<16x96xf32> to vector<8x8xf32>
    %cst_48 = arith.constant dense<0.000000e+00> : vector<8x8xf32>
    %115 = tpu.matmul %112, %113, %cst_48 {dimension_numbers = #tpu.dot_dimension_numbers<[1], [1], [0], [0], [0, 0, 1, 0], [], []>} : vector<8x8xf32>, vector<8x8xf32>, vector<8x8xf32> -> vector<8x8xf32>
    %cst_49 = arith.constant dense<0xFF800000> : vector<8xf32>
    %116 = vector.multi_reduction <maximumf>, %115, %cst_49 [1] : vector<8x8xf32> to vector<8xf32>
    %117 = vector.shape_cast %116 : vector<8xf32> to vector<8x1xf32>
    %118 = vector.broadcast %117 : vector<8x1xf32> to vector<8x8xf32>
    %119 = arith.subf %115, %118 : vector<8x8xf32>
    %120 = math.exp %119 : vector<8x8xf32>
    %cst_50 = arith.constant dense<0.000000e+00> : vector<8xf32>
    %121 = vector.multi_reduction <add>, %120, %cst_50 [1] : vector<8x8xf32> to vector<8xf32>
    %122 = vector.shape_cast %121 : vector<8xf32> to vector<8x1xf32>
    %123 = tpu.reciprocal %122 {approx = true} : vector<8x1xf32> -> vector<8x1xf32>
    %124 = vector.broadcast %123 : vector<8x1xf32> to vector<8x8xf32>
    %125 = arith.mulf %120, %124 : vector<8x8xf32>
    %cst_51 = arith.constant dense<0.000000e+00> : vector<8x8xf32>
    %126 = tpu.matmul %125, %114, %cst_51 {dimension_numbers = #tpu.dot_dimension_numbers<[1], [0], [0], [1], [0, 0, 1, 1], [], []>} : vector<8x8xf32>, vector<8x8xf32>, vector<8x8xf32> -> vector<8x8xf32>
    %127 = vector.extract_strided_slice %3 {offsets = [8, 0], sizes = [8, 32], strides = [1, 1]} : vector<32x32xf32> to vector<8x32xf32>
    %cst_52 = arith.constant dense<0.000000e+00> : vector<8x32xf32>
    %128 = tpu.matmul %126, %127, %cst_52 {dimension_numbers = #tpu.dot_dimension_numbers<[1], [0], [0], [1], [0, 0, 1, 1], [], []>} : vector<8x8xf32>, vector<8x32xf32>, vector<8x32xf32> -> vector<8x32xf32>
    %129 = arith.addf %109, %128 : vector<8x32xf32>
    %130 = vector.extract_strided_slice %11 {offsets = [8, 16], sizes = [8, 8], strides = [1, 1]} : vector<16x96xf32> to vector<8x8xf32>
    %cst_53 = arith.constant 0.353553385 : f32
    %131 = vector.broadcast %cst_53 : f32 to vector<8x8xf32>
    %132 = arith.mulf %130, %131 : vector<8x8xf32>
    %133 = vector.extract_strided_slice %11 {offsets = [8, 48], sizes = [8, 8], strides = [1, 1]} : vector<16x96xf32> to vector<8x8xf32>
    %134 = vector.extract_strided_slice %11 {offsets = [8, 80], sizes = [8, 8], strides = [1, 1]} : vector<16x96xf32> to vector<8x8xf32>
    %cst_54 = arith.constant dense<0.000000e+00> : vector<8x8xf32>
    %135 = tpu.matmul %132, %133, %cst_54 {dimension_numbers = #tpu.dot_dimension_numbers<[1], [1], [0], [0], [0, 0, 1, 0], [], []>} : vector<8x8xf32>, vector<8x8xf32>, vector<8x8xf32> -> vector<8x8xf32>
    %cst_55 = arith.constant dense<0xFF800000> : vector<8xf32>
    %136 = vector.multi_reduction <maximumf>, %135, %cst_55 [1] : vector<8x8xf32> to vector<8xf32>
    %137 = vector.shape_cast %136 : vector<8xf32> to vector<8x1xf32>
    %138 = vector.broadcast %137 : vector<8x1xf32> to vector<8x8xf32>
    %139 = arith.subf %135, %138 : vector<8x8xf32>
    %140 = math.exp %139 : vector<8x8xf32>
    %cst_56 = arith.constant dense<0.000000e+00> : vector<8xf32>
    %141 = vector.multi_reduction <add>, %140, %cst_56 [1] : vector<8x8xf32> to vector<8xf32>
    %142 = vector.shape_cast %141 : vector<8xf32> to vector<8x1xf32>
    %143 = tpu.reciprocal %142 {approx = true} : vector<8x1xf32> -> vector<8x1xf32>
    %144 = vector.broadcast %143 : vector<8x1xf32> to vector<8x8xf32>
    %145 = arith.mulf %140, %144 : vector<8x8xf32>
    %cst_57 = arith.constant dense<0.000000e+00> : vector<8x8xf32>
    %146 = tpu.matmul %145, %134, %cst_57 {dimension_numbers = #tpu.dot_dimension_numbers<[1], [0], [0], [1], [0, 0, 1, 1], [], []>} : vector<8x8xf32>, vector<8x8xf32>, vector<8x8xf32> -> vector<8x8xf32>
    %147 = vector.extract_strided_slice %3 {offsets = [16, 0], sizes = [8, 32], strides = [1, 1]} : vector<32x32xf32> to vector<8x32xf32>
    %cst_58 = arith.constant dense<0.000000e+00> : vector<8x32xf32>
    %148 = tpu.matmul %146, %147, %cst_58 {dimension_numbers = #tpu.dot_dimension_numbers<[1], [0], [0], [1], [0, 0, 1, 1], [], []>} : vector<8x8xf32>, vector<8x32xf32>, vector<8x32xf32> -> vector<8x32xf32>
    %149 = arith.addf %129, %148 : vector<8x32xf32>
    %150 = vector.extract_strided_slice %11 {offsets = [8, 24], sizes = [8, 8], strides = [1, 1]} : vector<16x96xf32> to vector<8x8xf32>
    %cst_59 = arith.constant 0.353553385 : f32
    %151 = vector.broadcast %cst_59 : f32 to vector<8x8xf32>
    %152 = arith.mulf %150, %151 : vector<8x8xf32>
    %153 = vector.extract_strided_slice %11 {offsets = [8, 56], sizes = [8, 8], strides = [1, 1]} : vector<16x96xf32> to vector<8x8xf32>
    %154 = vector.extract_strided_slice %11 {offsets = [8, 88], sizes = [8, 8], strides = [1, 1]} : vector<16x96xf32> to vector<8x8xf32>
    %cst_60 = arith.constant dense<0.000000e+00> : vector<8x8xf32>
    %155 = tpu.matmul %152, %153, %cst_60 {dimension_numbers = #tpu.dot_dimension_numbers<[1], [1], [0], [0], [0, 0, 1, 0], [], []>} : vector<8x8xf32>, vector<8x8xf32>, vector<8x8xf32> -> vector<8x8xf32>
    %cst_61 = arith.constant dense<0xFF800000> : vector<8xf32>
    %156 = vector.multi_reduction <maximumf>, %155, %cst_61 [1] : vector<8x8xf32> to vector<8xf32>
    %157 = vector.shape_cast %156 : vector<8xf32> to vector<8x1xf32>
    %158 = vector.broadcast %157 : vector<8x1xf32> to vector<8x8xf32>
    %159 = arith.subf %155, %158 : vector<8x8xf32>
    %160 = math.exp %159 : vector<8x8xf32>
    %cst_62 = arith.constant dense<0.000000e+00> : vector<8xf32>
    %161 = vector.multi_reduction <add>, %160, %cst_62 [1] : vector<8x8xf32> to vector<8xf32>
    %162 = vector.shape_cast %161 : vector<8xf32> to vector<8x1xf32>
    %163 = tpu.reciprocal %162 {approx = true} : vector<8x1xf32> -> vector<8x1xf32>
    %164 = vector.broadcast %163 : vector<8x1xf32> to vector<8x8xf32>
    %165 = arith.mulf %160, %164 : vector<8x8xf32>
    %cst_63 = arith.constant dense<0.000000e+00> : vector<8x8xf32>
    %166 = tpu.matmul %165, %154, %cst_63 {dimension_numbers = #tpu.dot_dimension_numbers<[1], [0], [0], [1], [0, 0, 1, 1], [], []>} : vector<8x8xf32>, vector<8x8xf32>, vector<8x8xf32> -> vector<8x8xf32>
    %167 = vector.extract_strided_slice %3 {offsets = [24, 0], sizes = [8, 32], strides = [1, 1]} : vector<32x32xf32> to vector<8x32xf32>
    %cst_64 = arith.constant dense<0.000000e+00> : vector<8x32xf32>
    %168 = tpu.matmul %166, %167, %cst_64 {dimension_numbers = #tpu.dot_dimension_numbers<[1], [0], [0], [1], [0, 0, 1, 1], [], []>} : vector<8x8xf32>, vector<8x32xf32>, vector<8x32xf32> -> vector<8x32xf32>
    %169 = arith.addf %149, %168 : vector<8x32xf32>
    %170 = tpu.concatenate %90, %169 in 0 : vector<8x32xf32>, vector<8x32xf32> -> vector<16x32xf32>
    %171 = vector.broadcast %4 : vector<1x32xf32> to vector<16x32xf32>
    %172 = arith.addf %170, %171 : vector<16x32xf32>
    %173 = arith.addf %0, %172 : vector<16x32xf32>
    %cst_65 = arith.constant dense<0.000000e+00> : vector<16xf32>
    %174 = vector.multi_reduction <add>, %173, %cst_65 [1] : vector<16x32xf32> to vector<16xf32>
    %175 = vector.shape_cast %174 : vector<16xf32> to vector<16x1xf32>
    %cst_66 = arith.constant 3.200000e+01 : f32
    %176 = vector.broadcast %cst_66 : f32 to vector<16x1xf32>
    %177 = arith.divf %175, %176 : vector<16x1xf32>
    %178 = vector.broadcast %177 : vector<16x1xf32> to vector<16x32xf32>
    %179 = arith.subf %173, %178 : vector<16x32xf32>
    %180 = arith.mulf %179, %179 : vector<16x32xf32>
    %cst_67 = arith.constant dense<0.000000e+00> : vector<16xf32>
    %181 = vector.multi_reduction <add>, %180, %cst_67 [1] : vector<16x32xf32> to vector<16xf32>
    %182 = vector.shape_cast %181 : vector<16xf32> to vector<16x1xf32>
    %cst_68 = arith.constant 3.200000e+01 : f32
    %183 = vector.broadcast %cst_68 : f32 to vector<16x1xf32>
    %184 = arith.divf %182, %183 : vector<16x1xf32>
    %185 = vector.broadcast %177 : vector<16x1xf32> to vector<16x32xf32>
    %186 = arith.subf %173, %185 : vector<16x32xf32>
    %cst_69 = arith.constant 9.99999974E-6 : f32
    %187 = vector.broadcast %cst_69 : f32 to vector<16x1xf32>
    %188 = arith.addf %184, %187 : vector<16x1xf32>
    %189 = math.rsqrt %188 : vector<16x1xf32>
    %190 = vector.broadcast %189 : vector<16x1xf32> to vector<16x32xf32>
    %191 = arith.mulf %186, %190 : vector<16x32xf32>
    %192 = vector.broadcast %5 : vector<1x32xf32> to vector<16x32xf32>
    %193 = arith.mulf %191, %192 : vector<16x32xf32>
    %194 = vector.broadcast %6 : vector<1x32xf32> to vector<16x32xf32>
    %195 = arith.addf %193, %194 : vector<16x32xf32>
    %c0_70 = arith.constant 0 : index
    %c0_71 = arith.constant 0 : index
    %196 = vector.load %arg9[%c0_70, %c0_71] : memref<32x64xf32, #tpu.memory_space<vmem>>, vector<32x64xf32>
    %c0_72 = arith.constant 0 : index
    %c0_73 = arith.constant 0 : index
    %197 = vector.load %arg10[%c0_72, %c0_73] : memref<1x64xf32, #tpu.memory_space<vmem>>, vector<1x64xf32>
    %c0_74 = arith.constant 0 : index
    %c0_75 = arith.constant 0 : index
    %198 = vector.load %arg11[%c0_74, %c0_75] : memref<64x32xf32, #tpu.memory_space<vmem>>, vector<64x32xf32>
    %c0_76 = arith.constant 0 : index
    %c0_77 = arith.constant 0 : index
    %199 = vector.load %arg12[%c0_76, %c0_77] : memref<1x32xf32, #tpu.memory_space<vmem>>, vector<1x32xf32>
    %cst_78 = arith.constant dense<0.000000e+00> : vector<16x64xf32>
    %200 = tpu.matmul %195, %196, %cst_78 {dimension_numbers = #tpu.dot_dimension_numbers<[1], [0], [0], [1], [0, 0, 1, 1], [], []>} : vector<16x32xf32>, vector<32x64xf32>, vector<16x64xf32> -> vector<16x64xf32>
    %201 = vector.broadcast %197 : vector<1x64xf32> to vector<16x64xf32>
    %202 = arith.addf %200, %201 : vector<16x64xf32>
    %cst_79 = arith.constant 0.000000e+00 : f32
    %203 = vector.broadcast %cst_79 : f32 to vector<16x64xf32>
    %204 = arith.maximumf %202, %203 : vector<16x64xf32>
    %cst_80 = arith.constant dense<0.000000e+00> : vector<16x32xf32>
    %205 = tpu.matmul %204, %198, %cst_80 {dimension_numbers = #tpu.dot_dimension_numbers<[1], [0], [0], [1], [0, 0, 1, 1], [], []>} : vector<16x64xf32>, vector<64x32xf32>, vector<16x32xf32> -> vector<16x32xf32>
    %206 = vector.broadcast %199 : vector<1x32xf32> to vector<16x32xf32>
    %207 = arith.addf %205, %206 : vector<16x32xf32>
    %208 = arith.addf %195, %207 : vector<16x32xf32>
    %cst_81 = arith.constant dense<0.000000e+00> : vector<16xf32>
    %209 = vector.multi_reduction <add>, %208, %cst_81 [1] : vector<16x32xf32> to vector<16xf32>
    %210 = vector.shape_cast %209 : vector<16xf32> to vector<16x1xf32>
    %cst_82 = arith.constant 3.200000e+01 : f32
    %211 = vector.broadcast %cst_82 : f32 to vector<16x1xf32>
    %212 = arith.divf %210, %211 : vector<16x1xf32>
    %213 = vector.broadcast %212 : vector<16x1xf32> to vector<16x32xf32>
    %214 = arith.subf %208, %213 : vector<16x32xf32>
    %215 = arith.mulf %214, %214 : vector<16x32xf32>
    %cst_83 = arith.constant dense<0.000000e+00> : vector<16xf32>
    %216 = vector.multi_reduction <add>, %215, %cst_83 [1] : vector<16x32xf32> to vector<16xf32>
    %217 = vector.shape_cast %216 : vector<16xf32> to vector<16x1xf32>
    %cst_84 = arith.constant 3.200000e+01 : f32
    %218 = vector.broadcast %cst_84 : f32 to vector<16x1xf32>
    %219 = arith.divf %217, %218 : vector<16x1xf32>
    %220 = vector.broadcast %212 : vector<16x1xf32> to vector<16x32xf32>
    %221 = arith.subf %208, %220 : vector<16x32xf32>
    %cst_85 = arith.constant 9.99999974E-6 : f32
    %222 = vector.broadcast %cst_85 : f32 to vector<16x1xf32>
    %223 = arith.addf %219, %222 : vector<16x1xf32>
    %224 = math.rsqrt %223 : vector<16x1xf32>
    %225 = vector.broadcast %224 : vector<16x1xf32> to vector<16x32xf32>
    %226 = arith.mulf %221, %225 : vector<16x32xf32>
    %227 = vector.broadcast %7 : vector<1x32xf32> to vector<16x32xf32>
    %228 = arith.mulf %226, %227 : vector<16x32xf32>
    %229 = vector.broadcast %8 : vector<1x32xf32> to vector<16x32xf32>
    %230 = arith.addf %228, %229 : vector<16x32xf32>
    %c0_86 = arith.constant 0 : index
    %c0_87 = arith.constant 0 : index
    %231 = vector.load %arg13[%c0_86, %c0_87] : memref<32x96xf32, #tpu.memory_space<vmem>>, vector<32x96xf32>
    %c0_88 = arith.constant 0 : index
    %c0_89 = arith.constant 0 : index
    %232 = vector.load %arg14[%c0_88, %c0_89] : memref<1x96xf32, #tpu.memory_space<vmem>>, vector<1x96xf32>
    %c0_90 = arith.constant 0 : index
    %c0_91 = arith.constant 0 : index
    %233 = vector.load %arg15[%c0_90, %c0_91] : memref<32x32xf32, #tpu.memory_space<vmem>>, vector<32x32xf32>
    %c0_92 = arith.constant 0 : index
    %c0_93 = arith.constant 0 : index
    %234 = vector.load %arg16[%c0_92, %c0_93] : memref<1x32xf32, #tpu.memory_space<vmem>>, vector<1x32xf32>
    %c0_94 = arith.constant 0 : index
    %c0_95 = arith.constant 0 : index
    %235 = vector.load %arg17[%c0_94, %c0_95] : memref<1x32xf32, #tpu.memory_space<vmem>>, vector<1x32xf32>
    %c0_96 = arith.constant 0 : index
    %c0_97 = arith.constant 0 : index
    %236 = vector.load %arg18[%c0_96, %c0_97] : memref<1x32xf32, #tpu.memory_space<vmem>>, vector<1x32xf32>
    %c0_98 = arith.constant 0 : index
    %c0_99 = arith.constant 0 : index
    %237 = vector.load %arg19[%c0_98, %c0_99] : memref<1x32xf32, #tpu.memory_space<vmem>>, vector<1x32xf32>
    %c0_100 = arith.constant 0 : index
    %c0_101 = arith.constant 0 : index
    %238 = vector.load %arg20[%c0_100, %c0_101] : memref<1x32xf32, #tpu.memory_space<vmem>>, vector<1x32xf32>
    %cst_102 = arith.constant dense<0.000000e+00> : vector<16x96xf32>
    %239 = tpu.matmul %230, %231, %cst_102 {dimension_numbers = #tpu.dot_dimension_numbers<[1], [0], [0], [1], [0, 0, 1, 1], [], []>} : vector<16x32xf32>, vector<32x96xf32>, vector<16x96xf32> -> vector<16x96xf32>
    %240 = vector.broadcast %232 : vector<1x96xf32> to vector<16x96xf32>
    %241 = arith.addf %239, %240 : vector<16x96xf32>
    %242 = vector.extract_strided_slice %241 {offsets = [0, 0], sizes = [8, 8], strides = [1, 1]} : vector<16x96xf32> to vector<8x8xf32>
    %cst_103 = arith.constant 0.353553385 : f32
    %243 = vector.broadcast %cst_103 : f32 to vector<8x8xf32>
    %244 = arith.mulf %242, %243 : vector<8x8xf32>
    %245 = vector.extract_strided_slice %241 {offsets = [0, 32], sizes = [8, 8], strides = [1, 1]} : vector<16x96xf32> to vector<8x8xf32>
    %246 = vector.extract_strided_slice %241 {offsets = [0, 64], sizes = [8, 8], strides = [1, 1]} : vector<16x96xf32> to vector<8x8xf32>
    %cst_104 = arith.constant dense<0.000000e+00> : vector<8x8xf32>
    %247 = tpu.matmul %244, %245, %cst_104 {dimension_numbers = #tpu.dot_dimension_numbers<[1], [1], [0], [0], [0, 0, 1, 0], [], []>} : vector<8x8xf32>, vector<8x8xf32>, vector<8x8xf32> -> vector<8x8xf32>
    %cst_105 = arith.constant dense<0xFF800000> : vector<8xf32>
    %248 = vector.multi_reduction <maximumf>, %247, %cst_105 [1] : vector<8x8xf32> to vector<8xf32>
    %249 = vector.shape_cast %248 : vector<8xf32> to vector<8x1xf32>
    %250 = vector.broadcast %249 : vector<8x1xf32> to vector<8x8xf32>
    %251 = arith.subf %247, %250 : vector<8x8xf32>
    %252 = math.exp %251 : vector<8x8xf32>
    %cst_106 = arith.constant dense<0.000000e+00> : vector<8xf32>
    %253 = vector.multi_reduction <add>, %252, %cst_106 [1] : vector<8x8xf32> to vector<8xf32>
    %254 = vector.shape_cast %253 : vector<8xf32> to vector<8x1xf32>
    %255 = tpu.reciprocal %254 {approx = true} : vector<8x1xf32> -> vector<8x1xf32>
    %256 = vector.broadcast %255 : vector<8x1xf32> to vector<8x8xf32>
    %257 = arith.mulf %252, %256 : vector<8x8xf32>
    %cst_107 = arith.constant dense<0.000000e+00> : vector<8x8xf32>
    %258 = tpu.matmul %257, %246, %cst_107 {dimension_numbers = #tpu.dot_dimension_numbers<[1], [0], [0], [1], [0, 0, 1, 1], [], []>} : vector<8x8xf32>, vector<8x8xf32>, vector<8x8xf32> -> vector<8x8xf32>
    %259 = vector.extract_strided_slice %233 {offsets = [0, 0], sizes = [8, 32], strides = [1, 1]} : vector<32x32xf32> to vector<8x32xf32>
    %cst_108 = arith.constant dense<0.000000e+00> : vector<8x32xf32>
    %260 = tpu.matmul %258, %259, %cst_108 {dimension_numbers = #tpu.dot_dimension_numbers<[1], [0], [0], [1], [0, 0, 1, 1], [], []>} : vector<8x8xf32>, vector<8x32xf32>, vector<8x32xf32> -> vector<8x32xf32>
    %261 = vector.extract_strided_slice %241 {offsets = [0, 8], sizes = [8, 8], strides = [1, 1]} : vector<16x96xf32> to vector<8x8xf32>
    %cst_109 = arith.constant 0.353553385 : f32
    %262 = vector.broadcast %cst_109 : f32 to vector<8x8xf32>
    %263 = arith.mulf %261, %262 : vector<8x8xf32>
    %264 = vector.extract_strided_slice %241 {offsets = [0, 40], sizes = [8, 8], strides = [1, 1]} : vector<16x96xf32> to vector<8x8xf32>
    %265 = vector.extract_strided_slice %241 {offsets = [0, 72], sizes = [8, 8], strides = [1, 1]} : vector<16x96xf32> to vector<8x8xf32>
    %cst_110 = arith.constant dense<0.000000e+00> : vector<8x8xf32>
    %266 = tpu.matmul %263, %264, %cst_110 {dimension_numbers = #tpu.dot_dimension_numbers<[1], [1], [0], [0], [0, 0, 1, 0], [], []>} : vector<8x8xf32>, vector<8x8xf32>, vector<8x8xf32> -> vector<8x8xf32>
    %cst_111 = arith.constant dense<0xFF800000> : vector<8xf32>
    %267 = vector.multi_reduction <maximumf>, %266, %cst_111 [1] : vector<8x8xf32> to vector<8xf32>
    %268 = vector.shape_cast %267 : vector<8xf32> to vector<8x1xf32>
    %269 = vector.broadcast %268 : vector<8x1xf32> to vector<8x8xf32>
    %270 = arith.subf %266, %269 : vector<8x8xf32>
    %271 = math.exp %270 : vector<8x8xf32>
    %cst_112 = arith.constant dense<0.000000e+00> : vector<8xf32>
    %272 = vector.multi_reduction <add>, %271, %cst_112 [1] : vector<8x8xf32> to vector<8xf32>
    %273 = vector.shape_cast %272 : vector<8xf32> to vector<8x1xf32>
    %274 = tpu.reciprocal %273 {approx = true} : vector<8x1xf32> -> vector<8x1xf32>
    %275 = vector.broadcast %274 : vector<8x1xf32> to vector<8x8xf32>
    %276 = arith.mulf %271, %275 : vector<8x8xf32>
    %cst_113 = arith.constant dense<0.000000e+00> : vector<8x8xf32>
    %277 = tpu.matmul %276, %265, %cst_113 {dimension_numbers = #tpu.dot_dimension_numbers<[1], [0], [0], [1], [0, 0, 1, 1], [], []>} : vector<8x8xf32>, vector<8x8xf32>, vector<8x8xf32> -> vector<8x8xf32>
    %278 = vector.extract_strided_slice %233 {offsets = [8, 0], sizes = [8, 32], strides = [1, 1]} : vector<32x32xf32> to vector<8x32xf32>
    %cst_114 = arith.constant dense<0.000000e+00> : vector<8x32xf32>
    %279 = tpu.matmul %277, %278, %cst_114 {dimension_numbers = #tpu.dot_dimension_numbers<[1], [0], [0], [1], [0, 0, 1, 1], [], []>} : vector<8x8xf32>, vector<8x32xf32>, vector<8x32xf32> -> vector<8x32xf32>
    %280 = arith.addf %260, %279 : vector<8x32xf32>
    %281 = vector.extract_strided_slice %241 {offsets = [0, 16], sizes = [8, 8], strides = [1, 1]} : vector<16x96xf32> to vector<8x8xf32>
    %cst_115 = arith.constant 0.353553385 : f32
    %282 = vector.broadcast %cst_115 : f32 to vector<8x8xf32>
    %283 = arith.mulf %281, %282 : vector<8x8xf32>
    %284 = vector.extract_strided_slice %241 {offsets = [0, 48], sizes = [8, 8], strides = [1, 1]} : vector<16x96xf32> to vector<8x8xf32>
    %285 = vector.extract_strided_slice %241 {offsets = [0, 80], sizes = [8, 8], strides = [1, 1]} : vector<16x96xf32> to vector<8x8xf32>
    %cst_116 = arith.constant dense<0.000000e+00> : vector<8x8xf32>
    %286 = tpu.matmul %283, %284, %cst_116 {dimension_numbers = #tpu.dot_dimension_numbers<[1], [1], [0], [0], [0, 0, 1, 0], [], []>} : vector<8x8xf32>, vector<8x8xf32>, vector<8x8xf32> -> vector<8x8xf32>
    %cst_117 = arith.constant dense<0xFF800000> : vector<8xf32>
    %287 = vector.multi_reduction <maximumf>, %286, %cst_117 [1] : vector<8x8xf32> to vector<8xf32>
    %288 = vector.shape_cast %287 : vector<8xf32> to vector<8x1xf32>
    %289 = vector.broadcast %288 : vector<8x1xf32> to vector<8x8xf32>
    %290 = arith.subf %286, %289 : vector<8x8xf32>
    %291 = math.exp %290 : vector<8x8xf32>
    %cst_118 = arith.constant dense<0.000000e+00> : vector<8xf32>
    %292 = vector.multi_reduction <add>, %291, %cst_118 [1] : vector<8x8xf32> to vector<8xf32>
    %293 = vector.shape_cast %292 : vector<8xf32> to vector<8x1xf32>
    %294 = tpu.reciprocal %293 {approx = true} : vector<8x1xf32> -> vector<8x1xf32>
    %295 = vector.broadcast %294 : vector<8x1xf32> to vector<8x8xf32>
    %296 = arith.mulf %291, %295 : vector<8x8xf32>
    %cst_119 = arith.constant dense<0.000000e+00> : vector<8x8xf32>
    %297 = tpu.matmul %296, %285, %cst_119 {dimension_numbers = #tpu.dot_dimension_numbers<[1], [0], [0], [1], [0, 0, 1, 1], [], []>} : vector<8x8xf32>, vector<8x8xf32>, vector<8x8xf32> -> vector<8x8xf32>
    %298 = vector.extract_strided_slice %233 {offsets = [16, 0], sizes = [8, 32], strides = [1, 1]} : vector<32x32xf32> to vector<8x32xf32>
    %cst_120 = arith.constant dense<0.000000e+00> : vector<8x32xf32>
    %299 = tpu.matmul %297, %298, %cst_120 {dimension_numbers = #tpu.dot_dimension_numbers<[1], [0], [0], [1], [0, 0, 1, 1], [], []>} : vector<8x8xf32>, vector<8x32xf32>, vector<8x32xf32> -> vector<8x32xf32>
    %300 = arith.addf %280, %299 : vector<8x32xf32>
    %301 = vector.extract_strided_slice %241 {offsets = [0, 24], sizes = [8, 8], strides = [1, 1]} : vector<16x96xf32> to vector<8x8xf32>
    %cst_121 = arith.constant 0.353553385 : f32
    %302 = vector.broadcast %cst_121 : f32 to vector<8x8xf32>
    %303 = arith.mulf %301, %302 : vector<8x8xf32>
    %304 = vector.extract_strided_slice %241 {offsets = [0, 56], sizes = [8, 8], strides = [1, 1]} : vector<16x96xf32> to vector<8x8xf32>
    %305 = vector.extract_strided_slice %241 {offsets = [0, 88], sizes = [8, 8], strides = [1, 1]} : vector<16x96xf32> to vector<8x8xf32>
    %cst_122 = arith.constant dense<0.000000e+00> : vector<8x8xf32>
    %306 = tpu.matmul %303, %304, %cst_122 {dimension_numbers = #tpu.dot_dimension_numbers<[1], [1], [0], [0], [0, 0, 1, 0], [], []>} : vector<8x8xf32>, vector<8x8xf32>, vector<8x8xf32> -> vector<8x8xf32>
    %cst_123 = arith.constant dense<0xFF800000> : vector<8xf32>
    %307 = vector.multi_reduction <maximumf>, %306, %cst_123 [1] : vector<8x8xf32> to vector<8xf32>
    %308 = vector.shape_cast %307 : vector<8xf32> to vector<8x1xf32>
    %309 = vector.broadcast %308 : vector<8x1xf32> to vector<8x8xf32>
    %310 = arith.subf %306, %309 : vector<8x8xf32>
    %311 = math.exp %310 : vector<8x8xf32>
    %cst_124 = arith.constant dense<0.000000e+00> : vector<8xf32>
    %312 = vector.multi_reduction <add>, %311, %cst_124 [1] : vector<8x8xf32> to vector<8xf32>
    %313 = vector.shape_cast %312 : vector<8xf32> to vector<8x1xf32>
    %314 = tpu.reciprocal %313 {approx = true} : vector<8x1xf32> -> vector<8x1xf32>
    %315 = vector.broadcast %314 : vector<8x1xf32> to vector<8x8xf32>
    %316 = arith.mulf %311, %315 : vector<8x8xf32>
    %cst_125 = arith.constant dense<0.000000e+00> : vector<8x8xf32>
    %317 = tpu.matmul %316, %305, %cst_125 {dimension_numbers = #tpu.dot_dimension_numbers<[1], [0], [0], [1], [0, 0, 1, 1], [], []>} : vector<8x8xf32>, vector<8x8xf32>, vector<8x8xf32> -> vector<8x8xf32>
    %318 = vector.extract_strided_slice %233 {offsets = [24, 0], sizes = [8, 32], strides = [1, 1]} : vector<32x32xf32> to vector<8x32xf32>
    %cst_126 = arith.constant dense<0.000000e+00> : vector<8x32xf32>
    %319 = tpu.matmul %317, %318, %cst_126 {dimension_numbers = #tpu.dot_dimension_numbers<[1], [0], [0], [1], [0, 0, 1, 1], [], []>} : vector<8x8xf32>, vector<8x32xf32>, vector<8x32xf32> -> vector<8x32xf32>
    %320 = arith.addf %300, %319 : vector<8x32xf32>
    %321 = vector.extract_strided_slice %241 {offsets = [8, 0], sizes = [8, 8], strides = [1, 1]} : vector<16x96xf32> to vector<8x8xf32>
    %cst_127 = arith.constant 0.353553385 : f32
    %322 = vector.broadcast %cst_127 : f32 to vector<8x8xf32>
    %323 = arith.mulf %321, %322 : vector<8x8xf32>
    %324 = vector.extract_strided_slice %241 {offsets = [8, 32], sizes = [8, 8], strides = [1, 1]} : vector<16x96xf32> to vector<8x8xf32>
    %325 = vector.extract_strided_slice %241 {offsets = [8, 64], sizes = [8, 8], strides = [1, 1]} : vector<16x96xf32> to vector<8x8xf32>
    %cst_128 = arith.constant dense<0.000000e+00> : vector<8x8xf32>
    %326 = tpu.matmul %323, %324, %cst_128 {dimension_numbers = #tpu.dot_dimension_numbers<[1], [1], [0], [0], [0, 0, 1, 0], [], []>} : vector<8x8xf32>, vector<8x8xf32>, vector<8x8xf32> -> vector<8x8xf32>
    %cst_129 = arith.constant dense<0xFF800000> : vector<8xf32>
    %327 = vector.multi_reduction <maximumf>, %326, %cst_129 [1] : vector<8x8xf32> to vector<8xf32>
    %328 = vector.shape_cast %327 : vector<8xf32> to vector<8x1xf32>
    %329 = vector.broadcast %328 : vector<8x1xf32> to vector<8x8xf32>
    %330 = arith.subf %326, %329 : vector<8x8xf32>
    %331 = math.exp %330 : vector<8x8xf32>
    %cst_130 = arith.constant dense<0.000000e+00> : vector<8xf32>
    %332 = vector.multi_reduction <add>, %331, %cst_130 [1] : vector<8x8xf32> to vector<8xf32>
    %333 = vector.shape_cast %332 : vector<8xf32> to vector<8x1xf32>
    %334 = tpu.reciprocal %333 {approx = true} : vector<8x1xf32> -> vector<8x1xf32>
    %335 = vector.broadcast %334 : vector<8x1xf32> to vector<8x8xf32>
    %336 = arith.mulf %331, %335 : vector<8x8xf32>
    %cst_131 = arith.constant dense<0.000000e+00> : vector<8x8xf32>
    %337 = tpu.matmul %336, %325, %cst_131 {dimension_numbers = #tpu.dot_dimension_numbers<[1], [0], [0], [1], [0, 0, 1, 1], [], []>} : vector<8x8xf32>, vector<8x8xf32>, vector<8x8xf32> -> vector<8x8xf32>
    %338 = vector.extract_strided_slice %233 {offsets = [0, 0], sizes = [8, 32], strides = [1, 1]} : vector<32x32xf32> to vector<8x32xf32>
    %cst_132 = arith.constant dense<0.000000e+00> : vector<8x32xf32>
    %339 = tpu.matmul %337, %338, %cst_132 {dimension_numbers = #tpu.dot_dimension_numbers<[1], [0], [0], [1], [0, 0, 1, 1], [], []>} : vector<8x8xf32>, vector<8x32xf32>, vector<8x32xf32> -> vector<8x32xf32>
    %340 = vector.extract_strided_slice %241 {offsets = [8, 8], sizes = [8, 8], strides = [1, 1]} : vector<16x96xf32> to vector<8x8xf32>
    %cst_133 = arith.constant 0.353553385 : f32
    %341 = vector.broadcast %cst_133 : f32 to vector<8x8xf32>
    %342 = arith.mulf %340, %341 : vector<8x8xf32>
    %343 = vector.extract_strided_slice %241 {offsets = [8, 40], sizes = [8, 8], strides = [1, 1]} : vector<16x96xf32> to vector<8x8xf32>
    %344 = vector.extract_strided_slice %241 {offsets = [8, 72], sizes = [8, 8], strides = [1, 1]} : vector<16x96xf32> to vector<8x8xf32>
    %cst_134 = arith.constant dense<0.000000e+00> : vector<8x8xf32>
    %345 = tpu.matmul %342, %343, %cst_134 {dimension_numbers = #tpu.dot_dimension_numbers<[1], [1], [0], [0], [0, 0, 1, 0], [], []>} : vector<8x8xf32>, vector<8x8xf32>, vector<8x8xf32> -> vector<8x8xf32>
    %cst_135 = arith.constant dense<0xFF800000> : vector<8xf32>
    %346 = vector.multi_reduction <maximumf>, %345, %cst_135 [1] : vector<8x8xf32> to vector<8xf32>
    %347 = vector.shape_cast %346 : vector<8xf32> to vector<8x1xf32>
    %348 = vector.broadcast %347 : vector<8x1xf32> to vector<8x8xf32>
    %349 = arith.subf %345, %348 : vector<8x8xf32>
    %350 = math.exp %349 : vector<8x8xf32>
    %cst_136 = arith.constant dense<0.000000e+00> : vector<8xf32>
    %351 = vector.multi_reduction <add>, %350, %cst_136 [1] : vector<8x8xf32> to vector<8xf32>
    %352 = vector.shape_cast %351 : vector<8xf32> to vector<8x1xf32>
    %353 = tpu.reciprocal %352 {approx = true} : vector<8x1xf32> -> vector<8x1xf32>
    %354 = vector.broadcast %353 : vector<8x1xf32> to vector<8x8xf32>
    %355 = arith.mulf %350, %354 : vector<8x8xf32>
    %cst_137 = arith.constant dense<0.000000e+00> : vector<8x8xf32>
    %356 = tpu.matmul %355, %344, %cst_137 {dimension_numbers = #tpu.dot_dimension_numbers<[1], [0], [0], [1], [0, 0, 1, 1], [], []>} : vector<8x8xf32>, vector<8x8xf32>, vector<8x8xf32> -> vector<8x8xf32>
    %357 = vector.extract_strided_slice %233 {offsets = [8, 0], sizes = [8, 32], strides = [1, 1]} : vector<32x32xf32> to vector<8x32xf32>
    %cst_138 = arith.constant dense<0.000000e+00> : vector<8x32xf32>
    %358 = tpu.matmul %356, %357, %cst_138 {dimension_numbers = #tpu.dot_dimension_numbers<[1], [0], [0], [1], [0, 0, 1, 1], [], []>} : vector<8x8xf32>, vector<8x32xf32>, vector<8x32xf32> -> vector<8x32xf32>
    %359 = arith.addf %339, %358 : vector<8x32xf32>
    %360 = vector.extract_strided_slice %241 {offsets = [8, 16], sizes = [8, 8], strides = [1, 1]} : vector<16x96xf32> to vector<8x8xf32>
    %cst_139 = arith.constant 0.353553385 : f32
    %361 = vector.broadcast %cst_139 : f32 to vector<8x8xf32>
    %362 = arith.mulf %360, %361 : vector<8x8xf32>
    %363 = vector.extract_strided_slice %241 {offsets = [8, 48], sizes = [8, 8], strides = [1, 1]} : vector<16x96xf32> to vector<8x8xf32>
    %364 = vector.extract_strided_slice %241 {offsets = [8, 80], sizes = [8, 8], strides = [1, 1]} : vector<16x96xf32> to vector<8x8xf32>
    %cst_140 = arith.constant dense<0.000000e+00> : vector<8x8xf32>
    %365 = tpu.matmul %362, %363, %cst_140 {dimension_numbers = #tpu.dot_dimension_numbers<[1], [1], [0], [0], [0, 0, 1, 0], [], []>} : vector<8x8xf32>, vector<8x8xf32>, vector<8x8xf32> -> vector<8x8xf32>
    %cst_141 = arith.constant dense<0xFF800000> : vector<8xf32>
    %366 = vector.multi_reduction <maximumf>, %365, %cst_141 [1] : vector<8x8xf32> to vector<8xf32>
    %367 = vector.shape_cast %366 : vector<8xf32> to vector<8x1xf32>
    %368 = vector.broadcast %367 : vector<8x1xf32> to vector<8x8xf32>
    %369 = arith.subf %365, %368 : vector<8x8xf32>
    %370 = math.exp %369 : vector<8x8xf32>
    %cst_142 = arith.constant dense<0.000000e+00> : vector<8xf32>
    %371 = vector.multi_reduction <add>, %370, %cst_142 [1] : vector<8x8xf32> to vector<8xf32>
    %372 = vector.shape_cast %371 : vector<8xf32> to vector<8x1xf32>
    %373 = tpu.reciprocal %372 {approx = true} : vector<8x1xf32> -> vector<8x1xf32>
    %374 = vector.broadcast %373 : vector<8x1xf32> to vector<8x8xf32>
    %375 = arith.mulf %370, %374 : vector<8x8xf32>
    %cst_143 = arith.constant dense<0.000000e+00> : vector<8x8xf32>
    %376 = tpu.matmul %375, %364, %cst_143 {dimension_numbers = #tpu.dot_dimension_numbers<[1], [0], [0], [1], [0, 0, 1, 1], [], []>} : vector<8x8xf32>, vector<8x8xf32>, vector<8x8xf32> -> vector<8x8xf32>
    %377 = vector.extract_strided_slice %233 {offsets = [16, 0], sizes = [8, 32], strides = [1, 1]} : vector<32x32xf32> to vector<8x32xf32>
    %cst_144 = arith.constant dense<0.000000e+00> : vector<8x32xf32>
    %378 = tpu.matmul %376, %377, %cst_144 {dimension_numbers = #tpu.dot_dimension_numbers<[1], [0], [0], [1], [0, 0, 1, 1], [], []>} : vector<8x8xf32>, vector<8x32xf32>, vector<8x32xf32> -> vector<8x32xf32>
    %379 = arith.addf %359, %378 : vector<8x32xf32>
    %380 = vector.extract_strided_slice %241 {offsets = [8, 24], sizes = [8, 8], strides = [1, 1]} : vector<16x96xf32> to vector<8x8xf32>
    %cst_145 = arith.constant 0.353553385 : f32
    %381 = vector.broadcast %cst_145 : f32 to vector<8x8xf32>
    %382 = arith.mulf %380, %381 : vector<8x8xf32>
    %383 = vector.extract_strided_slice %241 {offsets = [8, 56], sizes = [8, 8], strides = [1, 1]} : vector<16x96xf32> to vector<8x8xf32>
    %384 = vector.extract_strided_slice %241 {offsets = [8, 88], sizes = [8, 8], strides = [1, 1]} : vector<16x96xf32> to vector<8x8xf32>
    %cst_146 = arith.constant dense<0.000000e+00> : vector<8x8xf32>
    %385 = tpu.matmul %382, %383, %cst_146 {dimension_numbers = #tpu.dot_dimension_numbers<[1], [1], [0], [0], [0, 0, 1, 0], [], []>} : vector<8x8xf32>, vector<8x8xf32>, vector<8x8xf32> -> vector<8x8xf32>
    %cst_147 = arith.constant dense<0xFF800000> : vector<8xf32>
    %386 = vector.multi_reduction <maximumf>, %385, %cst_147 [1] : vector<8x8xf32> to vector<8xf32>
    %387 = vector.shape_cast %386 : vector<8xf32> to vector<8x1xf32>
    %388 = vector.broadcast %387 : vector<8x1xf32> to vector<8x8xf32>
    %389 = arith.subf %385, %388 : vector<8x8xf32>
    %390 = math.exp %389 : vector<8x8xf32>
    %cst_148 = arith.constant dense<0.000000e+00> : vector<8xf32>
    %391 = vector.multi_reduction <add>, %390, %cst_148 [1] : vector<8x8xf32> to vector<8xf32>
    %392 = vector.shape_cast %391 : vector<8xf32> to vector<8x1xf32>
    %393 = tpu.reciprocal %392 {approx = true} : vector<8x1xf32> -> vector<8x1xf32>
    %394 = vector.broadcast %393 : vector<8x1xf32> to vector<8x8xf32>
    %395 = arith.mulf %390, %394 : vector<8x8xf32>
    %cst_149 = arith.constant dense<0.000000e+00> : vector<8x8xf32>
    %396 = tpu.matmul %395, %384, %cst_149 {dimension_numbers = #tpu.dot_dimension_numbers<[1], [0], [0], [1], [0, 0, 1, 1], [], []>} : vector<8x8xf32>, vector<8x8xf32>, vector<8x8xf32> -> vector<8x8xf32>
    %397 = vector.extract_strided_slice %233 {offsets = [24, 0], sizes = [8, 32], strides = [1, 1]} : vector<32x32xf32> to vector<8x32xf32>
    %cst_150 = arith.constant dense<0.000000e+00> : vector<8x32xf32>
    %398 = tpu.matmul %396, %397, %cst_150 {dimension_numbers = #tpu.dot_dimension_numbers<[1], [0], [0], [1], [0, 0, 1, 1], [], []>} : vector<8x8xf32>, vector<8x32xf32>, vector<8x32xf32> -> vector<8x32xf32>
    %399 = arith.addf %379, %398 : vector<8x32xf32>
    %400 = tpu.concatenate %320, %399 in 0 : vector<8x32xf32>, vector<8x32xf32> -> vector<16x32xf32>
    %401 = vector.broadcast %234 : vector<1x32xf32> to vector<16x32xf32>
    %402 = arith.addf %400, %401 : vector<16x32xf32>
    %403 = arith.addf %230, %402 : vector<16x32xf32>
    %cst_151 = arith.constant dense<0.000000e+00> : vector<16xf32>
    %404 = vector.multi_reduction <add>, %403, %cst_151 [1] : vector<16x32xf32> to vector<16xf32>
    %405 = vector.shape_cast %404 : vector<16xf32> to vector<16x1xf32>
    %cst_152 = arith.constant 3.200000e+01 : f32
    %406 = vector.broadcast %cst_152 : f32 to vector<16x1xf32>
    %407 = arith.divf %405, %406 : vector<16x1xf32>
    %408 = vector.broadcast %407 : vector<16x1xf32> to vector<16x32xf32>
    %409 = arith.subf %403, %408 : vector<16x32xf32>
    %410 = arith.mulf %409, %409 : vector<16x32xf32>
    %cst_153 = arith.constant dense<0.000000e+00> : vector<16xf32>
    %411 = vector.multi_reduction <add>, %410, %cst_153 [1] : vector<16x32xf32> to vector<16xf32>
    %412 = vector.shape_cast %411 : vector<16xf32> to vector<16x1xf32>
    %cst_154 = arith.constant 3.200000e+01 : f32
    %413 = vector.broadcast %cst_154 : f32 to vector<16x1xf32>
    %414 = arith.divf %412, %413 : vector<16x1xf32>
    %415 = vector.broadcast %407 : vector<16x1xf32> to vector<16x32xf32>
    %416 = arith.subf %403, %415 : vector<16x32xf32>
    %cst_155 = arith.constant 9.99999974E-6 : f32
    %417 = vector.broadcast %cst_155 : f32 to vector<16x1xf32>
    %418 = arith.addf %414, %417 : vector<16x1xf32>
    %419 = math.rsqrt %418 : vector<16x1xf32>
    %420 = vector.broadcast %419 : vector<16x1xf32> to vector<16x32xf32>
    %421 = arith.mulf %416, %420 : vector<16x32xf32>
    %422 = vector.broadcast %235 : vector<1x32xf32> to vector<16x32xf32>
    %423 = arith.mulf %421, %422 : vector<16x32xf32>
    %424 = vector.broadcast %236 : vector<1x32xf32> to vector<16x32xf32>
    %425 = arith.addf %423, %424 : vector<16x32xf32>
    %c0_156 = arith.constant 0 : index
    %c0_157 = arith.constant 0 : index
    %426 = vector.load %arg21[%c0_156, %c0_157] : memref<32x4xf32, #tpu.memory_space<vmem>>, vector<32x4xf32>
    %c0_158 = arith.constant 0 : index
    %c0_159 = arith.constant 0 : index
    %427 = vector.load %arg22[%c0_158, %c0_159] : memref<32x256xf32, #tpu.memory_space<vmem>>, vector<32x256xf32>
    %c0_160 = arith.constant 0 : index
    %c0_161 = arith.constant 0 : index
    %428 = vector.load %arg23[%c0_160, %c0_161] : memref<1x256xf32, #tpu.memory_space<vmem>>, vector<1x256xf32>
    %c0_162 = arith.constant 0 : index
    %c0_163 = arith.constant 0 : index
    %429 = vector.load %arg24[%c0_162, %c0_163] : memref<256x32xf32, #tpu.memory_space<vmem>>, vector<256x32xf32>
    %c0_164 = arith.constant 0 : index
    %c0_165 = arith.constant 0 : index
    %430 = vector.load %arg25[%c0_164, %c0_165] : memref<4x32xf32, #tpu.memory_space<vmem>>, vector<4x32xf32>
    %cst_166 = arith.constant dense<0.000000e+00> : vector<16x4xf32>
    %431 = tpu.matmul %425, %426, %cst_166 {dimension_numbers = #tpu.dot_dimension_numbers<[1], [0], [0], [1], [0, 0, 1, 1], [], []>} : vector<16x32xf32>, vector<32x4xf32>, vector<16x4xf32> -> vector<16x4xf32>
    %cst_167 = arith.constant dense<0xFF800000> : vector<16xf32>
    %432 = vector.multi_reduction <maximumf>, %431, %cst_167 [1] : vector<16x4xf32> to vector<16xf32>
    %433 = vector.shape_cast %432 : vector<16xf32> to vector<16x1xf32>
    %434 = vector.broadcast %433 : vector<16x1xf32> to vector<16x4xf32>
    %435 = arith.subf %431, %434 : vector<16x4xf32>
    %436 = math.exp %435 : vector<16x4xf32>
    %cst_168 = arith.constant dense<0.000000e+00> : vector<16xf32>
    %437 = vector.multi_reduction <add>, %436, %cst_168 [1] : vector<16x4xf32> to vector<16xf32>
    %438 = vector.shape_cast %437 : vector<16xf32> to vector<16x1xf32>
    %439 = tpu.reciprocal %438 {approx = true} : vector<16x1xf32> -> vector<16x1xf32>
    %440 = vector.broadcast %439 : vector<16x1xf32> to vector<16x4xf32>
    %441 = arith.mulf %436, %440 : vector<16x4xf32>
    %442 = tpu.iota {dimensions = array<i32: 1>} : vector<16x4xi32>
    %443 = arith.sitofp %442 : vector<16x4xi32> to vector<16x4xf32>
    %cst_169 = arith.constant dense<0xFF800000> : vector<16xf32>
    %444 = vector.multi_reduction <maximumf>, %441, %cst_169 [1] : vector<16x4xf32> to vector<16xf32>
    %445 = vector.shape_cast %444 : vector<16xf32> to vector<16x1xf32>
    %446 = vector.broadcast %445 : vector<16x1xf32> to vector<16x4xf32>
    %447 = arith.cmpf oeq, %441, %446 : vector<16x4xf32>
    %cst_170 = arith.constant 4.000000e+00 : f32
    %448 = vector.broadcast %cst_170 : f32 to vector<16x4xf32>
    %449 = arith.select %447, %443, %448 : vector<16x4xi1>, vector<16x4xf32>
    %cst_171 = arith.constant dense<0x7F800000> : vector<16xf32>
    %450 = vector.multi_reduction <minimumf>, %449, %cst_171 [1] : vector<16x4xf32> to vector<16xf32>
    %451 = vector.shape_cast %450 : vector<16xf32> to vector<16x1xf32>
    %452 = vector.broadcast %451 : vector<16x1xf32> to vector<16x4xf32>
    %453 = arith.cmpf oeq, %443, %452 : vector<16x4xf32>
    %454 = arith.extui %453 : vector<16x4xi1> to vector<16x4xi32>
    %455 = arith.sitofp %454 : vector<16x4xi32> to vector<16x4xf32>
    %456 = tpu.iota {dimensions = array<i32: 0>} : vector<16x16xi32>
    %457 = tpu.iota {dimensions = array<i32: 1>} : vector<16x16xi32>
    %458 = arith.cmpi sge, %456, %457 : vector<16x16xi32>
    %459 = arith.extui %458 : vector<16x16xi1> to vector<16x16xi32>
    %460 = arith.sitofp %459 : vector<16x16xi32> to vector<16x16xf32>
    %cst_172 = arith.constant dense<0.000000e+00> : vector<16x4xf32>
    %461 = tpu.matmul %460, %455, %cst_172 {dimension_numbers = #tpu.dot_dimension_numbers<[1], [0], [0], [1], [0, 0, 1, 1], [], []>} : vector<16x16xf32>, vector<16x4xf32>, vector<16x4xf32> -> vector<16x4xf32>
    %cst_173 = arith.constant 1.000000e+00 : f32
    %462 = vector.broadcast %cst_173 : f32 to vector<16x4xf32>
    %463 = arith.subf %461, %462 : vector<16x4xf32>
    %cst_174 = arith.constant 4.000000e+00 : f32
    %464 = vector.broadcast %cst_174 : f32 to vector<16x4xf32>
    %465 = arith.cmpf olt, %463, %464 : vector<16x4xf32>
    %466 = arith.extui %465 : vector<16x4xi1> to vector<16x4xi32>
    %467 = arith.sitofp %466 : vector<16x4xi32> to vector<16x4xf32>
    %468 = arith.mulf %455, %467 : vector<16x4xf32>
    %469 = arith.mulf %441, %468 : vector<16x4xf32>
    %cst_175 = arith.constant dense<0.000000e+00> : vector<16xf32>
    %470 = vector.multi_reduction <add>, %469, %cst_175 [1] : vector<16x4xf32> to vector<16xf32>
    %471 = vector.shape_cast %470 : vector<16xf32> to vector<16x1xf32>
    %472 = vector.broadcast %471 : vector<16x1xf32> to vector<16x4xf32>
    %473 = arith.mulf %472, %468 : vector<16x4xf32>
    %cst_176 = arith.constant dense<0.000000e+00> : vector<16x256xf32>
    %474 = tpu.matmul %425, %427, %cst_176 {dimension_numbers = #tpu.dot_dimension_numbers<[1], [0], [0], [1], [0, 0, 1, 1], [], []>} : vector<16x32xf32>, vector<32x256xf32>, vector<16x256xf32> -> vector<16x256xf32>
    %475 = vector.broadcast %428 : vector<1x256xf32> to vector<16x256xf32>
    %476 = arith.addf %474, %475 : vector<16x256xf32>
    %cst_177 = arith.constant 0.000000e+00 : f32
    %477 = vector.broadcast %cst_177 : f32 to vector<16x256xf32>
    %478 = arith.maximumf %476, %477 : vector<16x256xf32>
    %479 = tpu.iota {dimensions = array<i32: 0>} : vector<4x256xi32>
    %480 = tpu.iota {dimensions = array<i32: 1>} : vector<4x256xi32>
    %c64_i32 = arith.constant 64 : i32
    %481 = vector.broadcast %c64_i32 : i32 to vector<4x256xi32>
    %482 = arith.muli %479, %481 : vector<4x256xi32>
    %483 = arith.cmpi sge, %480, %482 : vector<4x256xi32>
    %c1_i32 = arith.constant 1 : i32
    %484 = vector.broadcast %c1_i32 : i32 to vector<4x256xi32>
    %485 = arith.addi %479, %484 : vector<4x256xi32>
    %c64_i32_178 = arith.constant 64 : i32
    %486 = vector.broadcast %c64_i32_178 : i32 to vector<4x256xi32>
    %487 = arith.muli %485, %486 : vector<4x256xi32>
    %488 = arith.cmpi slt, %480, %487 : vector<4x256xi32>
    %489 = arith.andi %483, %488 : vector<4x256xi1>
    %490 = arith.extui %489 : vector<4x256xi1> to vector<4x256xi32>
    %491 = arith.sitofp %490 : vector<4x256xi32> to vector<4x256xf32>
    %cst_179 = arith.constant dense<0.000000e+00> : vector<16x256xf32>
    %492 = tpu.matmul %473, %491, %cst_179 {dimension_numbers = #tpu.dot_dimension_numbers<[1], [0], [0], [1], [0, 0, 1, 1], [], []>} : vector<16x4xf32>, vector<4x256xf32>, vector<16x256xf32> -> vector<16x256xf32>
    %493 = arith.mulf %478, %492 : vector<16x256xf32>
    %cst_180 = arith.constant dense<0.000000e+00> : vector<16x32xf32>
    %494 = tpu.matmul %493, %429, %cst_180 {dimension_numbers = #tpu.dot_dimension_numbers<[1], [0], [0], [1], [0, 0, 1, 1], [], []>} : vector<16x256xf32>, vector<256x32xf32>, vector<16x32xf32> -> vector<16x32xf32>
    %cst_181 = arith.constant dense<0.000000e+00> : vector<16x32xf32>
    %495 = tpu.matmul %473, %430, %cst_181 {dimension_numbers = #tpu.dot_dimension_numbers<[1], [0], [0], [1], [0, 0, 1, 1], [], []>} : vector<16x4xf32>, vector<4x32xf32>, vector<16x32xf32> -> vector<16x32xf32>
    %496 = arith.addf %494, %495 : vector<16x32xf32>
    %497 = arith.addf %425, %496 : vector<16x32xf32>
    %cst_182 = arith.constant dense<0.000000e+00> : vector<16xf32>
    %498 = vector.multi_reduction <add>, %497, %cst_182 [1] : vector<16x32xf32> to vector<16xf32>
    %499 = vector.shape_cast %498 : vector<16xf32> to vector<16x1xf32>
    %cst_183 = arith.constant 3.200000e+01 : f32
    %500 = vector.broadcast %cst_183 : f32 to vector<16x1xf32>
    %501 = arith.divf %499, %500 : vector<16x1xf32>
    %502 = vector.broadcast %501 : vector<16x1xf32> to vector<16x32xf32>
    %503 = arith.subf %497, %502 : vector<16x32xf32>
    %504 = arith.mulf %503, %503 : vector<16x32xf32>
    %cst_184 = arith.constant dense<0.000000e+00> : vector<16xf32>
    %505 = vector.multi_reduction <add>, %504, %cst_184 [1] : vector<16x32xf32> to vector<16xf32>
    %506 = vector.shape_cast %505 : vector<16xf32> to vector<16x1xf32>
    %cst_185 = arith.constant 3.200000e+01 : f32
    %507 = vector.broadcast %cst_185 : f32 to vector<16x1xf32>
    %508 = arith.divf %506, %507 : vector<16x1xf32>
    %509 = vector.broadcast %501 : vector<16x1xf32> to vector<16x32xf32>
    %510 = arith.subf %497, %509 : vector<16x32xf32>
    %cst_186 = arith.constant 9.99999974E-6 : f32
    %511 = vector.broadcast %cst_186 : f32 to vector<16x1xf32>
    %512 = arith.addf %508, %511 : vector<16x1xf32>
    %513 = math.rsqrt %512 : vector<16x1xf32>
    %514 = vector.broadcast %513 : vector<16x1xf32> to vector<16x32xf32>
    %515 = arith.mulf %510, %514 : vector<16x32xf32>
    %516 = vector.broadcast %237 : vector<1x32xf32> to vector<16x32xf32>
    %517 = arith.mulf %515, %516 : vector<16x32xf32>
    %518 = vector.broadcast %238 : vector<1x32xf32> to vector<16x32xf32>
    %519 = arith.addf %517, %518 : vector<16x32xf32>
    %520 = vector.shape_cast %519 : vector<16x32xf32> to vector<1x16x32xf32>
    %cst_187 = arith.constant dense<0.000000e+00> : vector<1xf32>
    %521 = vector.multi_reduction <add>, %520, %cst_187 [1, 2] : vector<1x16x32xf32> to vector<1xf32>
    %522 = vector.shape_cast %521 : vector<1xf32> to vector<1x1x1xf32>
    %523 = vector.extract %522[0, 0, 0] : f32 from vector<1x1x1xf32>
    %524 = vector.broadcast %523 : f32 to vector<1x1xf32>
    %c0_188 = arith.constant 0 : index
    %c0_189 = arith.constant 0 : index
    %525 = vector.load %arg26[%c0_188, %c0_189] : memref<1x1xf32, #tpu.memory_space<vmem>>, vector<1x1xf32>
    tpu.vector_store %arg26[%c0_188, %c0_189], %524 {strides = array<i32>} : memref<1x1xf32, #tpu.memory_space<vmem>>, vector<1x1xf32>,
    return
  }
}

</mosaic_0001>

<bundles_post_ra>
// kernel: _lambda_.1
= control target key start
LH: loop header
LB: loop body
LE: loop exit
PB: predicated region body
PF: predicated region fallthrough
CT: control target
= control target key end

     0   :  { %s7502_s0 = inlined_call_operand.hbm [shape: f32[16,32], index: 0, kind: input, shape index: {}]   ;;  %s7503_s1 = inlined_call_operand.hbm [shape: f32[32,96], index: 1, kind: input, shape index: {}]   ;;  %s7504_s2 = inlined_call_operand.hbm [shape: f32[1,96], index: 2, kind: input, shape index: {}]   ;;  %s7505_s3 = inlined_call_operand.hbm [shape: f32[32,32], index: 3, kind: input, shape index: {}]   ;;  %s7506_s4 = inlined_call_operand.hbm [shape: f32[1,32], index: 4, kind: input, shape index: {}]   ;;  %s7507_s5 = inlined_call_operand.vmem [shape: f32[1,32], index: 5, kind: input, shape index: {}, may-alias: {5,7,17,19}]   ;;  %s7508_s6 = inlined_call_operand.vmem [shape: f32[1,32], index: 6, kind: input, shape index: {}, may-alias: {6,8,18,20}]   ;;  %s7509_s7 = inlined_call_operand.vmem [shape: f32[1,32], index: 7, kind: input, shape index: {}, may-alias: {5,7,17,19}]   ;;  %s7510_s8 = inlined_call_operand.vmem [shape: f32[1,32], index: 8, kind: input, shape index: {}, may-alias: {6,8,18,20}]   ;;  %s7511_s9 = inlined_call_operand.hbm [shape: f32[32,64], index: 9, kind: input, shape index: {}]   ;;  %s7512_s10 = inlined_call_operand.hbm [shape: f32[1,64], index: 10, kind: input, shape index: {}]   ;;  %s7513_s11 = inlined_call_operand.hbm [shape: f32[64,32], index: 11, kind: input, shape index: {}]   ;;  %s7514_s12 = inlined_call_operand.hbm [shape: f32[1,32], index: 12, kind: input, shape index: {}]   ;;  %s7515_s13 = inlined_call_operand.hbm [shape: f32[32,96], index: 13, kind: input, shape index: {}]   ;;  %s7516_s14 = inlined_call_operand.hbm [shape: f32[1,96], index: 14, kind: input, shape index: {}]   ;;  %s7517_s15 = inlined_call_operand.hbm [shape: f32[32,32], index: 15, kind: input, shape index: {}]   ;;  %s7518_s16 = inlined_call_operand.vmem [shape: f32[1,32], index: 16, kind: input, shape index: {}]   ;;  %s7519_s17 = inlined_call_operand.vmem [shape: f32[1,32], index: 17, kind: input, shape index: {}, may-alias: {5,7,17,19}]   ;;  %s7520_s18 = inlined_call_operand.vmem [shape: f32[1,32], index: 18, kind: input, shape index: {}, may-alias: {6,8,18,20}]   ;;  %s7521_s19 = inlined_call_operand.vmem [shape: f32[1,32], index: 19, kind: input, shape index: {}, may-alias: {5,7,17,19}]   ;;  %s7522_s20 = inlined_call_operand.vmem [shape: f32[1,32], index: 20, kind: input, shape index: {}, may-alias: {6,8,18,20}]   ;;  %s7523_s21 = inlined_call_operand.hbm [shape: f32[32,4], index: 21, kind: input, shape index: {}]   ;;  %s7524_s22 = inlined_call_operand.vmem [shape: f32[32,256], index: 22, kind: input, shape index: {}]   ;;  %s7525_s23 = inlined_call_operand.vmem [shape: f32[1,256], index: 23, kind: input, shape index: {}]   ;;  %s7526_s24 = inlined_call_operand.hbm [shape: f32[256,32], index: 24, kind: input, shape index: {}]   ;;  %s7527_s25 = inlined_call_operand.vmem [shape: f32[4,32], index: 25, kind: input, shape index: {}]   ;;  %s7528_s26 = inlined_call_operand.hbm [shape: f32[1,1], index: 26, kind: output, shape index: {}]  }
   0x1   :  { %7537 = sst [smem:[#allocation35_spill]] %s7502_s0 }
   0x2   :  { %7538 = sst [smem:[#allocation36_spill]] %s7503_s1 }
   0x3   :  { %7539 = sst [smem:[#allocation37_spill]] %s7504_s2 }
   0x4   :  { %7540 = sst [smem:[#allocation38_spill]] %s7505_s3 }
   0x5   :  { %7541 = sst [smem:[#allocation39_spill]] %s7506_s4 }
   0x6   :  { %7542 = sst [smem:[#allocation40_spill]] %s7507_s5 }
   0x7   :  { %7543 = sst [smem:[#allocation41_spill]] %s7508_s6 }
   0x8   :  { %7544 = sst [smem:[#allocation42_spill]] %s7509_s7 }
   0x9   :  { %7545 = sst [smem:[#allocation43_spill]] %s7510_s8 }
   0xa   :  { %7546 = sst [smem:[#allocation44_spill]] %s7511_s9 }
   0xb   :  { %7547 = sst [smem:[#allocation45_spill]] %s7512_s10 }
   0xc   :  { %7548 = sst [smem:[#allocation46_spill]] %s7521_s19 }
   0xd   :  { %7549 = sst [smem:[#allocation47_spill]] %s7522_s20 }
   0xe   :  { %7550 = sst [smem:[#allocation48_spill]] %s7528_s26 }
   0xf   :  { %31 = vsyncpa [#allocation3], 0 }
  0x10   :  { %32 = vsyncpa [#allocation6], 0 }
  0x11   :  { %33 = vsyncpa [#allocation9], 0 }
  0x12   :  { %34 = vsyncpa [#allocation12], 0 }
  0x13   :  { %35 = vsyncpa [#allocation15], 0 }
  0x14   :  { %36 = vsyncpa [#allocation18], 0 }
  0x15   :  { %37 = vsyncpa [#allocation21], 0 }
  0x16   :  { %38 = vsyncpa [#allocation24], 0 }
  0x17   :  { %39 = vsyncpa [#allocation4], 0  ;;  %s6512_s27 = smov [#allocation5]   ;;  %s6513_s7 = smov [#allocation8]  }
  0x18   :  { %s57_s3 = sshll.u32 %s6512_s27, 4  ;;  %s79_s28 = sshll.u32 %s6513_s7, 4  ;;  %s58_s3 = int_to_ptr.vmem [resolvable:$true] %s57_s3  ;;  %s6678_s28 = int_to_ptr.vmem [resolvable:$true] %s79_s28 }
  0x19   :  { %s7551_s29 = sld [smem:[#allocation36_spill]] }
  0x1f   :  { %s6164_s0 = scalar_lea.hbm %s7551_s29, 512 }
  0x20   :  { %p6165_p0 = scmp.ne.s32.totalorder %s7551_s29, %s6164_s0  ;;  %p6168_p1 = scmp.lt.u32.totalorder %s6164_s0, %s7551_s29 }
  0x22   :  { %p6170_p2 = pnand %p6168_p1, %p6165_p0 }
  0x24   :  { %6173 = shalt.err (!%p6170_p2)
}
  0x25   :  { %s6174_s10 = scalar_lea.vmem %s58_s3, 512  ;;  %p6179_p4 = scmp.lt.s32.totalorder %s58_s3, %s58_s3 }
  0x26   :  { %p6175_p3 = scmp.ne.s32.totalorder %s58_s3, %s6174_s10  ;;  %p6180_p5 = scmp.lt.s32.totalorder %s6174_s10, %s6174_s10 }
  0x28   :  { %p6181_p6 = por %p6180_p5, %p6179_p4 }
  0x2a   :  { %p6182_p7 = pnand %p6181_p6, %p6175_p3 }
  0x2c   :  { %6185 = shalt.err (!%p6182_p7)
}
  0x2d   :  { %s6514_s6 = smov 128   ;;  %s6515_s1 = smov 8  }
  0x2e   :  { %63 = dma.hbm_to_vmem [thread:$0]  %s7551_s29, 512, %s58_s3, [#allocation6], %s6514_s6, %s6514_s6, %s6515_s1  }
  0x2f   :  { %s7552_s0 = sld [smem:[#allocation38_spill]] }
  0x35   :  { %s6186_s9 = scalar_lea.hbm %s7552_s0, 512 }
  0x36   :  { %p6187_p8 = scmp.ne.s32.totalorder %s7552_s0, %s6186_s9  ;;  %p6190_p9 = scmp.lt.u32.totalorder %s6186_s9, %s7552_s0 }
  0x38   :  { %p6192_p10 = pnand %p6190_p9, %p6187_p8 }
  0x3a   :  { %6195 = shalt.err (!%p6192_p10)
}
  0x3b   :  { %s6196_s26 = scalar_lea.vmem %s6678_s28, 512  ;;  %p6201_p12 = scmp.lt.s32.totalorder %s6678_s28, %s6678_s28 }
  0x3c   :  { %p6197_p11 = scmp.ne.s32.totalorder %s6678_s28, %s6196_s26  ;;  %p6202_p13 = scmp.lt.s32.totalorder %s6196_s26, %s6196_s26 }
  0x3e   :  { %p6203_p0 = por %p6202_p13, %p6201_p12 }
  0x40   :  { %p6204_p1 = pnand %p6203_p0, %p6197_p11 }
  0x42   :  { %6207 = shalt.err (!%p6204_p1)
}
  0x43   :  { %85 = dma.hbm_to_vmem [thread:$0]  %s7552_s0, 512, %s6678_s28, [#allocation9], %s6514_s6, %s6514_s6, %s6515_s1  }
  0x44   :  { %s6516_s27 = smov [#allocation11]   ;;  %s6517_s8 = smov [#allocation14]  }
  0x45   :  { %s109_s7 = sshll.u32 %s6516_s27, 4  ;;  %s131_s4 = sshll.u32 %s6517_s8, 4  ;;  %s110_s7 = int_to_ptr.vmem [resolvable:$true] %s109_s7  ;;  %s6715_s4 = int_to_ptr.vmem [resolvable:$true] %s131_s4 }
  0x46   :  { %s7553_s30 = sld [smem:[#allocation44_spill]] }
  0x4c   :  { %s6208_s2 = scalar_lea.hbm %s7553_s30, 512 }
  0x4d   :  { %p6209_p2 = scmp.ne.s32.totalorder %s7553_s30, %s6208_s2  ;;  %p6212_p3 = scmp.lt.u32.totalorder %s6208_s2, %s7553_s30 }
  0x4f   :  { %p6214_p4 = pnand %p6212_p3, %p6209_p2 }
  0x51   :  { %6217 = shalt.err (!%p6214_p4)
}
  0x52   :  { %s6218_s28 = scalar_lea.vmem %s110_s7, 512  ;;  %p6223_p6 = scmp.lt.s32.totalorder %s110_s7, %s110_s7 }
  0x53   :  { %p6219_p5 = scmp.ne.s32.totalorder %s110_s7, %s6218_s28  ;;  %p6224_p7 = scmp.lt.s32.totalorder %s6218_s28, %s6218_s28 }
  0x55   :  { %p6225_p8 = por %p6224_p7, %p6223_p6 }
  0x57   :  { %p6226_p9 = pnand %p6225_p8, %p6219_p5 }
  0x59   :  { %6229 = shalt.err (!%p6226_p9)
}
  0x5a   :  { %115 = dma.hbm_to_vmem [thread:$0]  %s7553_s30, 512, %s110_s7, [#allocation12], %s6514_s6, %s6514_s6, %s6515_s1  }
  0x5b   :  { %s6230_s19 = scalar_lea.hbm %s7513_s11, 1024 }
  0x5c   :  { %p6231_p10 = scmp.ne.s32.totalorder %s7513_s11, %s6230_s19  ;;  %p6234_p11 = scmp.lt.u32.totalorder %s6230_s19, %s7513_s11 }
  0x5e   :  { %p6236_p12 = pnand %p6234_p11, %p6231_p10 }
  0x60   :  { %6239 = shalt.err (!%p6236_p12)
}
  0x61   :  { %s6240_s2 = scalar_lea.vmem %s6715_s4, 1024  ;;  %p6245_p0 = scmp.lt.s32.totalorder %s6715_s4, %s6715_s4 }
  0x62   :  { %p6241_p13 = scmp.ne.s32.totalorder %s6715_s4, %s6240_s2  ;;  %p6246_p1 = scmp.lt.s32.totalorder %s6240_s2, %s6240_s2 }
  0x64   :  { %p6247_p2 = por %p6246_p1, %p6245_p0 }
  0x66   :  { %p6248_p3 = pnand %p6247_p2, %p6241_p13 }
  0x68   :  { %6251 = shalt.err (!%p6248_p3)
}
  0x69   :  { %137 = dma.hbm_to_vmem [thread:$0]  %s7513_s11, 1024, %s6715_s4, [#allocation15], %s6514_s6, %s6514_s6, %s6515_s1  }
  0x6a   :  { %s6518_s5 = smov [#allocation17]   ;;  %s6519_s28 = smov [#allocation20]  }
  0x6b   :  { %s153_s10 = sshll.u32 %s6518_s5, 4  ;;  %s175_s0 = sshll.u32 %s6519_s28, 4  ;;  %s154_s10 = int_to_ptr.vmem [resolvable:$true] %s153_s10  ;;  %s6752_s0 = int_to_ptr.vmem [resolvable:$true] %s175_s0 }
  0x6c   :  { %s6252_s27 = scalar_lea.hbm %s7515_s13, 512 }
  0x6d   :  { %p6253_p4 = scmp.ne.s32.totalorder %s7515_s13, %s6252_s27  ;;  %p6256_p5 = scmp.lt.u32.totalorder %s6252_s27, %s7515_s13 }
  0x6f   :  { %p6258_p6 = pnand %p6256_p5, %p6253_p4 }
  0x71   :  { %6261 = shalt.err (!%p6258_p6)
}
  0x72   :  { %s6262_s11 = scalar_lea.vmem %s154_s10, 512  ;;  %p6267_p8 = scmp.lt.s32.totalorder %s154_s10, %s154_s10 }
  0x73   :  { %p6263_p7 = scmp.ne.s32.totalorder %s154_s10, %s6262_s11  ;;  %p6268_p9 = scmp.lt.s32.totalorder %s6262_s11, %s6262_s11 }
  0x75   :  { %p6269_p10 = por %p6268_p9, %p6267_p8 }
  0x77   :  { %p6270_p11 = pnand %p6269_p10, %p6263_p7 }
  0x79   :  { %6273 = shalt.err (!%p6270_p11)
}
  0x7a   :  { %159 = dma.hbm_to_vmem [thread:$0]  %s7515_s13, 512, %s154_s10, [#allocation18], %s6514_s6, %s6514_s6, %s6515_s1  }
  0x7b   :  { %s6274_s30 = scalar_lea.hbm %s7517_s15, 512 }
  0x7c   :  { %p6275_p12 = scmp.ne.s32.totalorder %s7517_s15, %s6274_s30  ;;  %p6278_p13 = scmp.lt.u32.totalorder %s6274_s30, %s7517_s15 }
  0x7e   :  { %p6280_p0 = pnand %p6278_p13, %p6275_p12 }
  0x80   :  { %6283 = shalt.err (!%p6280_p0)
}
  0x81   :  { %s6284_s27 = scalar_lea.vmem %s6752_s0, 512  ;;  %p6289_p2 = scmp.lt.s32.totalorder %s6752_s0, %s6752_s0 }
  0x82   :  { %p6285_p1 = scmp.ne.s32.totalorder %s6752_s0, %s6284_s27  ;;  %p6290_p3 = scmp.lt.s32.totalorder %s6284_s27, %s6284_s27 }
  0x84   :  { %p6291_p4 = por %p6290_p3, %p6289_p2 }
  0x86   :  { %p6292_p5 = pnand %p6291_p4, %p6285_p1 }
  0x88   :  { %6295 = shalt.err (!%p6292_p5)
}
  0x89   :  { %181 = dma.hbm_to_vmem [thread:$0]  %s7517_s15, 512, %s6752_s0, [#allocation21], %s6514_s6, %s6514_s6, %s6515_s1  }
  0x8a   :  { %s6520_s19 = smov [#allocation2]   ;;  %s6521_s8 = smov [#allocation7]  }
  0x8b   :  { %s45_s20 = sshll.u32 %s6520_s19, 4  ;;  %s70_s9 = sshll.u32 %s6521_s8, 4  ;;  %s46_s20 = int_to_ptr.vmem [resolvable:$true] %s45_s20  ;;  %s71_s9 = int_to_ptr.vmem [resolvable:$true] %s70_s9 }
  0x8c   :  { %s7554_s26 = sld [smem:[#allocation35_spill]] }
  0x92   :  { %s6296_s2 = scalar_lea.hbm %s7554_s26, 256 }
  0x93   :  { %p6297_p6 = scmp.ne.s32.totalorder %s7554_s26, %s6296_s2  ;;  %p6300_p7 = scmp.lt.u32.totalorder %s6296_s2, %s7554_s26 }
  0x95   :  { %p6302_p8 = pnand %p6300_p7, %p6297_p6 }
  0x97   :  { %6305 = shalt.err (!%p6302_p8)
}
  0x98   :  { %s6306_s15 = scalar_lea.vmem %s46_s20, 256  ;;  %p6311_p10 = scmp.lt.s32.totalorder %s46_s20, %s46_s20 }
  0x99   :  { %p6307_p9 = scmp.ne.s32.totalorder %s46_s20, %s6306_s15  ;;  %p6312_p11 = scmp.lt.s32.totalorder %s6306_s15, %s6306_s15 }
  0x9b   :  { %p6313_p12 = por %p6312_p11, %p6311_p10 }
  0x9d   :  { %p6314_p13 = pnand %p6313_p12, %p6307_p9 }
  0x9f   :  { %6317 = shalt.err (!%p6314_p13)
}
  0xa0   :  { %51 = dma.hbm_to_vmem [thread:$0]  %s7554_s26, 256, %s46_s20, [#allocation3], %s6514_s6, %s6514_s6, %s6515_s1  }
  0xa1   :  { %s7555_s13 = sld [smem:[#allocation37_spill]] }
  0xa7   :  { %s6318_s10 = scalar_lea.hbm %s7555_s13, 16 }
  0xa8   :  { %p6319_p0 = scmp.ne.s32.totalorder %s7555_s13, %s6318_s10  ;;  %p6322_p1 = scmp.lt.u32.totalorder %s6318_s10, %s7555_s13 }
  0xaa   :  { %p6324_p2 = pnand %p6322_p1, %p6319_p0 }
  0xac   :  { %6327 = shalt.err (!%p6324_p2)
}
  0xad   :  { %s6328_s2 = scalar_lea.vmem %s71_s9, 16  ;;  %s6332_s7 = scalar_lea.vmem %s71_s9, 32 }
  0xae   :  { %p6329_p3 = scmp.ne.s32.totalorder %s71_s9, %s6328_s2  ;;  %p6333_p4 = scmp.lt.s32.totalorder %s71_s9, %s71_s9 }
  0xaf   :  { %p6334_p5 = scmp.lt.s32.totalorder %s6332_s7, %s6328_s2 }
  0xb1   :  { %p6335_p6 = por %p6334_p5, %p6333_p4 }
  0xb3   :  { %p6336_p7 = pnand %p6335_p6, %p6329_p3 }
  0xb5   :  { %6339 = shalt.err (!%p6336_p7)
}
  0xb6   :  { %73 = dma.hbm_to_vmem [thread:$0]  %s7555_s13, 16, %s71_s9, [#allocation6]  }
  0xb7   :  { %s6522_s30 = smov [#allocation10]   ;;  %s6523_s28 = smov [#allocation13]  }
  0xb8   :  { %s92_s5 = sshll.u32 %s6522_s30, 4  ;;  %s122_s15 = sshll.u32 %s6523_s28, 4  ;;  %s93_s5 = int_to_ptr.vmem [resolvable:$true] %s92_s5  ;;  %s123_s15 = int_to_ptr.vmem [resolvable:$true] %s122_s15 }
  0xb9   :  { %s7556_s29 = sld [smem:[#allocation39_spill]] }
  0xbf   :  { %s6340_s27 = scalar_lea.hbm %s7556_s29, 16 }
  0xc0   :  { %p6341_p8 = scmp.ne.s32.totalorder %s7556_s29, %s6340_s27  ;;  %p6344_p9 = scmp.lt.u32.totalorder %s6340_s27, %s7556_s29 }
  0xc2   :  { %p6346_p10 = pnand %p6344_p9, %p6341_p8 }
  0xc4   :  { %6349 = shalt.err (!%p6346_p10)
}
  0xc5   :  { %s6350_s9 = scalar_lea.vmem %s93_s5, 16  ;;  %s6354_s13 = scalar_lea.vmem %s93_s5, 32 }
  0xc6   :  { %p6351_p11 = scmp.ne.s32.totalorder %s93_s5, %s6350_s9  ;;  %p6355_p12 = scmp.lt.s32.totalorder %s93_s5, %s93_s5 }
  0xc7   :  { %p6356_p13 = scmp.lt.s32.totalorder %s6354_s13, %s6350_s9 }
  0xc9   :  { %p6357_p0 = por %p6356_p13, %p6355_p12 }
  0xcb   :  { %p6358_p1 = pnand %p6357_p0, %p6351_p11 }
  0xcd   :  { %6361 = shalt.err (!%p6358_p1)
}
  0xce   :  { %95 = dma.hbm_to_vmem [thread:$0]  %s7556_s29, 16, %s93_s5, [#allocation9]  }
  0xcf   :  { %s7557_s26 = sld [smem:[#allocation45_spill]] }
  0xd5   :  { %s6362_s30 = scalar_lea.hbm %s7557_s26, 16 }
  0xd6   :  { %p6363_p2 = scmp.ne.s32.totalorder %s7557_s26, %s6362_s30  ;;  %p6366_p3 = scmp.lt.u32.totalorder %s6362_s30, %s7557_s26 }
  0xd8   :  { %p6368_p4 = pnand %p6366_p3, %p6363_p2 }
  0xda   :  { %6371 = shalt.err (!%p6368_p4)
}
  0xdb   :  { %s6372_s10 = scalar_lea.vmem %s123_s15, 16  ;;  %s6376_s19 = scalar_lea.vmem %s123_s15, 32 }
  0xdc   :  { %p6373_p5 = scmp.ne.s32.totalorder %s123_s15, %s6372_s10  ;;  %p6377_p6 = scmp.lt.s32.totalorder %s123_s15, %s123_s15 }
  0xdd   :  { %p6378_p7 = scmp.lt.s32.totalorder %s6376_s19, %s6372_s10 }
  0xdf   :  { %p6379_p8 = por %p6378_p7, %p6377_p6 }
  0xe1   :  { %p6380_p9 = pnand %p6379_p8, %p6373_p5 }
  0xe3   :  { %6383 = shalt.err (!%p6380_p9)
}
  0xe4   :  { %125 = dma.hbm_to_vmem [thread:$0]  %s7557_s26, 16, %s123_s15, [#allocation12]  }
  0xe5   :  { %s6524_s8 = smov [#allocation16]   ;;  %s6525_s9 = smov [#allocation19]  }
  0xe6   :  { %s144_s11 = sshll.u32 %s6524_s8, 4  ;;  %s166_s13 = sshll.u32 %s6525_s9, 4  ;;  %s145_s11 = int_to_ptr.vmem [resolvable:$true] %s144_s11  ;;  %s167_s13 = int_to_ptr.vmem [resolvable:$true] %s166_s13 }
  0xe7   :  { %s6384_s7 = scalar_lea.hbm %s7514_s12, 16 }
  0xe8   :  { %p6385_p10 = scmp.ne.s32.totalorder %s7514_s12, %s6384_s7  ;;  %p6388_p11 = scmp.lt.u32.totalorder %s6384_s7, %s7514_s12 }
  0xea   :  { %p6390_p12 = pnand %p6388_p11, %p6385_p10 }
  0xec   :  { %6393 = shalt.err (!%p6390_p12)
}
  0xed   :  { %s6394_s15 = scalar_lea.vmem %s145_s11, 16  ;;  %s6398_s26 = scalar_lea.vmem %s145_s11, 32 }
  0xee   :  { %p6395_p13 = scmp.ne.s32.totalorder %s145_s11, %s6394_s15  ;;  %p6399_p0 = scmp.lt.s32.totalorder %s145_s11, %s145_s11 }
  0xef   :  { %p6400_p1 = scmp.lt.s32.totalorder %s6398_s26, %s6394_s15 }
  0xf1   :  { %p6401_p2 = por %p6400_p1, %p6399_p0 }
  0xf3   :  { %p6402_p3 = pnand %p6401_p2, %p6395_p13 }
  0xf5   :  { %6405 = shalt.err (!%p6402_p3)
}
  0xf6   :  { %147 = dma.hbm_to_vmem [thread:$0]  %s7514_s12, 16, %s145_s11, [#allocation15]  }
  0xf7   :  { %s6406_s5 = scalar_lea.hbm %s7516_s14, 16 }
  0xf8   :  { %p6407_p4 = scmp.ne.s32.totalorder %s7516_s14, %s6406_s5  ;;  %p6410_p5 = scmp.lt.u32.totalorder %s6406_s5, %s7516_s14 }
  0xfa   :  { %p6412_p6 = pnand %p6410_p5, %p6407_p4 }
  0xfc   :  { %6415 = shalt.err (!%p6412_p6)
}
  0xfd   :  { %s6416_s2 = scalar_lea.vmem %s167_s13, 16  ;;  %s6420_s7 = scalar_lea.vmem %s167_s13, 32 }
  0xfe   :  { %p6417_p7 = scmp.ne.s32.totalorder %s167_s13, %s6416_s2  ;;  %p6421_p8 = scmp.lt.s32.totalorder %s167_s13, %s167_s13 }
  0xff   :  { %p6422_p9 = scmp.lt.s32.totalorder %s6420_s7, %s6416_s2 }
 0x101   :  { %p6423_p10 = por %p6422_p9, %p6421_p8 }
 0x103   :  { %p6424_p11 = pnand %p6423_p10, %p6417_p7 }
 0x105   :  { %6427 = shalt.err (!%p6424_p11)
}
 0x106   :  { %169 = dma.hbm_to_vmem [thread:$0]  %s7516_s14, 16, %s167_s13, [#allocation18]  }
 0x107   :  { %s6526_s20 = smov [#allocation22]   ;;  %s6527_s28 = smov [#allocation23]  }
 0x108   :  { %s197_s30 = sshll.u32 %s6526_s20, 4  ;;  %s213_s0 = sshll.u32 %s6527_s28, 4  ;;  %s198_s30 = int_to_ptr.vmem [resolvable:$true] %s197_s30  ;;  %s6864_s0 = int_to_ptr.vmem [resolvable:$true] %s213_s0 }
 0x109   :  { %s6428_s3 = scalar_lea.hbm %s7523_s21, 512 }
 0x10a   :  { %p6429_p12 = scmp.ne.s32.totalorder %s7523_s21, %s6428_s3  ;;  %p6432_p13 = scmp.lt.u32.totalorder %s6428_s3, %s7523_s21 }
 0x10c   :  { %p6434_p0 = pnand %p6432_p13, %p6429_p12 }
 0x10e   :  { %6437 = shalt.err (!%p6434_p0)
}
 0x10f   :  { %s6438_s14 = scalar_lea.vmem %s198_s30, 512  ;;  %p6443_p2 = scmp.lt.s32.totalorder %s198_s30, %s198_s30 }
 0x110   :  { %p6439_p1 = scmp.ne.s32.totalorder %s198_s30, %s6438_s14  ;;  %p6444_p3 = scmp.lt.s32.totalorder %s6438_s14, %s6438_s14 }
 0x112   :  { %p6445_p4 = por %p6444_p3, %p6443_p2 }
 0x114   :  { %p6446_p5 = pnand %p6445_p4, %p6439_p1 }
 0x116   :  { %6449 = shalt.err (!%p6446_p5)
}
 0x117   :  { %203 = dma.hbm_to_vmem [thread:$0]  %s7523_s21, 512, %s198_s30, [#allocation21], %s6514_s6, %s6514_s6, %s6515_s1  }
 0x118   :  { %s6450_s4 = scalar_lea.hbm %s7526_s24, 4096 }
 0x119   :  { %p6451_p6 = scmp.ne.s32.totalorder %s7526_s24, %s6450_s4  ;;  %p6454_p7 = scmp.lt.u32.totalorder %s6450_s4, %s7526_s24 }
 0x11b   :  { %p6456_p8 = pnand %p6454_p7, %p6451_p6 }
 0x11d   :  { %6459 = shalt.err (!%p6456_p8)
}
 0x11e   :  { %s6460_s20 = scalar_lea.vmem %s6864_s0, 4096  ;;  %p6465_p10 = scmp.lt.s32.totalorder %s6864_s0, %s6864_s0 }
 0x11f   :  { %p6461_p9 = scmp.ne.s32.totalorder %s6864_s0, %s6460_s20  ;;  %p6466_p11 = scmp.lt.s32.totalorder %s6460_s20, %s6460_s20 }
 0x121   :  { %p6467_p12 = por %p6466_p11, %p6465_p10 }
 0x123   :  { %p6468_p13 = pnand %p6467_p12, %p6461_p9 }
 0x125   :  { %6471 = shalt.err (!%p6468_p13)
}
 0x126   :  { %219 = dma.hbm_to_vmem [thread:$0]  %s7526_s24, 4096, %s6864_s0, [#allocation24], %s6514_s6, %s6514_s6, %s6515_s1  }
 0x127   :  { %6494 = dma.done.wait [#allocation3], 256  }
 0x128   :  { %6495 = vsyncadd [#allocation3], 4294967040 }
 0x129   :  { %6496 = dma.done.wait [#allocation6], 528  }
 0x12a   :  { %6497 = vsyncadd [#allocation6], 4294966768 }
 0x12b   :  { %6498 = dma.done.wait [#allocation9], 528  }
 0x12c   :  { %6499 = vsyncadd [#allocation9], 4294966768 }
 0x12d   :  { %6500 = dma.done.wait [#allocation12], 528  }
 0x12e   :  { %6501 = vsyncadd [#allocation12], 4294966768 }
 0x12f   :  { %6502 = dma.done.wait [#allocation15], 1040  }
 0x130   :  { %6503 = vsyncadd [#allocation15], 4294966256 }
 0x131   :  { %6504 = dma.done.wait [#allocation18], 528  }
 0x132   :  { %6505 = vsyncadd [#allocation18], 4294966768 }
 0x133   :  { %6506 = dma.done.wait [#allocation21], 1024  }
 0x134   :  { %6507 = vsyncadd [#allocation21], 4294966272 }
 0x135   :  { %6508 = dma.done.wait [#allocation24], 4096  }
 0x136   :  { %6509 = vsyncadd [#allocation24], 4294963200  ;;  %vm286_vm0 = vcmask 261120   ;;  %v266_v0 = vld [vmem:[#allocation5] sm:$0xff]  ;;  %v267_v1 = vld [vmem:[#allocation5 + $0x8] sm:$0xff]  ;;  %v6528_v8 = vmov 0.0  }
 0x137   :  { %v268_v2 = vld [vmem:[#allocation5 + $0x10] sm:$0xff]  ;;  %v5951_v3 = vpack.c.bf16 %v267_v1, %v266_v0  ;;  %v269_v4 = vld [vmem:[#allocation5 + $0x18] sm:$0xff]  ;;  %5647 = vmatprep.subr.mxu1 %v6528_v8  ;;  %vm6529_vm1 = vmmov 0   ;;  %v5350_v9 = vld [vmem:[#allocation7] ss:$0 sm:$0xff]  ;;  %s6530_s24 = smov 96  }
 0x138   :  { %v6901_v5 = vld [vmem:[#allocation2] sm:$0xff]  ;;  %v5955_v6 = vpack.c.bf16 %v269_v4, %v268_v2  ;;  %v6905_v7 = vld [vmem:[#allocation2 + $0x8] sm:$0xff]  ;;  %5649 = vmatprep.mubr.msk.f32.mxu1 %vm6529_vm1, %v6528_v8  ;;  %s6531_s6 = smov 120   ;;  %s6532_s1 = smov 88   ;;  %vm372_vm2 = vcmask 64512   ;;  %v6963_v43 = vld [vmem:[#allocation8] sm:$0xff] }
 0x139   :  { %5644 = vmatprep.mubr.msk.f32.mxu0 %vm286_vm0, %v6901_v5  ;;  %5952 = vmatprep.subr.bf16.mxu0 %v5951_v3  ;;  %s6533_s28 = smov 56   ;;  %s6534_s0 = smov 64   ;;  %v6951_v34 = vld [vmem:[#allocation8 + $0x8] sm:$0xff]  ;;  %vm2441_vm3 = vcmask 523264   ;;  %vm4757_vm4 = vcmask 31744   ;;  %vm4814_vm8 = vcmask 130048  }
 0x13a   :  { %5954 = vmatpush3.bf16.msra.mxu0 %v5951_v3  ;;  %s6535_s15 = smov 80   ;;  %s6536_s26 = smov 112  }
 0x13b   :  { %5956 = vmatprep.subr.bf16.mxu0 %v5955_v6  ;;  %s6537_s3 = smov 72   ;;  %s6538_s27 = smov 104  }
 0x13c   :  { %s6539_s10 = smov 48   ;;  %s6540_s19 = smov 40  }
 0x13d   :  { %s7558_s13 = sld [smem:[#allocation40_spill]]  ;;  %s7559_s9 = sld [smem:[#allocation41_spill]] }
 0x13e   :  { %5958 = vmatpush3.bf16.msra.mxu0 %v5955_v6  ;;  %v6997_v6 = vld [vmem:[#allocation8 + $0x10] sm:$0xff]  ;;  %s7560_s7 = sld [smem:[#allocation42_spill]]  ;;  %s7561_s20 = sld [smem:[#allocation43_spill]] }
 0x13f   :  { %5657 = vmatprep.subr.mxu0 %v6528_v8  ;;  %s7562_s12 = sld [smem:[#allocation46_spill]]  ;;  %s7563_s21 = sld [smem:[#allocation47_spill]] }
 0x140   :  { %s6542_s30 = smov [#allocation25]  }
 0x141   :  { %5645 = vmatmul.mubr.msk.f32.vlgmr.msra.gmra.mrb[0].mxu0 %vm286_vm0, %v6905_v7 }
 0x142   :  { %5659 = vmatprep.mubr.msk.f32.mxu0 %vm6529_vm1, %v6528_v8 }
 0x214   :  { %v5646_v10 = vpop.f32.mrb[0].mxu0 }
 0x215   :  { %v6915_v11 = vadd.f32 %v5646_v10, %v5350_v9  ;;  %v359_v12 = vpop.f32.mrb[1].mxu0 }
 0x216   :  { %v6917_v13 = vadd.f32 %v5350_v9, %v359_v12 }
 0x218   :  { %370 = vrot.lane.b32.xlu0 %v6917_v13, %s6530_s24  ;;  %v6922_v14 = vmul.f32 0.35355338, %v6917_v13 }
 0x21a   :  { %535 = vrot.lane.b32.xlu1 %v6922_v14, %s6531_s6 }
 0x21c   :  { %537 = vrot.lane.b32.xlu0 %v6917_v13, %s6532_s1 }
 0x28a   :  { %v371_v15 = vpop.permute.xlu0 %370 }
 0x28b   :  { %5648 = vmatpush3.xpose.msk.msra.mxu1 %vm372_vm2, %v371_v15 }
 0x28c   :  { %5652 = vmatprep.subr.mxu1 %v6528_v8  ;;  %v536_v17 = vpop.permute.xlu1 %535 }
 0x28e   :  { %v538_v16 = vpop.permute.xlu0 %537  ;;  %5650 = vmatmul.mubr.msk.f32.vlgmr.msra.gmra.mrb[0].mxu1 %vm372_vm2, %v6922_v14 }
 0x28f   :  { %5658 = vmatpush3.xpose.msk.msra.mxu0 %vm372_vm2, %v538_v16  ;;  %5654 = vmatprep.mubr.msk.f32.mxu1 %vm6529_vm1, %v6528_v8 }
 0x290   :  { %5667 = vmatprep.subr.mxu0 %v6528_v8 }
 0x292   :  { %5660 = vmatmul.mubr.msk.f32.vlgmr.msra.gmra.mrb[2].mxu0 %vm372_vm2, %v536_v17 }
 0x293   :  { %5669 = vmatprep.mubr.msk.f32.mxu0 %vm6529_vm1, %v6528_v8  ;;  %5668 = vmatpush3.msra.mxu0 %v6951_v34 }
 0x294   :  { %5677 = vmatprep.subr.mxu0 %v6528_v8 }
 0x361   :  { %v444_v18 = vpop.f32.mrb[0].mxu1 }
 0x362   :  { %v5651_v19 = vpop.f32.mrb[1].mxu1  ;;  %v448_v20 = vsel %vm372_vm2, %v444_v18, -inf }
 0x363   :  { %449 = vmax.xlane.f32.xlu1 %v448_v20 }
 0x365   :  { %v609_v21 = vpop.f32.mrb[2].mxu0 }
 0x366   :  { %v5661_v22 = vpop.f32.mrb[3].mxu0  ;;  %v613_v23 = vsel %vm372_vm2, %v609_v21, -inf }
 0x367   :  { %614 = vmax.xlane.f32.xlu0 %v613_v23  ;;  %v7012_v22 = vmul.f32 0.35355338, %v6915_v11 }
 0x3f0   :  { %v450_v24 = vpop.xlane.xlu1 %449 }
 0x3f1   :  { %v451_v25 = vsub.f32 %v444_v18, %v450_v24 }
 0x3f3   :  { %v452_v26 = vmul.f32 1.442695, %v451_v25 }
 0x3f4   :  { %v615_v27 = vpop.xlane.xlu0 %614 }
 0x3f5   :  { %6076 = vpow2.f32 %v452_v26  ;;  %v616_v28 = vsub.f32 %v609_v21, %v615_v27 }
 0x3f7   :  { %v617_v29 = vmul.f32 1.442695, %v616_v28 }
 0x3f9   :  { %6078 = vpow2.f32 %v617_v29 }
 0x3ff   :  { %v6077_v30 = vpop.eup %6076 }
 0x400   :  { %v454_v31 = vsel %vm372_vm2, %v6077_v30, 0.0 }
 0x401   :  { %455 = vadd.xlane.f32.xlu0 %v454_v31  ;;  %v7032_v31 = vld [vmem:[#allocation8 + $0x18] sm:$0xff] }
 0x403   :  { %v6079_v32 = vpop.eup %6078 }
 0x404   :  { %v619_v33 = vsel %vm372_vm2, %v6079_v32, 0.0 }
 0x405   :  { %620 = vadd.xlane.f32.xlu1 %v619_v33 }
 0x416   :  { %624 = vrot.lane.b32.xlu1 %v6917_v13, %s6533_s28 }
 0x417   :  { %459 = vrot.lane.b32.xlu0 %v6917_v13, %s6534_s0 }
 0x41a   :  { %848 = vrot.lane.b32.xlu1 %v6917_v13, %s6535_s15 }
 0x41b   :  { %846 = vrot.lane.b32.xlu0 %v6922_v14, %s6536_s26 }
 0x48e   :  { %v456_v35 = vpop.xlane.xlu0 %455 }
 0x48f   :  { %6080 = vrcp.f32 %v456_v35 }
 0x492   :  { %v460_v36 = vpop.permute.xlu0 %459  ;;  %v621_v37 = vpop.xlane.xlu1 %620 }
 0x493   :  { %6082 = vrcp.f32 %v621_v37  ;;  %5653 = vmatpush3.msra.mxu1 %v460_v36 }
 0x494   :  { %5662 = vmatprep.subr.mxu1 %v6528_v8 }
 0x496   :  { %v625_v40 = vpop.permute.xlu1 %624  ;;  %v847_v49 = vpop.permute.xlu0 %846 }
 0x499   :  { %v6081_v38 = vpop.eup %6080 }
 0x49a   :  { %v458_v39 = vmul.f32 %v6081_v38, %v6077_v30  ;;  %v849_v47 = vpop.permute.xlu1 %848 }
 0x49c   :  { %5655 = vmatmul.mubr.msk.f32.vlgmr.msra.gmra.mrb[2].mxu1 %vm372_vm2, %v458_v39 }
 0x49d   :  { %v6083_v41 = vpop.eup %6082  ;;  %5663 = vmatpush3.msra.mxu1 %v625_v40  ;;  %5664 = vmatprep.mubr.msk.f32.mxu1 %vm6529_vm1, %v6528_v8 }
 0x49e   :  { %v623_v42 = vmul.f32 %v6083_v41, %v6079_v32  ;;  %5672 = vmatprep.subr.mxu1 %v6528_v8 }
 0x4a0   :  { %5665 = vmatmul.mubr.msk.f32.vlgmr.msra.gmra.mrb[4].mxu1 %vm372_vm2, %v623_v42 }
 0x4a1   :  { %5674 = vmatprep.mubr.msk.f32.mxu1 %vm6529_vm1, %v6528_v8  ;;  %5673 = vmatpush3.msra.mxu1 %v6963_v43 }
 0x4a2   :  { %5682 = vmatprep.subr.mxu1 %v6528_v8 }
 0x56f   :  { %v531_v44 = vpop.f32.mrb[2].mxu1 }
 0x570   :  { %v5656_v45 = vpop.f32.mrb[3].mxu1  ;;  %5675 = vmatmul.mubr.msk.f32.vlgmr.msra.gmra.mrb[6].mxu1 %vm372_vm2, %v531_v44 }
 0x571   :  { %5684 = vmatprep.mubr.msk.f32.mxu1 %vm6529_vm1, %v6528_v8 }
 0x573   :  { %v696_v46 = vpop.f32.mrb[4].mxu1 }
 0x574   :  { %v5666_v48 = vpop.f32.mrb[5].mxu1  ;;  %5670 = vmatmul.mubr.msk.f32.vlgmr.msra.gmra.mrb[4].mxu0 %vm372_vm2, %v696_v46 }
 0x575   :  { %5678 = vmatpush3.xpose.msk.msra.mxu0 %vm372_vm2, %v849_v47  ;;  %5679 = vmatprep.mubr.msk.f32.mxu0 %vm6529_vm1, %v6528_v8 }
 0x576   :  { %5687 = vmatprep.subr.mxu0 %v6528_v8 }
 0x578   :  { %5680 = vmatmul.mubr.msk.f32.vlgmr.msra.gmra.mrb[6].mxu0 %vm372_vm2, %v847_v49 }
 0x579   :  { %5689 = vmatprep.mubr.msk.f32.mxu0 %vm6529_vm1, %v6528_v8  ;;  %5688 = vmatpush3.msra.mxu0 %v6997_v6 }
 0x57a   :  { %5697 = vmatprep.subr.mxu0 %v6528_v8 }
 0x643   :  { %v842_v50 = vpop.f32.mrb[6].mxu1 }
 0x644   :  { %v5676_v51 = vpop.f32.mrb[7].mxu1 }
 0x647   :  { %v769_v52 = vpop.f32.mrb[4].mxu0 }
 0x648   :  { %v843_v53 = vadd.f32 %v842_v50, %v769_v52  ;;  %v5671_v54 = vpop.f32.mrb[5].mxu0 }
 0x64b   :  { %v920_v55 = vpop.f32.mrb[6].mxu0 }
 0x64c   :  { %v5681_v56 = vpop.f32.mrb[7].mxu0  ;;  %v924_v57 = vsel %vm372_vm2, %v920_v55, -inf }
 0x64d   :  { %925 = vmax.xlane.f32.xlu1 %v924_v57 }
 0x65e   :  { %1087 = vrot.lane.b32.xlu1 %v6917_v13, %s6537_s3 }
 0x662   :  { %1085 = vrot.lane.b32.xlu1 %v6922_v14, %s6538_s27 }
 0x666   :  { %1326 = vrot.lane.b32.xlu1 %v6915_v11, %s6530_s24 }
 0x6da   :  { %v926_v58 = vpop.xlane.xlu1 %925 }
 0x6db   :  { %v927_v59 = vsub.f32 %v920_v55, %v926_v58 }
 0x6dd   :  { %v928_v60 = vmul.f32 1.442695, %v927_v59 }
 0x6de   :  { %v1088_v2 = vpop.permute.xlu1 %1087 }
 0x6df   :  { %6084 = vpow2.f32 %v928_v60 }
 0x6e2   :  { %v1086_v4 = vpop.permute.xlu1 %1085 }
 0x6e6   :  { %v1327_v25 = vpop.permute.xlu1 %1326 }
 0x6e9   :  { %v6085_v61 = vpop.eup %6084 }
 0x6ea   :  { %v930_v62 = vsel %vm372_vm2, %v6085_v61, 0.0 }
 0x6eb   :  { %931 = vadd.xlane.f32.xlu0 %v930_v62 }
 0x701   :  { %935 = vrot.lane.b32.xlu0 %v6917_v13, %s6539_s10 }
 0x778   :  { %v932_v63 = vpop.xlane.xlu0 %931 }
 0x779   :  { %6086 = vrcp.f32 %v932_v63 }
 0x77c   :  { %v936_v0 = vpop.permute.xlu0 %935 }
 0x77d   :  { %5683 = vmatpush3.msra.mxu1 %v936_v0 }
 0x77e   :  { %5692 = vmatprep.subr.mxu1 %v6528_v8 }
 0x783   :  { %v6087_v1 = vpop.eup %6086 }
 0x784   :  { %v934_v3 = vmul.f32 %v6087_v1, %v6085_v61 }
 0x786   :  { %5685 = vmatmul.mubr.msk.f32.vlgmr.msra.gmra.mrb[8].mxu1 %vm372_vm2, %v934_v3 }
 0x787   :  { %5693 = vmatpush3.xpose.msk.msra.mxu1 %vm372_vm2, %v1088_v2  ;;  %5694 = vmatprep.mubr.msk.f32.mxu1 %vm6529_vm1, %v6528_v8 }
 0x788   :  { %5702 = vmatprep.subr.mxu1 %v6528_v8 }
 0x78a   :  { %5695 = vmatmul.mubr.msk.f32.vlgmr.msra.gmra.mrb[10].mxu1 %vm372_vm2, %v1086_v4 }
 0x78b   :  { %5704 = vmatprep.mubr.msk.f32.mxu1 %vm6529_vm1, %v6528_v8  ;;  %5703 = vmatpush3.msra.mxu1 %v7032_v31 }
 0x78c   :  { %5712 = vmatprep.subr.mxu1 %v6528_v8 }
 0x859   :  { %v1007_v9 = vpop.f32.mrb[8].mxu1 }
 0x85a   :  { %v5686_v10 = vpop.f32.mrb[9].mxu1  ;;  %5690 = vmatmul.mubr.msk.f32.vlgmr.msra.gmra.mrb[8].mxu0 %vm372_vm2, %v1007_v9 }
 0x85b   :  { %5699 = vmatprep.mubr.msk.f32.mxu0 %vm6529_vm1, %v6528_v8 }
 0x85d   :  { %v1159_v12 = vpop.f32.mrb[10].mxu1 }
 0x85e   :  { %v5696_v14 = vpop.f32.mrb[11].mxu1  ;;  %v1163_v15 = vsel %vm372_vm2, %v1159_v12, -inf }
 0x85f   :  { %1164 = vmax.xlane.f32.xlu0 %v1163_v15 }
 0x875   :  { %1174 = vrot.lane.b32.xlu0 %v6917_v13, %s6540_s19 }
 0x879   :  { %1492 = vrot.lane.b32.xlu0 %v6915_v11, %s6532_s1 }
 0x8ec   :  { %v1165_v16 = vpop.xlane.xlu0 %1164 }
 0x8ed   :  { %v1166_v17 = vsub.f32 %v1159_v12, %v1165_v16 }
 0x8ef   :  { %v1167_v18 = vmul.f32 1.442695, %v1166_v17 }
 0x8f0   :  { %v1175_v19 = vpop.permute.xlu0 %1174 }
 0x8f1   :  { %6088 = vpow2.f32 %v1167_v18  ;;  %5698 = vmatpush3.msra.mxu0 %v1175_v19 }
 0x8f2   :  { %5707 = vmatprep.subr.mxu0 %v6528_v8 }
 0x8f4   :  { %v1493_v29 = vpop.permute.xlu0 %1492 }
 0x8fb   :  { %v6089_v20 = vpop.eup %6088 }
 0x8fc   :  { %v1169_v21 = vsel %vm372_vm2, %v6089_v20, 0.0 }
 0x8fd   :  { %1170 = vadd.xlane.f32.xlu1 %v1169_v21 }
 0x90e   :  { %1490 = vrot.lane.b32.xlu1 %v7012_v22, %s6531_s6 }
 0x92d   :  { %v1080_v13 = vpop.f32.mrb[8].mxu0 }
 0x92e   :  { %v1084_v23 = vadd.f32 %v1080_v13, %v843_v53  ;;  %v5691_v24 = vpop.f32.mrb[9].mxu0 }
 0x98a   :  { %v1171_v26 = vpop.xlane.xlu1 %1170 }
 0x98b   :  { %6090 = vrcp.f32 %v1171_v26  ;;  %v5385_v26 = vld [vmem:[#allocation10] ss:$0 sm:$0xff] }
 0x98e   :  { %v1491_v30 = vpop.permute.xlu1 %1490 }
 0x995   :  { %v6091_v27 = vpop.eup %6090 }
 0x996   :  { %v1173_v28 = vmul.f32 %v6091_v27, %v6089_v20 }
 0x998   :  { %5700 = vmatmul.mubr.msk.f32.vlgmr.msra.gmra.mrb[10].mxu0 %vm372_vm2, %v1173_v28 }
 0x999   :  { %5708 = vmatpush3.xpose.msk.msra.mxu0 %vm372_vm2, %v1327_v25  ;;  %5709 = vmatprep.mubr.msk.f32.mxu0 %vm6529_vm1, %v6528_v8 }
 0x99a   :  { %5717 = vmatprep.subr.mxu0 %v6528_v8 }
 0x99c   :  { %5710 = vmatmul.mubr.msk.f32.vlgmr.msra.gmra.mrb[12].mxu0 %vm372_vm2, %v7012_v22 }
 0x99d   :  { %5718 = vmatpush3.xpose.msk.msra.mxu0 %vm372_vm2, %v1493_v29  ;;  %5719 = vmatprep.mubr.msk.f32.mxu0 %vm6529_vm1, %v6528_v8 }
 0x99e   :  { %5727 = vmatprep.subr.mxu0 %v6528_v8 }
 0x9a0   :  { %5720 = vmatmul.mubr.msk.f32.vlgmr.msra.gmra.mrb[14].mxu0 %vm372_vm2, %v1491_v30 }
 0x9a1   :  { %5728 = vmatpush3.msra.mxu0 %v6951_v34  ;;  %5729 = vmatprep.mubr.msk.f32.mxu0 %vm6529_vm1, %v6528_v8 }
 0x9a2   :  { %5737 = vmatprep.subr.mxu0 %v6528_v8 }
 0xa6b   :  { %v1246_v32 = vpop.f32.mrb[10].mxu0 }
 0xa6c   :  { %v5701_v33 = vpop.f32.mrb[11].mxu0  ;;  %5705 = vmatmul.mubr.msk.f32.vlgmr.msra.gmra.mrb[12].mxu1 %vm372_vm2, %v1246_v32 }
 0xa6d   :  { %5714 = vmatprep.mubr.msk.f32.mxu1 %vm6529_vm1, %v6528_v8 }
 0xa6f   :  { %v1399_v35 = vpop.f32.mrb[12].mxu0 }
 0xa70   :  { %v5711_v34 = vpop.f32.mrb[13].mxu0  ;;  %v1403_v36 = vsel %vm372_vm2, %v1399_v35, -inf }
 0xa71   :  { %1404 = vmax.xlane.f32.xlu0 %v1403_v36 }
 0xa73   :  { %v1564_v37 = vpop.f32.mrb[14].mxu0 }
 0xa74   :  { %v5721_v38 = vpop.f32.mrb[15].mxu0  ;;  %v1568_v39 = vsel %vm372_vm2, %v1564_v37, -inf }
 0xa75   :  { %1569 = vmax.xlane.f32.xlu1 %v1568_v39 }
 0xa86   :  { %1414 = vrot.lane.b32.xlu1 %v6915_v11, %s6534_s0 }
 0xa8a   :  { %1803 = vrot.lane.b32.xlu1 %v6915_v11, %s6535_s15 }
 0xa8e   :  { %1801 = vrot.lane.b32.xlu1 %v7012_v22, %s6536_s26 }
 0xafe   :  { %v1405_v40 = vpop.xlane.xlu0 %1404 }
 0xaff   :  { %v1406_v41 = vsub.f32 %v1399_v35, %v1405_v40 }
 0xb01   :  { %v1407_v42 = vmul.f32 1.442695, %v1406_v41 }
 0xb02   :  { %v1570_v44 = vpop.xlane.xlu1 %1569 }
 0xb03   :  { %6092 = vpow2.f32 %v1407_v42  ;;  %v1571_v45 = vsub.f32 %v1564_v37, %v1570_v44 }
 0xb05   :  { %v1572_v46 = vmul.f32 1.442695, %v1571_v45 }
 0xb06   :  { %v1415_v47 = vpop.permute.xlu1 %1414 }
 0xb07   :  { %6094 = vpow2.f32 %v1572_v46  ;;  %5713 = vmatpush3.msra.mxu1 %v1415_v47 }
 0xb08   :  { %5722 = vmatprep.subr.mxu1 %v6528_v8 }
 0xb0a   :  { %v1804_v0 = vpop.permute.xlu1 %1803 }
 0xb0d   :  { %v6093_v48 = vpop.eup %6092 }
 0xb0e   :  { %v1409_v49 = vsel %vm372_vm2, %v6093_v48, 0.0 }
 0xb0f   :  { %1410 = vadd.xlane.f32.xlu0 %v1409_v49 }
 0xb11   :  { %v6095_v50 = vpop.eup %6094 }
 0xb12   :  { %v1574_v51 = vsel %vm372_vm2, %v6095_v50, 0.0 }
 0xb13   :  { %1575 = vadd.xlane.f32.xlu0 %v1574_v51 }
 0xb29   :  { %1579 = vrot.lane.b32.xlu0 %v6915_v11, %s6533_s28 }
 0xb3f   :  { %v1319_v52 = vpop.f32.mrb[12].mxu1 }
 0xb40   :  { %v7052_v53 = vadd.f32 %v1319_v52, %v1084_v23  ;;  %v5706_v54 = vpop.f32.mrb[13].mxu1 }
 0xb42   :  { %v2285_v28 = vadd.f32 %v5385_v26, %v7052_v53 }
 0xb9c   :  { %v1411_v55 = vpop.xlane.xlu0 %1410 }
 0xb9d   :  { %6096 = vrcp.f32 %v1411_v55 }
 0xba0   :  { %v1576_v56 = vpop.xlane.xlu0 %1575 }
 0xba1   :  { %6098 = vrcp.f32 %v1576_v56 }
 0xba4   :  { %v1580_v59 = vpop.permute.xlu0 %1579 }
 0xba7   :  { %v6097_v57 = vpop.eup %6096 }
 0xba8   :  { %v1413_v58 = vmul.f32 %v6097_v57, %v6093_v48 }
 0xbaa   :  { %5715 = vmatmul.mubr.msk.f32.vlgmr.msra.gmra.mrb[14].mxu1 %vm372_vm2, %v1413_v58 }
 0xbab   :  { %v6099_v60 = vpop.eup %6098  ;;  %5723 = vmatpush3.msra.mxu1 %v1580_v59  ;;  %5724 = vmatprep.mubr.msk.f32.mxu1 %vm6529_vm1, %v6528_v8 }
 0xbac   :  { %v1578_v61 = vmul.f32 %v6099_v60, %v6095_v50  ;;  %5732 = vmatprep.subr.mxu1 %v6528_v8 }
 0xbae   :  { %5725 = vmatmul.mubr.msk.f32.vlgmr.msra.gmra.mrb[16].mxu1 %vm372_vm2, %v1578_v61 }
 0xbaf   :  { %5733 = vmatpush3.msra.mxu1 %v6963_v43  ;;  %5734 = vmatprep.mubr.msk.f32.mxu1 %vm6529_vm1, %v6528_v8  ;;  %v1802_v43 = vpop.permute.xlu1 %1801 }
 0xbb0   :  { %5742 = vmatprep.subr.mxu1 %v6528_v8 }
 0xc7d   :  { %v1486_v62 = vpop.f32.mrb[14].mxu1 }
 0xc7e   :  { %v5716_v63 = vpop.f32.mrb[15].mxu1  ;;  %5735 = vmatmul.mubr.msk.f32.vlgmr.msra.gmra.mrb[18].mxu1 %vm372_vm2, %v1486_v62 }
 0xc7f   :  { %5744 = vmatprep.mubr.msk.f32.mxu1 %vm6529_vm1, %v6528_v8 }
 0xc81   :  { %v1651_v1 = vpop.f32.mrb[16].mxu1 }
 0xc82   :  { %v5726_v2 = vpop.f32.mrb[17].mxu1  ;;  %5730 = vmatmul.mubr.msk.f32.vlgmr.msra.gmra.mrb[16].mxu0 %vm372_vm2, %v1651_v1 }
 0xc83   :  { %5738 = vmatpush3.xpose.msk.msra.mxu0 %vm372_vm2, %v1804_v0  ;;  %5739 = vmatprep.mubr.msk.f32.mxu0 %vm6529_vm1, %v6528_v8 }
 0xc84   :  { %5747 = vmatprep.subr.mxu0 %v6528_v8 }
 0xc86   :  { %5740 = vmatmul.mubr.msk.f32.vlgmr.msra.gmra.mrb[18].mxu0 %vm372_vm2, %v1802_v43 }
 0xc87   :  { %5748 = vmatpush3.msra.mxu0 %v6997_v6  ;;  %5749 = vmatprep.mubr.msk.f32.mxu0 %vm6529_vm1, %v6528_v8 }
 0xc88   :  { %5757 = vmatprep.subr.mxu0 %v6528_v8 }
 0xd51   :  { %v1797_v3 = vpop.f32.mrb[18].mxu1 }
 0xd52   :  { %v5736_v4 = vpop.f32.mrb[19].mxu1 }
 0xd53   :  { %v5387_v4 = vld [vmem:[%s7559_s9] ss:$0 sm:$0xff] }
 0xd55   :  { %v1724_v9 = vpop.f32.mrb[16].mxu0 }
 0xd56   :  { %v1798_v10 = vadd.f32 %v1797_v3, %v1724_v9  ;;  %v5731_v12 = vpop.f32.mrb[17].mxu0 }
 0xd57   :  { %v2332_v12 = vld [vmem:[#allocation11] sm:$0xff] }
 0xd59   :  { %v1875_v14 = vpop.f32.mrb[18].mxu0 }
 0xd5a   :  { %v5741_v15 = vpop.f32.mrb[19].mxu0  ;;  %v1879_v16 = vsel %vm372_vm2, %v1875_v14, -inf }
 0xd5b   :  { %1880 = vmax.xlane.f32.xlu0 %v1879_v16  ;;  %v2334_v16 = vld [vmem:[#allocation11 + $0x10] sm:$0xff] }
 0xd71   :  { %1890 = vrot.lane.b32.xlu0 %v6915_v11, %s6539_s10 }
 0xd75   :  { %2040 = vrot.lane.b32.xlu0 %v7012_v22, %s6538_s27 }
 0xde8   :  { %v1881_v6 = vpop.xlane.xlu0 %1880 }
 0xde9   :  { %v1882_v17 = vsub.f32 %v1875_v14, %v1881_v6  ;;  %v2333_v14 = vld [vmem:[#allocation11 + $0x8] sm:$0xff]  ;;  %v2335_v6 = vld [vmem:[#allocation11 + $0x18] sm:$0xff] }
 0xdea   :  { %v5959_v15 = vpack.c.bf16 %v2333_v14, %v2332_v12  ;;  %v5394_v14 = vld [vmem:[%s7560_s7] ss:$0 sm:$0xff] }
 0xdeb   :  { %v1883_v18 = vmul.f32 1.442695, %v1882_v17  ;;  %v5963_v17 = vpack.c.bf16 %v2335_v6, %v2334_v16  ;;  %v5395_v16 = vld [vmem:[%s7561_s20] ss:$0 sm:$0xff] }
 0xdec   :  { %v1891_v19 = vpop.permute.xlu0 %1890 }
 0xded   :  { %6100 = vpow2.f32 %v1883_v18  ;;  %5743 = vmatpush3.msra.mxu1 %v1891_v19  ;;  %v2337_v18 = vld [vmem:[#allocation14] sm:$0xff]  ;;  %v2338_v19 = vld [vmem:[#allocation14 + $0x8] sm:$0xff] }
 0xdee   :  { %5752 = vmatprep.subr.mxu1 %v6528_v8 }
 0xdf0   :  { %v2041_v25 = vpop.permute.xlu0 %2040 }
 0xdf7   :  { %v6101_v20 = vpop.eup %6100 }
 0xdf8   :  { %v1885_v21 = vsel %vm372_vm2, %v6101_v20, 0.0 }
 0xdf9   :  { %1886 = vadd.xlane.f32.xlu1 %v1885_v21 }
 0xe0a   :  { %2042 = vrot.lane.b32.xlu1 %v6915_v11, %s6537_s3 }
 0xe86   :  { %v1887_v13 = vpop.xlane.xlu1 %1886 }
 0xe87   :  { %6102 = vrcp.f32 %v1887_v13 }
 0xe8a   :  { %v2043_v22 = vpop.permute.xlu1 %2042 }
 0xe91   :  { %v6103_v23 = vpop.eup %6102 }
 0xe92   :  { %v1889_v24 = vmul.f32 %v6103_v23, %v6101_v20  ;;  %v5967_v20 = vpack.c.bf16 %v2338_v19, %v2337_v18 }
 0xe94   :  { %5745 = vmatmul.mubr.msk.f32.vlgmr.msra.gmra.mrb[20].mxu1 %vm372_vm2, %v1889_v24 }
 0xe95   :  { %5753 = vmatpush3.xpose.msk.msra.mxu1 %vm372_vm2, %v2043_v22  ;;  %5754 = vmatprep.mubr.msk.f32.mxu1 %vm6529_vm1, %v6528_v8 }
 0xe96   :  { %5762 = vmatprep.subr.mxu1 %v6528_v8 }
 0xe98   :  { %5755 = vmatmul.mubr.msk.f32.vlgmr.msra.gmra.mrb[22].mxu1 %vm372_vm2, %v2041_v25  ;;  %v2339_v25 = vld [vmem:[#allocation14 + $0x10] sm:$0xff] }
 0xe99   :  { %5763 = vmatpush3.msra.mxu1 %v7032_v31  ;;  %5764 = vmatprep.mubr.msk.f32.mxu1 %vm6529_vm1, %v6528_v8  ;;  %v2287_v31 = vadd.f32 %v2285_v28, %v6901_v5 }
 0xe9a   :  { %5813 = vmatprep.subr.mxu1 %v6528_v8 }
 0xe9b   :  { %v2289_v35 = vsel %vm286_vm0, %v2287_v31, 0.0 }
 0xf67   :  { %v1962_v27 = vpop.f32.mrb[20].mxu1 }
 0xf68   :  { %v5746_v29 = vpop.f32.mrb[21].mxu1  ;;  %5750 = vmatmul.mubr.msk.f32.vlgmr.msra.gmra.mrb[20].mxu0 %vm372_vm2, %v1962_v27 }
 0xf69   :  { %5759 = vmatprep.mubr.msk.f32.mxu0 %vm6529_vm1, %v6528_v8 }
 0xf6b   :  { %v2114_v30 = vpop.f32.mrb[22].mxu1 }
 0xf6c   :  { %v5756_v32 = vpop.f32.mrb[23].mxu1  ;;  %v2118_v33 = vsel %vm372_vm2, %v2114_v30, -inf }
 0xf6d   :  { %2119 = vmax.xlane.f32.xlu1 %v2118_v33  ;;  %v2342_v32 = vld [vmem:[#allocation14 + $0x28] sm:$0xff] }
 0xf71   :  { %2290 = vadd.xlane.f32.xlu1 %v2289_v35  ;;  %v2344_v35 = vld [vmem:[#allocation14 + $0x38] sm:$0xff] }
 0xffa   :  { %v2120_v34 = vpop.xlane.xlu1 %2119 }
 0xffb   :  { %v2121_v36 = vsub.f32 %v2114_v30, %v2120_v34  ;;  %v2341_v30 = vld [vmem:[#allocation14 + $0x20] sm:$0xff] }
 0xffc   :  { %v5975_v33 = vpack.c.bf16 %v2342_v32, %v2341_v30 }
 0xffd   :  { %v2122_v37 = vmul.f32 1.442695, %v2121_v36  ;;  %v5388_v36 = vld [vmem:[#allocation13] ss:$0 sm:$0xff] }
 0xffe   :  { %v2291_v49 = vpop.xlane.xlu1 %2290 }
 0xfff   :  { %6104 = vpow2.f32 %v2122_v37 }
0x1009   :  { %v6105_v38 = vpop.eup %6104 }
0x100a   :  { %v2124_v39 = vsel %vm372_vm2, %v6105_v38, 0.0 }
0x100b   :  { %2125 = vadd.xlane.f32.xlu0 %v2124_v39 }
0x1021   :  { %2129 = vrot.lane.b32.xlu0 %v6915_v11, %s6540_s19  ;;  %v2296_v11 = vmul.f32 0.03125, %v2291_v49 }
0x1023   :  { %v2298_v53 = vsub.f32 %v2287_v31, %v2296_v11  ;;  %v2343_v31 = vld [vmem:[#allocation14 + $0x30] sm:$0xff] }
0x1024   :  { %v5979_v34 = vpack.c.bf16 %v2344_v35, %v2343_v31 }
0x1025   :  { %v2300_v57 = vmul.f32 %v2298_v53, %v2298_v53 }
0x1027   :  { %v2302_v58 = vsel %vm286_vm0, %v2300_v57, 0.0 }
0x103b   :  { %v2035_v40 = vpop.f32.mrb[20].mxu0 }
0x103c   :  { %v2039_v41 = vadd.f32 %v2035_v40, %v1798_v10  ;;  %v5751_v42 = vpop.f32.mrb[21].mxu0 }
0x1098   :  { %v2126_v44 = vpop.xlane.xlu0 %2125 }
0x1099   :  { %6106 = vrcp.f32 %v2126_v44  ;;  %v5391_v44 = vld [vmem:[#allocation16] ss:$0 sm:$0xff] }
0x109c   :  { %v2130_v5 = vpop.permute.xlu0 %2129 }
0x109d   :  { %5758 = vmatpush3.msra.mxu0 %v2130_v5 }
0x109e   :  { %5960 = vmatprep.subr.bf16.mxu0 %v5959_v15 }
0x10a3   :  { %v6107_v45 = vpop.eup %6106 }
0x10a4   :  { %v2128_v46 = vmul.f32 %v6107_v45, %v6105_v38 }
0x10a6   :  { %5760 = vmatmul.mubr.msk.f32.vlgmr.msra.gmra.mrb[22].mxu0 %vm372_vm2, %v2128_v46 }
0x10a7   :  { %5962 = vmatpush3.bf16.msra.mxu0 %v5959_v15 }
0x10a8   :  { %5964 = vmatprep.subr.bf16.mxu0 %v5963_v17 }
0x10ab   :  { %5966 = vmatpush3.bf16.msra.mxu0 %v5963_v17 }
0x10ac   :  { %5968 = vmatprep.subr.bf16.mxu0 %v5967_v20 }
0x1179   :  { %v2201_v47 = vpop.f32.mrb[22].mxu0 }
0x117a   :  { %v5761_v48 = vpop.f32.mrb[23].mxu0  ;;  %5765 = vmatmul.mubr.msk.f32.vlgmr.msra.gmra.mrb[24].mxu1 %vm372_vm2, %v2201_v47 }
0x117b   :  { %5815 = vmatprep.mubr.msk.f32.mxu1 %vm6529_vm1, %v6528_v8 }
0x124d   :  { %v2274_v50 = vpop.f32.mrb[24].mxu1 }
0x124e   :  { %v2278_v51 = vadd.f32 %v2274_v50, %v2039_v41  ;;  %v5766_v52 = vpop.f32.mrb[25].mxu1 }
0x1250   :  { %v2286_v54 = vadd.f32 %v5385_v26, %v2278_v51  ;;  %v2340_v26 = vld [vmem:[#allocation14 + $0x18] sm:$0xff] }
0x1251   :  { %v5971_v29 = vpack.c.bf16 %v2340_v26, %v2339_v25 }
0x1252   :  { %v2288_v55 = vadd.f32 %v2286_v54, %v6905_v7  ;;  %v5386_v7 = vld [vmem:[%s7558_s13] ss:$0 sm:$0xff] }
0x1254   :  { %v2292_v56 = vsel %vm286_vm0, %v2288_v55, 0.0 }
0x1255   :  { %2293 = vadd.xlane.f32.xlu1 %v2292_v56 }
0x1259   :  { %2303 = vadd.xlane.f32.xlu1 %v2302_v58 }
0x12e2   :  { %v2294_v59 = vpop.xlane.xlu1 %2293 }
0x12e3   :  { %v2297_v60 = vmul.f32 0.03125, %v2294_v59 }
0x12e5   :  { %v2299_v61 = vsub.f32 %v2288_v55, %v2297_v60 }
0x12e6   :  { %v2304_v62 = vpop.xlane.xlu1 %2303 }
0x12e7   :  { %v2308_v63 = vmul.f32 0.03125, %v2304_v62  ;;  %v2301_v0 = vmul.f32 %v2299_v61, %v2299_v61  ;;  %v2568_v62 = vld [vmem:[#allocation17 + $0x8] sm:$0xff] }
0x12e9   :  { %v2310_v1 = vadd.f32 1e-05, %v2308_v63  ;;  %v2305_v2 = vsel %vm286_vm0, %v2301_v0, 0.0  ;;  %v2569_v0 = vld [vmem:[#allocation17 + $0x10] sm:$0xff] }
0x12ea   :  { %2306 = vadd.xlane.f32.xlu1 %v2305_v2 }
0x12eb   :  { %6108 = vrsqrt.f32 %v2310_v1  ;;  %v2570_v1 = vld [vmem:[#allocation17 + $0x18] sm:$0xff] }
0x12ec   :  { %v5987_v2 = vpack.c.bf16 %v2570_v1, %v2569_v0 }
0x12f5   :  { %v6109_v43 = vpop.eup %6108 }
0x12f6   :  { %v2314_v3 = vmul.f32 %v6109_v43, %v2298_v53 }
0x12f8   :  { %v2322_v9 = vmul.f32 %v5386_v7, %v2314_v3 }
0x12fa   :  { %v2330_v10 = vadd.f32 %v5387_v4, %v2322_v9 }
0x12fc   :  { %5775 = vmatprep.mubr.msk.f32.mxu0 %vm286_vm0, %v2330_v10 }
0x1377   :  { %v2307_v21 = vpop.xlane.xlu1 %2306 }
0x1378   :  { %v2309_v13 = vmul.f32 0.03125, %v2307_v21 }
0x137a   :  { %v2311_v23 = vadd.f32 1e-05, %v2309_v13  ;;  %v5396_v13 = vld [vmem:[#allocation19] ss:$0 sm:$0xff] }
0x137c   :  { %6110 = vrsqrt.f32 %v2311_v23 }
0x1386   :  { %v6111_v24 = vpop.eup %6110 }
0x1387   :  { %v2315_v22 = vmul.f32 %v6111_v24, %v2299_v61  ;;  %v2567_v61 = vld [vmem:[#allocation17] sm:$0xff] }
0x1388   :  { %v5983_v63 = vpack.c.bf16 %v2568_v62, %v2567_v61 }
0x1389   :  { %v2323_v27 = vmul.f32 %v5386_v7, %v2315_v22 }
0x138b   :  { %v2331_v28 = vadd.f32 %v5387_v4, %v2323_v27 }
0x138d   :  { %5776 = vmatmul.mubr.msk.f32.vlgmr.msra.gmra.mrb[24].mxu0 %vm286_vm0, %v2331_v28 }
0x138e   :  { %5970 = vmatpush3.bf16.msra.mxu0 %v5967_v20 }
0x138f   :  { %5972 = vmatprep.subr.bf16.mxu0 %v5971_v29 }
0x1392   :  { %5974 = vmatpush3.bf16.msra.mxu0 %v5971_v29 }
0x1393   :  { %5976 = vmatprep.subr.bf16.mxu0 %v5975_v33 }
0x1396   :  { %5978 = vmatpush3.bf16.msra.mxu0 %v5975_v33 }
0x1397   :  { %5980 = vmatprep.subr.bf16.mxu0 %v5979_v34 }
0x139a   :  { %5982 = vmatpush3.bf16.msra.mxu0 %v5979_v34 }
0x139b   :  { %5984 = vmatprep.subr.bf16.mxu0 %v5983_v63 }
0x1460   :  { %v5777_v37 = vpop.f32.mrb[24].mxu0 }
0x1461   :  { %v2430_v38 = vadd.f32 %v5777_v37, %v5388_v36  ;;  %v2424_v39 = vpop.f32.mrb[25].mxu0 }
0x1462   :  { %v2425_v40 = vadd.f32 %v5388_v36, %v2424_v39 }
0x1463   :  { %v2434_v42 = vmax.f32 %v2430_v38, 0.0 }
0x1464   :  { %v2433_v41 = vmax.f32 %v2425_v40, 0.0 }
0x1466   :  { %5794 = vmatprep.mubr.msk.f32.mxu0 %vm2441_vm3, %v2433_v41 }
0x1467   :  { %5795 = vmatmul.mubr.msk.f32.vlgmr.msra.gmra.mrb[26].mxu0 %vm2441_vm3, %v2434_v42 }
0x1468   :  { %5986 = vmatpush3.bf16.msra.mxu0 %v5983_v63 }
0x1469   :  { %5988 = vmatprep.subr.bf16.mxu0 %v5987_v2 }
0x146c   :  { %5990 = vmatpush3.bf16.msra.mxu0 %v5987_v2 }
0x146d   :  { %5808 = vmatprep.subr.mxu0 %v6528_v8 }
0x153a   :  { %v5796_v5 = vpop.f32.mrb[26].mxu0 }
0x153b   :  { %v2514_v45 = vpop.f32.mrb[27].mxu0  ;;  %v2520_v46 = vadd.f32 %v5796_v5, %v5391_v44 }
0x153c   :  { %v2515_v47 = vadd.f32 %v5391_v44, %v2514_v45 }
0x153d   :  { %v2524_v11 = vadd.f32 %v2520_v46, %v2331_v28 }
0x153e   :  { %v2523_v48 = vadd.f32 %v2515_v47, %v2330_v10  ;;  %v7179_v47 = vld [vmem:[#allocation20 + $0x8] sm:$0xff] }
0x153f   :  { %v2528_v50 = vsel %vm286_vm0, %v2524_v11, 0.0 }
0x1540   :  { %v2525_v49 = vsel %vm286_vm0, %v2523_v48, 0.0 }
0x1541   :  { %2526 = vadd.xlane.f32.xlu1 %v2525_v49 }
0x1545   :  { %2529 = vadd.xlane.f32.xlu1 %v2528_v50 }
0x15ce   :  { %v2527_v51 = vpop.xlane.xlu1 %2526 }
0x15cf   :  { %v2531_v52 = vmul.f32 0.03125, %v2527_v51 }
0x15d1   :  { %v2533_v53 = vsub.f32 %v2523_v48, %v2531_v52 }
0x15d2   :  { %v2530_v54 = vpop.xlane.xlu1 %2529 }
0x15d3   :  { %v2532_v55 = vmul.f32 0.03125, %v2530_v54  ;;  %v2535_v56 = vmul.f32 %v2533_v53, %v2533_v53  ;;  %v7190_v54 = vld [vmem:[#allocation20] sm:$0xff] }
0x15d5   :  { %v2534_v57 = vsub.f32 %v2524_v11, %v2532_v55  ;;  %v2537_v58 = vsel %vm286_vm0, %v2535_v56, 0.0 }
0x15d6   :  { %2538 = vadd.xlane.f32.xlu0 %v2537_v58 }
0x15d7   :  { %v2536_v59 = vmul.f32 %v2534_v57, %v2534_v57 }
0x15d9   :  { %v2540_v60 = vsel %vm286_vm0, %v2536_v59, 0.0 }
0x15da   :  { %2541 = vadd.xlane.f32.xlu1 %v2540_v60 }
0x1663   :  { %v2539_v43 = vpop.xlane.xlu0 %2538 }
0x1664   :  { %v2543_v7 = vmul.f32 0.03125, %v2539_v43 }
0x1666   :  { %v2545_v3 = vadd.f32 1e-05, %v2543_v7 }
0x1667   :  { %v2542_v4 = vpop.xlane.xlu1 %2541 }
0x1668   :  { %6112 = vrsqrt.f32 %v2545_v3  ;;  %v2544_v9 = vmul.f32 0.03125, %v2542_v4 }
0x166a   :  { %v2546_v10 = vadd.f32 1e-05, %v2544_v9 }
0x166c   :  { %6114 = vrsqrt.f32 %v2546_v10 }
0x1672   :  { %v6113_v12 = vpop.eup %6112 }
0x1673   :  { %v2549_v15 = vmul.f32 %v6113_v12, %v2533_v53 }
0x1675   :  { %v2557_v6 = vmul.f32 %v5394_v14, %v2549_v15 }
0x1676   :  { %v6115_v17 = vpop.eup %6114 }
0x1677   :  { %v2550_v18 = vmul.f32 %v6115_v17, %v2534_v57  ;;  %v7132_v19 = vadd.f32 %v5395_v16, %v2557_v6 }
0x1679   :  { %v2558_v20 = vmul.f32 %v5394_v14, %v2550_v18  ;;  %5805 = vmatprep.mubr.msk.f32.mxu0 %vm286_vm0, %v7132_v19 }
0x167b   :  { %v7136_v21 = vadd.f32 %v5395_v16, %v2558_v20  ;;  %v7222_v20 = vld [vmem:[#allocation20 + $0x10] sm:$0xff] }
0x167d   :  { %5806 = vmatmul.mubr.msk.f32.vlgmr.msra.gmra.mrb[28].mxu0 %vm286_vm0, %v7136_v21 }
0x167e   :  { %5810 = vmatprep.mubr.msk.f32.mxu0 %vm6529_vm1, %v6528_v8 }
0x1750   :  { %v5807_v23 = vpop.f32.mrb[28].mxu0 }
0x1751   :  { %v7142_v24 = vadd.f32 %v5807_v23, %v5396_v13  ;;  %v2659_v22 = vpop.f32.mrb[29].mxu0 }
0x1752   :  { %v7144_v25 = vadd.f32 %v5396_v13, %v2659_v22 }
0x1754   :  { %2670 = vrot.lane.b32.xlu1 %v7144_v25, %s6530_s24  ;;  %v7151_v26 = vmul.f32 0.35355338, %v7144_v25 }
0x1758   :  { %2836 = vrot.lane.b32.xlu1 %v7144_v25, %s6532_s1 }
0x175c   :  { %2834 = vrot.lane.b32.xlu1 %v7151_v26, %s6531_s6 }
0x17c6   :  { %v2671_v27 = vpop.permute.xlu1 %2670 }
0x17c7   :  { %5809 = vmatpush3.xpose.msk.msra.mxu0 %vm372_vm2, %v2671_v27 }
0x17c8   :  { %5818 = vmatprep.subr.mxu0 %v6528_v8 }
0x17ca   :  { %v2837_v28 = vpop.permute.xlu1 %2836  ;;  %5811 = vmatmul.mubr.msk.f32.vlgmr.msra.gmra.mrb[30].mxu0 %vm372_vm2, %v7151_v26 }
0x17cb   :  { %5819 = vmatpush3.xpose.msk.msra.mxu0 %vm372_vm2, %v2837_v28  ;;  %5820 = vmatprep.mubr.msk.f32.mxu0 %vm6529_vm1, %v6528_v8  ;;  %v7235_v28 = vmul.f32 0.35355338, %v7142_v24 }
0x17cc   :  { %5828 = vmatprep.subr.mxu0 %v6528_v8 }
0x17ce   :  { %v2835_v29 = vpop.permute.xlu1 %2834 }
0x17cf   :  { %5821 = vmatmul.mubr.msk.f32.vlgmr.msra.gmra.mrb[32].mxu0 %vm372_vm2, %v2835_v29 }
0x17d0   :  { %5830 = vmatprep.mubr.msk.f32.mxu0 %vm6529_vm1, %v6528_v8  ;;  %5829 = vmatpush3.msra.mxu0 %v7179_v47 }
0x17d1   :  { %5838 = vmatprep.subr.mxu0 %v6528_v8 }
0x189d   :  { %v2743_v30 = vpop.f32.mrb[30].mxu0 }
0x189e   :  { %v5812_v32 = vpop.f32.mrb[31].mxu0  ;;  %v2747_v33 = vsel %vm372_vm2, %v2743_v30, -inf }
0x189f   :  { %2748 = vmax.xlane.f32.xlu0 %v2747_v33 }
0x18a2   :  { %v2908_v31 = vpop.f32.mrb[32].mxu0 }
0x18a3   :  { %v5822_v35 = vpop.f32.mrb[33].mxu0  ;;  %v2912_v34 = vsel %vm372_vm2, %v2908_v31, -inf }
0x18a4   :  { %2913 = vmax.xlane.f32.xlu1 %v2912_v34 }
0x18b5   :  { %2758 = vrot.lane.b32.xlu0 %v7144_v25, %s6534_s0  ;;  %3147 = vrot.lane.b32.xlu1 %v7144_v25, %s6535_s15 }
0x192c   :  { %v2749_v36 = vpop.xlane.xlu0 %2748 }
0x192d   :  { %v2750_v37 = vsub.f32 %v2743_v30, %v2749_v36 }
0x192f   :  { %v2751_v38 = vmul.f32 1.442695, %v2750_v37 }
0x1930   :  { %v2759_v39 = vpop.permute.xlu0 %2758 }
0x1931   :  { %6116 = vpow2.f32 %v2751_v38  ;;  %5814 = vmatpush3.msra.mxu1 %v2759_v39  ;;  %v2914_v40 = vpop.xlane.xlu1 %2913 }
0x1932   :  { %v2915_v41 = vsub.f32 %v2908_v31, %v2914_v40  ;;  %5823 = vmatprep.subr.mxu1 %v6528_v8 }
0x1934   :  { %v2916_v42 = vmul.f32 1.442695, %v2915_v41 }
0x1935   :  { %v3148_v58 = vpop.permute.xlu1 %3147 }
0x1936   :  { %6118 = vpow2.f32 %v2916_v42 }
0x193b   :  { %v6117_v44 = vpop.eup %6116 }
0x193c   :  { %v2753_v5 = vsel %vm372_vm2, %v6117_v44, 0.0 }
0x193d   :  { %2754 = vadd.xlane.f32.xlu0 %v2753_v5 }
0x1940   :  { %v6119_v45 = vpop.eup %6118 }
0x1941   :  { %v2918_v46 = vsel %vm372_vm2, %v6119_v45, 0.0 }
0x1942   :  { %2919 = vadd.xlane.f32.xlu0 %v2918_v46 }
0x1958   :  { %2923 = vrot.lane.b32.xlu0 %v7144_v25, %s6533_s28 }
0x195c   :  { %3145 = vrot.lane.b32.xlu0 %v7151_v26, %s6536_s26 }
0x19ca   :  { %v2755_v48 = vpop.xlane.xlu0 %2754 }
0x19cb   :  { %6120 = vrcp.f32 %v2755_v48 }
0x19cf   :  { %v2920_v49 = vpop.xlane.xlu0 %2919 }
0x19d0   :  { %6122 = vrcp.f32 %v2920_v49 }
0x19d3   :  { %v2924_v51 = vpop.permute.xlu0 %2923 }
0x19d5   :  { %v6121_v11 = vpop.eup %6120 }
0x19d6   :  { %v2757_v50 = vmul.f32 %v6121_v11, %v6117_v44  ;;  %v7259_v44 = vld [vmem:[#allocation20 + $0x18] sm:$0xff] }
0x19d7   :  { %v3146_v60 = vpop.permute.xlu0 %3145 }
0x19d8   :  { %5816 = vmatmul.mubr.msk.f32.vlgmr.msra.gmra.mrb[26].mxu1 %vm372_vm2, %v2757_v50 }
0x19d9   :  { %5824 = vmatpush3.msra.mxu1 %v2924_v51  ;;  %5825 = vmatprep.mubr.msk.f32.mxu1 %vm6529_vm1, %v6528_v8 }
0x19da   :  { %v6123_v52 = vpop.eup %6122  ;;  %5833 = vmatprep.subr.mxu1 %v6528_v8 }
0x19db   :  { %v2922_v53 = vmul.f32 %v6123_v52, %v6119_v45 }
0x19dd   :  { %5826 = vmatmul.mubr.msk.f32.vlgmr.msra.gmra.mrb[28].mxu1 %vm372_vm2, %v2922_v53 }
0x19de   :  { %5835 = vmatprep.mubr.msk.f32.mxu1 %vm6529_vm1, %v6528_v8  ;;  %5834 = vmatpush3.msra.mxu1 %v7190_v54 }
0x19df   :  { %5843 = vmatprep.subr.mxu1 %v6528_v8 }
0x1aab   :  { %v2830_v55 = vpop.f32.mrb[26].mxu1 }
0x1aac   :  { %v5817_v56 = vpop.f32.mrb[27].mxu1  ;;  %5836 = vmatmul.mubr.msk.f32.vlgmr.msra.gmra.mrb[30].mxu1 %vm372_vm2, %v2830_v55 }
0x1aad   :  { %5845 = vmatprep.mubr.msk.f32.mxu1 %vm6529_vm1, %v6528_v8 }
0x1ab0   :  { %v2995_v57 = vpop.f32.mrb[28].mxu1 }
0x1ab1   :  { %v5827_v59 = vpop.f32.mrb[29].mxu1  ;;  %5831 = vmatmul.mubr.msk.f32.vlgmr.msra.gmra.mrb[34].mxu0 %vm372_vm2, %v2995_v57 }
0x1ab2   :  { %5839 = vmatpush3.xpose.msk.msra.mxu0 %vm372_vm2, %v3148_v58  ;;  %5840 = vmatprep.mubr.msk.f32.mxu0 %vm6529_vm1, %v6528_v8 }
0x1ab3   :  { %5848 = vmatprep.subr.mxu0 %v6528_v8 }
0x1ab5   :  { %5841 = vmatmul.mubr.msk.f32.vlgmr.msra.gmra.mrb[36].mxu0 %vm372_vm2, %v3146_v60 }
0x1ab6   :  { %5850 = vmatprep.mubr.msk.f32.mxu0 %vm6529_vm1, %v6528_v8  ;;  %5849 = vmatpush3.msra.mxu0 %v7222_v20 }
0x1ab7   :  { %5858 = vmatprep.subr.mxu0 %v6528_v8 }
0x1b7f   :  { %v3141_v61 = vpop.f32.mrb[30].mxu1 }
0x1b80   :  { %v5837_v62 = vpop.f32.mrb[31].mxu1 }
0x1b84   :  { %v3068_v63 = vpop.f32.mrb[34].mxu0 }
0x1b85   :  { %v3142_v0 = vadd.f32 %v3141_v61, %v3068_v63  ;;  %v5832_v1 = vpop.f32.mrb[35].mxu0 }
0x1b88   :  { %v3219_v2 = vpop.f32.mrb[36].mxu0 }
0x1b89   :  { %v5842_v43 = vpop.f32.mrb[37].mxu0  ;;  %v3223_v7 = vsel %vm372_vm2, %v3219_v2, -inf }
0x1b8a   :  { %3224 = vmax.xlane.f32.xlu0 %v3223_v7 }
0x1ba0   :  { %3234 = vrot.lane.b32.xlu0 %v7144_v25, %s6539_s10 }
0x1ba4   :  { %3384 = vrot.lane.b32.xlu0 %v7151_v26, %s6538_s27 }
0x1c17   :  { %v3225_v3 = vpop.xlane.xlu0 %3224 }
0x1c18   :  { %v3226_v4 = vsub.f32 %v3219_v2, %v3225_v3 }
0x1c1a   :  { %v3227_v9 = vmul.f32 1.442695, %v3226_v4 }
0x1c1b   :  { %v3235_v10 = vpop.permute.xlu0 %3234 }
0x1c1c   :  { %6124 = vpow2.f32 %v3227_v9  ;;  %5844 = vmatpush3.msra.mxu1 %v3235_v10 }
0x1c1d   :  { %5853 = vmatprep.subr.mxu1 %v6528_v8 }
0x1c1f   :  { %v3385_v18 = vpop.permute.xlu0 %3384 }
0x1c26   :  { %v6125_v12 = vpop.eup %6124 }
0x1c27   :  { %v3229_v14 = vsel %vm372_vm2, %v6125_v12, 0.0 }
0x1c28   :  { %3230 = vadd.xlane.f32.xlu1 %v3229_v14 }
0x1c39   :  { %3386 = vrot.lane.b32.xlu1 %v7144_v25, %s6537_s3 }
0x1cb5   :  { %v3231_v15 = vpop.xlane.xlu1 %3230 }
0x1cb6   :  { %6126 = vrcp.f32 %v3231_v15 }
0x1cb9   :  { %v3387_v17 = vpop.permute.xlu1 %3386 }
0x1cc0   :  { %v6127_v16 = vpop.eup %6126 }
0x1cc1   :  { %v3233_v6 = vmul.f32 %v6127_v16, %v6125_v12 }
0x1cc3   :  { %5846 = vmatmul.mubr.msk.f32.vlgmr.msra.gmra.mrb[32].mxu1 %vm372_vm2, %v3233_v6 }
0x1cc4   :  { %5854 = vmatpush3.xpose.msk.msra.mxu1 %vm372_vm2, %v3387_v17  ;;  %5855 = vmatprep.mubr.msk.f32.mxu1 %vm6529_vm1, %v6528_v8 }
0x1cc5   :  { %5863 = vmatprep.subr.mxu1 %v6528_v8 }
0x1cc7   :  { %5856 = vmatmul.mubr.msk.f32.vlgmr.msra.gmra.mrb[34].mxu1 %vm372_vm2, %v3385_v18 }
0x1cc8   :  { %5865 = vmatprep.mubr.msk.f32.mxu1 %vm6529_vm1, %v6528_v8  ;;  %5864 = vmatpush3.msra.mxu1 %v7259_v44 }
0x1cc9   :  { %5873 = vmatprep.subr.mxu1 %v6528_v8 }
0x1d96   :  { %v3306_v13 = vpop.f32.mrb[32].mxu1 }
0x1d97   :  { %v5847_v23 = vpop.f32.mrb[33].mxu1  ;;  %5851 = vmatmul.mubr.msk.f32.vlgmr.msra.gmra.mrb[38].mxu0 %vm372_vm2, %v3306_v13 }
0x1d98   :  { %5860 = vmatprep.mubr.msk.f32.mxu0 %vm6529_vm1, %v6528_v8 }
0x1d9a   :  { %v3458_v22 = vpop.f32.mrb[34].mxu1 }
0x1d9b   :  { %v5857_v26 = vpop.f32.mrb[35].mxu1  ;;  %v3462_v27 = vsel %vm372_vm2, %v3458_v22, -inf }
0x1d9c   :  { %3463 = vmax.xlane.f32.xlu0 %v3462_v27 }
0x1db2   :  { %3473 = vrot.lane.b32.xlu0 %v7144_v25, %s6540_s19 }
0x1db6   :  { %3791 = vrot.lane.b32.xlu0 %v7142_v24, %s6532_s1 }
0x1dba   :  { %3789 = vrot.lane.b32.xlu0 %v7235_v28, %s6531_s6 }
0x1e29   :  { %v3464_v29 = vpop.xlane.xlu0 %3463 }
0x1e2a   :  { %v3465_v30 = vsub.f32 %v3458_v22, %v3464_v29 }
0x1e2c   :  { %v3466_v32 = vmul.f32 1.442695, %v3465_v30 }
0x1e2d   :  { %v3474_v33 = vpop.permute.xlu0 %3473 }
0x1e2e   :  { %6128 = vpow2.f32 %v3466_v32  ;;  %5859 = vmatpush3.msra.mxu0 %v3474_v33 }
0x1e2f   :  { %5868 = vmatprep.subr.mxu0 %v6528_v8 }
0x1e31   :  { %v3792_v41 = vpop.permute.xlu0 %3791 }
0x1e35   :  { %v3790_v42 = vpop.permute.xlu0 %3789 }
0x1e38   :  { %v6129_v31 = vpop.eup %6128 }
0x1e39   :  { %v3468_v25 = vsel %vm372_vm2, %v6129_v31, 0.0 }
0x1e3a   :  { %3469 = vadd.xlane.f32.xlu1 %v3468_v25 }
0x1e4b   :  { %3625 = vrot.lane.b32.xlu1 %v7142_v24, %s6530_s24 }
0x1e6a   :  { %v3379_v35 = vpop.f32.mrb[38].mxu0 }
0x1e6b   :  { %v3383_v34 = vadd.f32 %v3379_v35, %v3142_v0  ;;  %v5852_v36 = vpop.f32.mrb[39].mxu0 }
0x1ec7   :  { %v3470_v37 = vpop.xlane.xlu1 %3469 }
0x1ec8   :  { %6130 = vrcp.f32 %v3470_v37 }
0x1ecb   :  { %v3626_v40 = vpop.permute.xlu1 %3625 }
0x1ed2   :  { %v6131_v38 = vpop.eup %6130 }
0x1ed3   :  { %v3472_v39 = vmul.f32 %v6131_v38, %v6129_v31  ;;  %v5431_v38 = vld [vmem:[%s7518_s16] ss:$0 sm:$0xff]  ;;  %s5334_s16 = sshll.u32 %s6542_s30, 4  ;;  %s5335_s16 = int_to_ptr.vmem [resolvable:$true] %s5334_s16 }
0x1ed4   :  { %s6472_s6 = scalar_lea.vmem %s5335_s16, 16  ;;  %s6476_s1 = scalar_lea.vmem %s5335_s16, 32 }
0x1ed5   :  { %5861 = vmatmul.mubr.msk.f32.vlgmr.msra.gmra.mrb[40].mxu0 %vm372_vm2, %v3472_v39  ;;  %p6473_p0 = scmp.ne.s32.totalorder %s5335_s16, %s6472_s6  ;;  %p6477_p1 = scmp.lt.s32.totalorder %s5335_s16, %s5335_s16 }
0x1ed6   :  { %5869 = vmatpush3.xpose.msk.msra.mxu0 %vm372_vm2, %v3626_v40  ;;  %5870 = vmatprep.mubr.msk.f32.mxu0 %vm6529_vm1, %v6528_v8  ;;  %p6478_p2 = scmp.lt.s32.totalorder %s6476_s1, %s6472_s6 }
0x1ed7   :  { %5878 = vmatprep.subr.mxu0 %v6528_v8 }
0x1ed8   :  { %p6479_p3 = por %p6478_p2, %p6477_p1 }
0x1ed9   :  { %5871 = vmatmul.mubr.msk.f32.vlgmr.msra.gmra.mrb[42].mxu0 %vm372_vm2, %v7235_v28 }
0x1eda   :  { %5879 = vmatpush3.xpose.msk.msra.mxu0 %vm372_vm2, %v3792_v41  ;;  %5880 = vmatprep.mubr.msk.f32.mxu0 %vm6529_vm1, %v6528_v8  ;;  %p6480_p4 = pnand %p6479_p3, %p6473_p0 }
0x1edb   :  { %5888 = vmatprep.subr.mxu0 %v6528_v8 }
0x1edd   :  { %5881 = vmatmul.mubr.msk.f32.vlgmr.msra.gmra.mrb[44].mxu0 %vm372_vm2, %v3790_v42 }
0x1ede   :  { %5889 = vmatpush3.msra.mxu0 %v7179_v47  ;;  %5890 = vmatprep.mubr.msk.f32.mxu0 %vm6529_vm1, %v6528_v8 }
0x1edf   :  { %5898 = vmatprep.subr.mxu0 %v6528_v8 }
0x1fa8   :  { %v3545_v5 = vpop.f32.mrb[40].mxu0 }
0x1fa9   :  { %v5862_v45 = vpop.f32.mrb[41].mxu0  ;;  %5866 = vmatmul.mubr.msk.f32.vlgmr.msra.gmra.mrb[36].mxu1 %vm372_vm2, %v3545_v5 }
0x1faa   :  { %5875 = vmatprep.mubr.msk.f32.mxu1 %vm6529_vm1, %v6528_v8 }
0x1fac   :  { %v3698_v46 = vpop.f32.mrb[42].mxu0 }
0x1fad   :  { %v5872_v47 = vpop.f32.mrb[43].mxu0  ;;  %v3702_v48 = vsel %vm372_vm2, %v3698_v46, -inf }
0x1fae   :  { %3703 = vmax.xlane.f32.xlu0 %v3702_v48 }
0x1fb0   :  { %v3863_v49 = vpop.f32.mrb[44].mxu0 }
0x1fb1   :  { %v5882_v11 = vpop.f32.mrb[45].mxu0  ;;  %v3867_v50 = vsel %vm372_vm2, %v3863_v49, -inf }
0x1fb2   :  { %3868 = vmax.xlane.f32.xlu1 %v3867_v50 }
0x1fc3   :  { %3713 = vrot.lane.b32.xlu1 %v7142_v24, %s6534_s0 }
0x1fc7   :  { %4102 = vrot.lane.b32.xlu1 %v7142_v24, %s6535_s15 }
0x1fcb   :  { %4100 = vrot.lane.b32.xlu1 %v7235_v28, %s6536_s26 }
0x203b   :  { %v3704_v51 = vpop.xlane.xlu0 %3703 }
0x203c   :  { %v3705_v52 = vsub.f32 %v3698_v46, %v3704_v51 }
0x203e   :  { %v3706_v53 = vmul.f32 1.442695, %v3705_v52 }
0x203f   :  { %v3869_v55 = vpop.xlane.xlu1 %3868 }
0x2040   :  { %6132 = vpow2.f32 %v3706_v53  ;;  %v3870_v56 = vsub.f32 %v3863_v49, %v3869_v55 }
0x2042   :  { %v3871_v57 = vmul.f32 1.442695, %v3870_v56 }
0x2043   :  { %v3714_v58 = vpop.permute.xlu1 %3713 }
0x2044   :  { %6134 = vpow2.f32 %v3871_v57  ;;  %5874 = vmatpush3.msra.mxu1 %v3714_v58 }
0x2045   :  { %5883 = vmatprep.subr.mxu1 %v6528_v8 }
0x2047   :  { %v4103_v15 = vpop.permute.xlu1 %4102 }
0x204a   :  { %v6133_v59 = vpop.eup %6132 }
0x204b   :  { %v3708_v60 = vsel %vm372_vm2, %v6133_v59, 0.0 }
0x204c   :  { %3709 = vadd.xlane.f32.xlu0 %v3708_v60 }
0x204e   :  { %v6135_v61 = vpop.eup %6134 }
0x204f   :  { %v3873_v62 = vsel %vm372_vm2, %v6135_v61, 0.0 }
0x2050   :  { %3874 = vadd.xlane.f32.xlu0 %v3873_v62 }
0x2066   :  { %3878 = vrot.lane.b32.xlu0 %v7142_v24, %s6533_s28 }
0x207c   :  { %v3618_v63 = vpop.f32.mrb[36].mxu1 }
0x207d   :  { %v7279_v0 = vadd.f32 %v3618_v63, %v3383_v34  ;;  %v5867_v1 = vpop.f32.mrb[37].mxu1 }
0x207f   :  { %v4584_v40 = vadd.f32 %v5431_v38, %v7279_v0 }
0x2081   :  { %v4586_v45 = vadd.f32 %v4584_v40, %v7132_v19 }
0x2083   :  { %v4588_v46 = vsel %vm286_vm0, %v4586_v45, 0.0 }
0x20d9   :  { %v3710_v2 = vpop.xlane.xlu0 %3709 }
0x20da   :  { %6136 = vrcp.f32 %v3710_v2 }
0x20dd   :  { %v3875_v43 = vpop.xlane.xlu0 %3874 }
0x20de   :  { %6138 = vrcp.f32 %v3875_v43 }
0x20e1   :  { %v3879_v4 = vpop.permute.xlu0 %3878 }
0x20e4   :  { %v6137_v7 = vpop.eup %6136 }
0x20e5   :  { %v3712_v3 = vmul.f32 %v6137_v7, %v6133_v59 }
0x20e7   :  { %5876 = vmatmul.mubr.msk.f32.vlgmr.msra.gmra.mrb[38].mxu1 %vm372_vm2, %v3712_v3 }
0x20e8   :  { %v6139_v9 = vpop.eup %6138  ;;  %5884 = vmatpush3.msra.mxu1 %v3879_v4  ;;  %5885 = vmatprep.mubr.msk.f32.mxu1 %vm6529_vm1, %v6528_v8 }
0x20e9   :  { %v3877_v10 = vmul.f32 %v6139_v9, %v6135_v61  ;;  %5893 = vmatprep.subr.mxu1 %v6528_v8 }
0x20eb   :  { %5886 = vmatmul.mubr.msk.f32.vlgmr.msra.gmra.mrb[40].mxu1 %vm372_vm2, %v3877_v10 }
0x20ec   :  { %5894 = vmatpush3.msra.mxu1 %v7190_v54  ;;  %5895 = vmatprep.mubr.msk.f32.mxu1 %vm6529_vm1, %v6528_v8  ;;  %v4101_v54 = vpop.permute.xlu1 %4100 }
0x20ed   :  { %5903 = vmatprep.subr.mxu1 %v6528_v8 }
0x21ba   :  { %v3785_v12 = vpop.f32.mrb[38].mxu1 }
0x21bb   :  { %v5877_v14 = vpop.f32.mrb[39].mxu1  ;;  %5896 = vmatmul.mubr.msk.f32.vlgmr.msra.gmra.mrb[42].mxu1 %vm372_vm2, %v3785_v12 }
0x21bc   :  { %5905 = vmatprep.mubr.msk.f32.mxu1 %vm6529_vm1, %v6528_v8 }
0x21be   :  { %v3950_v16 = vpop.f32.mrb[40].mxu1 }
0x21bf   :  { %v5887_v6 = vpop.f32.mrb[41].mxu1  ;;  %5891 = vmatmul.mubr.msk.f32.vlgmr.msra.gmra.mrb[46].mxu0 %vm372_vm2, %v3950_v16 }
0x21c0   :  { %5899 = vmatpush3.xpose.msk.msra.mxu0 %vm372_vm2, %v4103_v15  ;;  %5900 = vmatprep.mubr.msk.f32.mxu0 %vm6529_vm1, %v6528_v8 }
0x21c1   :  { %5908 = vmatprep.subr.mxu0 %v6528_v8 }
0x21c3   :  { %5901 = vmatmul.mubr.msk.f32.vlgmr.msra.gmra.mrb[48].mxu0 %vm372_vm2, %v4101_v54 }
0x21c4   :  { %5909 = vmatpush3.msra.mxu0 %v7222_v20  ;;  %5910 = vmatprep.mubr.msk.f32.mxu0 %vm6529_vm1, %v6528_v8 }
0x21c5   :  { %5918 = vmatprep.subr.mxu0 %v6528_v8 }
0x228e   :  { %v4096_v17 = vpop.f32.mrb[42].mxu1 }
0x228f   :  { %v5897_v18 = vpop.f32.mrb[43].mxu1 }
0x2290   :  { %v5433_v18 = vld [vmem:[%s7520_s18] ss:$0 sm:$0xff] }
0x2292   :  { %v4023_v13 = vpop.f32.mrb[46].mxu0 }
0x2293   :  { %v4097_v23 = vadd.f32 %v4096_v17, %v4023_v13  ;;  %v5892_v22 = vpop.f32.mrb[47].mxu0 }
0x2294   :  { %v4630_v22 = vld [vmem:[#allocation22] sm:$0xff] }
0x2296   :  { %v4174_v26 = vpop.f32.mrb[48].mxu0 }
0x2297   :  { %v5902_v27 = vpop.f32.mrb[49].mxu0  ;;  %v4178_v29 = vsel %vm372_vm2, %v4174_v26, -inf }
0x2298   :  { %4179 = vmax.xlane.f32.xlu0 %v4178_v29  ;;  %v4632_v29 = vld [vmem:[#allocation22 + $0x10] sm:$0xff] }
0x22ae   :  { %4189 = vrot.lane.b32.xlu0 %v7142_v24, %s6539_s10 }
0x22b2   :  { %4339 = vrot.lane.b32.xlu0 %v7235_v28, %s6538_s27 }
0x2325   :  { %v4180_v20 = vpop.xlane.xlu0 %4179 }
0x2326   :  { %v4181_v30 = vsub.f32 %v4174_v26, %v4180_v20  ;;  %v4631_v26 = vld [vmem:[#allocation22 + $0x8] sm:$0xff]  ;;  %v4633_v20 = vld [vmem:[#allocation22 + $0x18] sm:$0xff] }
0x2327   :  { %v5991_v27 = vpack.c.bf16 %v4631_v26, %v4630_v22 }
0x2328   :  { %v4182_v32 = vmul.f32 1.442695, %v4181_v30  ;;  %v5995_v30 = vpack.c.bf16 %v4633_v20, %v4632_v29 }
0x2329   :  { %v4190_v33 = vpop.permute.xlu0 %4189 }
0x232a   :  { %6140 = vpow2.f32 %v4182_v32  ;;  %5904 = vmatpush3.msra.mxu1 %v4190_v33 }
0x232b   :  { %5913 = vmatprep.subr.mxu1 %v6528_v8 }
0x232d   :  { %v4340_v37 = vpop.permute.xlu0 %4339 }
0x2334   :  { %v6141_v31 = vpop.eup %6140 }
0x2335   :  { %v4184_v25 = vsel %vm372_vm2, %v6141_v31, 0.0 }
0x2336   :  { %4185 = vadd.xlane.f32.xlu1 %v4184_v25 }
0x2347   :  { %4341 = vrot.lane.b32.xlu1 %v7142_v24, %s6537_s3 }
0x23c3   :  { %v4186_v35 = vpop.xlane.xlu1 %4185 }
0x23c4   :  { %6142 = vrcp.f32 %v4186_v35 }
0x23c7   :  { %v4342_v28 = vpop.permute.xlu1 %4341 }
0x23ce   :  { %v6143_v34 = vpop.eup %6142 }
0x23cf   :  { %v4188_v36 = vmul.f32 %v6143_v34, %v6141_v31 }
0x23d1   :  { %5906 = vmatmul.mubr.msk.f32.vlgmr.msra.gmra.mrb[44].mxu1 %vm372_vm2, %v4188_v36 }
0x23d2   :  { %5914 = vmatpush3.xpose.msk.msra.mxu1 %vm372_vm2, %v4342_v28  ;;  %5915 = vmatprep.mubr.msk.f32.mxu1 %vm6529_vm1, %v6528_v8 }
0x23d3   :  { %5923 = vmatprep.subr.mxu1 %v6528_v8 }
0x23d5   :  { %5916 = vmatmul.mubr.msk.f32.vlgmr.msra.gmra.mrb[46].mxu1 %vm372_vm2, %v4340_v37 }
0x23d6   :  { %5924 = vmatpush3.msra.mxu1 %v7259_v44  ;;  %5925 = vmatprep.mubr.msk.f32.mxu1 %vm6529_vm1, %v6528_v8 }
0x24a4   :  { %v4261_v39 = vpop.f32.mrb[44].mxu1 }
0x24a5   :  { %v5907_v41 = vpop.f32.mrb[45].mxu1  ;;  %5911 = vmatmul.mubr.msk.f32.vlgmr.msra.gmra.mrb[50].mxu0 %vm372_vm2, %v4261_v39 }
0x24a6   :  { %5920 = vmatprep.mubr.msk.f32.mxu0 %vm6529_vm1, %v6528_v8  ;;  %vm5028_vm1 = vcmask 1043456  }
0x24a8   :  { %v4413_v42 = vpop.f32.mrb[46].mxu1 }
0x24a9   :  { %v5917_v5 = vpop.f32.mrb[47].mxu1  ;;  %v4417_v44 = vsel %vm372_vm2, %v4413_v42, -inf }
0x24aa   :  { %4418 = vmax.xlane.f32.xlu1 %v4417_v44 }
0x24ae   :  { %4589 = vadd.xlane.f32.xlu1 %v4588_v46 }
0x2537   :  { %v4419_v47 = vpop.xlane.xlu1 %4418 }
0x2538   :  { %v4420_v48 = vsub.f32 %v4413_v42, %v4419_v47 }
0x253a   :  { %v4421_v49 = vmul.f32 1.442695, %v4420_v48 }
0x253b   :  { %v4590_v60 = vpop.xlane.xlu1 %4589 }
0x253c   :  { %6144 = vpow2.f32 %v4421_v49  ;;  %v4594_v61 = vmul.f32 0.03125, %v4590_v60 }
0x253e   :  { %v4596_v0 = vsub.f32 %v4586_v45, %v4594_v61 }
0x2540   :  { %v4598_v7 = vmul.f32 %v4596_v0, %v4596_v0 }
0x2542   :  { %v4600_v3 = vsel %vm286_vm0, %v4598_v7, 0.0 }
0x2546   :  { %v6145_v11 = vpop.eup %6144 }
0x2547   :  { %v4423_v50 = vsel %vm372_vm2, %v6145_v11, 0.0 }
0x2548   :  { %4424 = vadd.xlane.f32.xlu0 %v4423_v50 }
0x255e   :  { %4428 = vrot.lane.b32.xlu0 %v7142_v24, %s6540_s19 }
0x2578   :  { %v4334_v51 = vpop.f32.mrb[50].mxu0 }
0x2579   :  { %v4338_v52 = vadd.f32 %v4334_v51, %v4097_v23  ;;  %v5912_v53 = vpop.f32.mrb[51].mxu0 }
0x25d5   :  { %v4425_v55 = vpop.xlane.xlu0 %4424 }
0x25d6   :  { %6146 = vrcp.f32 %v4425_v55 }
0x25d9   :  { %v4429_v19 = vpop.permute.xlu0 %4428 }
0x25da   :  { %5919 = vmatpush3.msra.mxu0 %v4429_v19 }
0x25db   :  { %5992 = vmatprep.subr.bf16.mxu0 %v5991_v27 }
0x25e0   :  { %v6147_v56 = vpop.eup %6146 }
0x25e1   :  { %v4427_v57 = vmul.f32 %v6147_v56, %v6145_v11 }
0x25e3   :  { %5921 = vmatmul.mubr.msk.f32.vlgmr.msra.gmra.mrb[52].mxu0 %vm372_vm2, %v4427_v57  ;;  %v4780_v57 = vlaneseq }
0x25e4   :  { %5994 = vmatpush3.bf16.msra.mxu0 %v5991_v27 }
0x25e5   :  { %5996 = vmatprep.subr.bf16.mxu0 %v5995_v30 }
0x25e8   :  { %5998 = vmatpush3.bf16.msra.mxu0 %v5995_v30 }
0x26b6   :  { %v4500_v58 = vpop.f32.mrb[52].mxu0 }
0x26b7   :  { %v5922_v59 = vpop.f32.mrb[53].mxu0  ;;  %5926 = vmatmul.mubr.msk.f32.vlgmr.msra.gmra.mrb[48].mxu1 %vm372_vm2, %v4500_v58  ;;  %v4781_v58 = vand.u32 127, %v4780_v57 }
0x26b9   :  { %v7367_v59 = vcvt.s32.f32 %v4781_v58  ;;  %v5008_v26 = vadd.s32 128, %v4781_v58 }
0x278a   :  { %v4573_v62 = vpop.f32.mrb[48].mxu1 }
0x278b   :  { %v4577_v63 = vadd.f32 %v4573_v62, %v4338_v52  ;;  %v5927_v24 = vpop.f32.mrb[49].mxu1 }
0x278d   :  { %v4585_v1 = vadd.f32 %v5431_v38, %v4577_v63 }
0x278f   :  { %v4587_v2 = vadd.f32 %v4585_v1, %v7136_v21  ;;  %v5432_v21 = vld [vmem:[%s7519_s17] ss:$0 sm:$0xff]  ;;  %v7375_v1 = vshrl.u32 %v4780_v57, 7 }
0x2791   :  { %v4591_v43 = vsel %vm286_vm0, %v4587_v2, 0.0  ;;  %vm4808_vm7 = vcmp.ge.s32.totalorder %v7375_v1, %v4781_v58  ;;  %v4807_v7 = vadd.s32 8, %v7375_v1  ;;  %v5009_v27 = vmul.u32 64, %v7375_v1 }
0x2792   :  { %4592 = vadd.xlane.f32.xlu1 %v4591_v43  ;;  %v5012_v29 = vadd.s32 1, %v7375_v1 }
0x2793   :  { %vm4809_vm11 = vcmp.ge.s32.totalorder %v4807_v7, %v4781_v58  ;;  %vm5011_vm13 = vcmp.ge.s32.totalorder %v5008_v26, %v5009_v27  ;;  %vm5010_vm14 = vcmp.ge.s32.totalorder %v4781_v58, %v5009_v27  ;;  %v4672_v27 = vld [vmem:[#allocation23 + $0xe8] sm:$0xff] }
0x2794   :  { %v5013_v20 = vmul.u32 64, %v5012_v29 }
0x2796   :  { %4601 = vadd.xlane.f32.xlu1 %v4600_v3  ;;  %v4635_v3 = vld [vmem:[%s7524_s22 + $0x8] sm:$0xff]  ;;  %vm5015_vm15 = vcmp.lt.s32.totalorder %v5008_v26, %v5013_v20  ;;  %vm5014_vm2 = vcmp.lt.s32.totalorder %v4781_v58, %v5013_v20  ;;  %v4671_v26 = vld [vmem:[#allocation23 + $0xe0] sm:$0xff] }
0x2797   :  { %vm5017_vm3 = vmand %vm5011_vm13, %vm5015_vm15  ;;  %v4645_v58 = vld [vmem:[#allocation23 + $0x10] sm:$0xff]  ;;  %v6035_v20 = vpack.c.bf16 %v4672_v27, %v4671_v26 }
0x2798   :  { %v5451_v30 = vsel %vm5017_vm3, 1.0, %v6528_v8 }
0x2799   :  { %5452 = vmatprep.subr.msk.mxu0 %vm5028_vm1, %v5451_v30  ;;  %v4655_v30 = vld [vmem:[#allocation23 + $0x60] sm:$0xff] }
0x281f   :  { %v4593_v4 = vpop.xlane.xlu1 %4592 }
0x2820   :  { %v4595_v9 = vmul.f32 0.03125, %v4593_v4  ;;  %v4637_v4 = vld [vmem:[%s7524_s22 + $0x18] sm:$0xff] }
0x2822   :  { %v4597_v10 = vsub.f32 %v4587_v2, %v4595_v9  ;;  %v5438_v2 = vsel %vm4808_vm7, 1.0, %v6528_v8 }
0x2823   :  { %v4602_v12 = vpop.xlane.xlu1 %4601  ;;  %5943 = vmatprep.mubr.msk.f32.mxu1 %vm4814_vm8, %v5438_v2  ;;  %v4665_v2 = vld [vmem:[#allocation23 + $0xb0] sm:$0xff] }
0x2824   :  { %v4606_v14 = vmul.f32 0.03125, %v4602_v12  ;;  %v4599_v15 = vmul.f32 %v4597_v10, %v4597_v10  ;;  %v4634_v12 = vld [vmem:[%s7524_s22] sm:$0xff] }
0x2826   :  { %v4608_v16 = vadd.f32 1e-05, %v4606_v14  ;;  %v4603_v6 = vsel %vm286_vm0, %v4599_v15, 0.0  ;;  %v4636_v14 = vld [vmem:[%s7524_s22 + $0x10] sm:$0xff]  ;;  %v4639_v15 = vld [vmem:[%s7524_s22 + $0x28] sm:$0xff] }
0x2827   :  { %4604 = vadd.xlane.f32.xlu1 %v4603_v6  ;;  %v6541_v6 = vmov 1.0|1.0  }
0x2828   :  { %6148 = vrsqrt.f32 %v4608_v16  ;;  %v4641_v16 = vld [vmem:[%s7524_s22 + $0x38] sm:$0xff] }
0x2832   :  { %v6149_v54 = vpop.eup %6148 }
0x2833   :  { %v4612_v17 = vmul.f32 %v6149_v54, %v4596_v0  ;;  %v5439_v54 = vsel %vm4809_vm11, 1.0, %v6528_v8 }
0x2835   :  { %v4620_v13 = vmul.f32 %v5432_v21, %v4612_v17  ;;  %v6007_v17 = vpack.c.bf16 %v4641_v16, %v4639_v15  ;;  %v4651_v16 = vld [vmem:[#allocation23 + $0x40] sm:$0xff] }
0x2837   :  { %v7346_v23 = vadd.f32 %v5433_v18, %v4620_v13  ;;  %v4640_v13 = vld [vmem:[%s7524_s22 + $0x30] sm:$0xff] }
0x2839   :  { %5936 = vmatprep.mubr.msk.f32.mxu0 %vm286_vm0, %v7346_v23 }
0x28b4   :  { %v4605_v32 = vpop.xlane.xlu1 %4604 }
0x28b5   :  { %v4607_v33 = vmul.f32 0.03125, %v4605_v32 }
0x28b7   :  { %v4609_v31 = vadd.f32 1e-05, %v4607_v33 }
0x28b9   :  { %6150 = vrsqrt.f32 %v4609_v31 }
0x28c3   :  { %v6151_v25 = vpop.eup %6150 }
0x28c4   :  { %v4613_v35 = vmul.f32 %v6151_v25, %v4597_v10  ;;  %v6003_v10 = vpack.c.bf16 %v4637_v4, %v4635_v3  ;;  %v4649_v4 = vld [vmem:[#allocation23 + $0x30] sm:$0xff] }
0x28c6   :  { %v4621_v34 = vmul.f32 %v5432_v21, %v4613_v35  ;;  %v6005_v21 = vpack.c.bf16 %v4636_v14, %v4634_v12  ;;  %v4668_v12 = vld [vmem:[#allocation23 + $0xc8] sm:$0xff] }
0x28c8   :  { %v7350_v36 = vadd.f32 %v5433_v18, %v4621_v34  ;;  %v4638_v18 = vld [vmem:[%s7524_s22 + $0x20] sm:$0xff] }
0x28c9   :  { %v6009_v22 = vpack.c.bf16 %v4640_v13, %v4638_v18  ;;  %v4653_v13 = vld [vmem:[#allocation23 + $0x50] sm:$0xff] }
0x28ca   :  { %5937 = vmatmul.mubr.msk.f32.vlgmr.msra.gmra.mrb[54].mxu0 %vm286_vm0, %v7350_v36 }
0x28cb   :  { %5099 = vmatprep.mubr.f32.mxu0 %v6528_v8 }
0x299d   :  { %v5938_v28 = vpop.f32.mrb[54].mxu0 }
0x299e   :  { %v4748_v37 = vpop.f32.mrb[55].mxu0  ;;  %v4761_v39 = vsel %vm4757_vm4, %v5938_v28, -inf }
0x299f   :  { %v4758_v38 = vsel %vm4757_vm4, %v4748_v37, -inf }
0x29a0   :  { %4759 = vmax.xlane.f32.xlu1 %v4758_v38 }
0x29a4   :  { %4762 = vmax.xlane.f32.xlu1 %v4761_v39 }
0x2a2d   :  { %v4760_v40 = vpop.xlane.xlu1 %4759 }
0x2a2e   :  { %v4764_v41 = vsub.f32 %v4748_v37, %v4760_v40 }
0x2a30   :  { %v4766_v42 = vmul.f32 1.442695, %v4764_v41 }
0x2a31   :  { %v4763_v5 = vpop.xlane.xlu1 %4762 }
0x2a32   :  { %6152 = vpow2.f32 %v4766_v42  ;;  %v4765_v44 = vsub.f32 %v5938_v28, %v4763_v5 }
0x2a34   :  { %v4768_v45 = vmul.f32 1.442695, %v4765_v44 }
0x2a36   :  { %6154 = vpow2.f32 %v4768_v45 }
0x2a3c   :  { %v6153_v46 = vpop.eup %6152 }
0x2a3d   :  { %v4770_v47 = vsel %vm4757_vm4, %v6153_v46, 0.0 }
0x2a3e   :  { %4771 = vadd.xlane.f32.xlu0 %v4770_v47 }
0x2a40   :  { %v6155_v48 = vpop.eup %6154 }
0x2a41   :  { %v4773_v49 = vsel %vm4757_vm4, %v6155_v48, 0.0 }
0x2a42   :  { %4774 = vadd.xlane.f32.xlu1 %v4773_v49  ;;  %v7454_v49 = vld [vmem:[%s7527_s25] sm:$0xf] }
0x2acb   :  { %v4772_v11 = vpop.xlane.xlu0 %4771 }
0x2acc   :  { %6156 = vrcp.f32 %v4772_v11  ;;  %v4659_v11 = vld [vmem:[#allocation23 + $0x80] sm:$0xff] }
0x2acf   :  { %v4775_v50 = vpop.xlane.xlu1 %4774 }
0x2ad0   :  { %6158 = vrcp.f32 %v4775_v50  ;;  %v4660_v50 = vld [vmem:[#allocation23 + $0x88] sm:$0xff] }
0x2ad6   :  { %v6157_v51 = vpop.eup %6156 }
0x2ad7   :  { %v7359_v52 = vmul.f32 %v6157_v51, %v6153_v46  ;;  %v4643_v51 = vld [vmem:[#allocation23] sm:$0xff] }
0x2ad9   :  { %v4783_v53 = vsel %vm4757_vm4, %v7359_v52, -inf }
0x2ada   :  { %v6159_v55 = vpop.eup %6158  ;;  %4784 = vmax.xlane.f32.xlu1 %v4783_v53  ;;  %v4644_v53 = vld [vmem:[#allocation23 + $0x8] sm:$0xff] }
0x2adb   :  { %v7363_v19 = vmul.f32 %v6159_v55, %v6155_v48  ;;  %v4661_v55 = vld [vmem:[#allocation23 + $0x90] sm:$0xff] }
0x2add   :  { %v4786_v56 = vsel %vm4757_vm4, %v7363_v19, -inf }
0x2ade   :  { %4787 = vmax.xlane.f32.xlu1 %v4786_v56  ;;  %v6013_v56 = vpack.c.bf16 %v4644_v53, %v4643_v51 }
0x2b67   :  { %v4785_v60 = vpop.xlane.xlu1 %4784 }
0x2b68   :  { %vm4789_vm5 = vcmp.eq.f32.partialorder %v7359_v52, %v4785_v60  ;;  %v4663_v60 = vld [vmem:[#allocation23 + $0xa0] sm:$0xff] }
0x2b69   :  { %v4791_v61 = vsel %vm4789_vm5, %v7367_v59, 4.0  ;;  %vm5016_vm5 = vmand %vm5010_vm14, %vm5014_vm2 }
0x2b6a   :  { %v4793_v62 = vsel %vm4757_vm4, %v4791_v61, inf  ;;  %v5450_v32 = vsel %vm5016_vm5, 1.0, %v6528_v8  ;;  %v4664_v61 = vld [vmem:[#allocation23 + $0xa8] sm:$0xff] }
0x2b6b   :  { %4794 = vmin.xlane.f32.xlu1 %v4793_v62  ;;  %v4788_v63 = vpop.xlane.xlu1 %4787  ;;  %5453 = vmatpush1.msk.msra.mxu0 %vm5028_vm1, %v5450_v32  ;;  %v4656_v32 = vld [vmem:[#allocation23 + $0x68] sm:$0xff] }
0x2b6c   :  { %vm4790_vm6 = vcmp.eq.f32.partialorder %v7363_v19, %v4788_v63  ;;  %5946 = vmatprep.subr.msk.mxu0 %vm5028_vm1, %v7454_v49  ;;  %v6019_v63 = vpack.c.bf16 %v4664_v61, %v4663_v60 }
0x2b6d   :  { %v4792_v24 = vsel %vm4790_vm6, %v7367_v59, 4.0 }
0x2b6e   :  { %v4796_v0 = vsel %vm4757_vm4, %v4792_v24, inf  ;;  %v4647_v24 = vld [vmem:[#allocation23 + $0x20] sm:$0xff] }
0x2b6f   :  { %4797 = vmin.xlane.f32.xlu1 %v4796_v0  ;;  %v4648_v0 = vld [vmem:[#allocation23 + $0x28] sm:$0xff] }
0x2b70   :  { %v6021_v7 = vpack.c.bf16 %v4648_v0, %v4647_v24 }
0x2bf8   :  { %v4795_v43 = vpop.xlane.xlu1 %4794 }
0x2bf9   :  { %vm4799_vm9 = vcmp.eq.f32.partialorder %v7367_v59, %v4795_v43  ;;  %v4666_v43 = vld [vmem:[#allocation23 + $0xb8] sm:$0xff] }
0x2bfa   :  { %v5436_v37 = vsel %vm4799_vm9, 1.0, %v6528_v8  ;;  %v6023_v3 = vpack.c.bf16 %v4666_v43, %v4665_v2 }
0x2bfc   :  { %v4798_v9 = vpop.xlane.xlu1 %4797 }
0x2bfd   :  { %vm4800_vm10 = vcmp.eq.f32.partialorder %v7367_v59, %v4798_v9  ;;  %v4646_v59 = vld [vmem:[#allocation23 + $0x18] sm:$0xff] }
0x2bfe   :  { %vm5999_vm12 = vmpackc.low %vm4800_vm10, %vm4799_vm9  ;;  %v5437_v34 = vsel %vm4800_vm10, 1.0, %v6528_v8  ;;  %v6017_v62 = vpack.c.bf16 %v4646_v59, %v4645_v58  ;;  %v4650_v9 = vld [vmem:[#allocation23 + $0x38] sm:$0xff] }
0x2bff   :  { %6000 = vmatprep.subr.msk.bf16.mxu1 %vm5999_vm12, %v6541_v6  ;;  %v6025_v14 = vpack.c.bf16 %v4650_v9, %v4649_v4 }
0x2c00   :  { %6002 = vmatpush3.bf16.msk.msra.mxu1 %vm5999_vm12, %v6541_v6  ;;  %v4652_v6 = vld [vmem:[#allocation23 + $0x48] sm:$0xff] }
0x2c01   :  { %6004 = vmatprep.subr.bf16.mxu1 %v6003_v10  ;;  %v4667_v10 = vld [vmem:[#allocation23 + $0xc0] sm:$0xff] }
0x2c02   :  { %v6027_v15 = vpack.c.bf16 %v4668_v12, %v4667_v10 }
0x2c03   :  { %5944 = vmatmul.mubr.msk.f32.vlgmr.msra.gmra.mrb[50].mxu1 %vm4814_vm8, %v5439_v54  ;;  %v4669_v54 = vld [vmem:[#allocation23 + $0xd0] sm:$0xff] }
0x2c04   :  { %6006 = vmatpush1.bf16.msra.mxu1 %v6005_v21  ;;  %4991 = vmatprep.mubr.f32.mxu1 %v6528_v8  ;;  %v4670_v21 = vld [vmem:[#allocation23 + $0xd8] sm:$0xff] }
0x2c05   :  { %6008 = vmatprep.subr.bf16.mxu1 %v6007_v17  ;;  %v6029_v17 = vpack.c.bf16 %v4652_v6, %v4651_v16  ;;  %v6031_v18 = vpack.c.bf16 %v4670_v21, %v4669_v54 }
0x2c08   :  { %6010 = vmatpush1.bf16.msra.mxu1 %v6009_v22  ;;  %v4654_v22 = vld [vmem:[#allocation23 + $0x58] sm:$0xff] }
0x2c09   :  { %v6033_v29 = vpack.c.bf16 %v4654_v22, %v4653_v13 }
0x2c0b   :  { %5448 = vmatmul.mubr.msk.f32.vlgmr.msra.gmra.mrb[52].mxu1 %vm286_vm0, %v7346_v23 }
0x2c0c   :  { %4997 = vmatprep.mubr.f32.mxu1 %v6528_v8 }
0x2c0f   :  { %5449 = vmatmul.mubr.msk.f32.gmra.mrb[54].mxu1 %vm286_vm0, %v7350_v36 }
0x2cd6   :  { %v5945_v33 = vpop.f32.mrb[50].mxu1 }
0x2cd7   :  { %v5445_v31 = vadd.f32 -1.0, %v5945_v33  ;;  %v4887_v25 = vpop.f32.mrb[51].mxu1  ;;  %v6037_v33 = vpack.c.bf16 %v4656_v32, %v4655_v30  ;;  %v5459_v32 = vld [vmem:[%s7562_s12] ss:$0 sm:$0xff] }
0x2cd8   :  { %v5444_v35 = vadd.f32 -1.0, %v4887_v25 }
0x2cd9   :  { %vm4899_vm6 = vcmp.lt.f32.partialorder %v5445_v31, 4.0 }
0x2cda   :  { %v5447_v28 = vsel %vm4899_vm6, 1.0, %v6528_v8  ;;  %vm4898_vm7 = vcmp.lt.f32.partialorder %v5444_v35, 4.0 }
0x2cdb   :  { %v7432_v38 = vmul.f32 %v5447_v28, %v5437_v34  ;;  %v5446_v39 = vsel %vm4898_vm7, 1.0, %v6528_v8  ;;  %v4673_v28 = vld [vmem:[#allocation23 + $0xf0] sm:$0xff] }
0x2cdc   :  { %v7435_v40 = vmul.f32 %v5446_v39, %v5436_v37  ;;  %v4674_v37 = vld [vmem:[#allocation23 + $0xf8] sm:$0xff] }
0x2cdd   :  { %v4907_v45 = vmul.f32 %v7432_v38, %v7363_v19  ;;  %v4662_v19 = vld [vmem:[#allocation23 + $0x98] sm:$0xff]  ;;  %v6039_v39 = vpack.c.bf16 %v4674_v37, %v4673_v28 }
0x2cde   :  { %v7437_v41 = vpop.f32.mrb[52].mxu1  ;;  %v4906_v42 = vmul.f32 %v7435_v40, %v7359_v52  ;;  %v6011_v52 = vpack.c.bf16 %v4660_v50, %v4659_v11  ;;  %v6015_v57 = vpack.c.bf16 %v4662_v19, %v4661_v55 }
0x2cdf   :  { %v7441_v5 = vpop.f32.mrb[53].mxu1  ;;  %v4911_v48 = vsel %vm4757_vm4, %v4907_v45, 0.0  ;;  %v4923_v45 = vsub.s32 1, %v7375_v1 }
0x2ce0   :  { %v4908_v44 = vsel %vm4757_vm4, %v4906_v42, 0.0  ;;  %6012 = vmatprep.subr.bf16.mxu1 %v6011_v52  ;;  %v4658_v42 = vld [vmem:[#allocation23 + $0x78] sm:$0xff] }
0x2ce1   :  { %4909 = vadd.xlane.f32.xlu1 %v4908_v44  ;;  %6014 = vmatpush3.bf16.msra.mxu1 %v6013_v56 }
0x2ce2   :  { %v7446_v46 = vpop.f32.mrb[54].mxu1  ;;  %6016 = vmatprep.subr.bf16.mxu1 %v6015_v57 }
0x2ce3   :  { %v7448_v47 = vpop.f32.mrb[55].mxu1 }
0x2ce5   :  { %4912 = vadd.xlane.f32.xlu1 %v4911_v48  ;;  %6018 = vmatpush3.bf16.msra.mxu1 %v6017_v62 }
0x2ce6   :  { %6020 = vmatprep.subr.bf16.mxu1 %v6019_v63 }
0x2ce9   :  { %6022 = vmatpush3.bf16.msra.mxu1 %v6021_v7 }
0x2cea   :  { %6024 = vmatprep.subr.bf16.mxu1 %v6023_v3 }
0x2ced   :  { %6026 = vmatpush3.bf16.msra.mxu1 %v6025_v14 }
0x2cee   :  { %6028 = vmatprep.subr.bf16.mxu1 %v6027_v15 }
0x2cf1   :  { %6030 = vmatpush3.bf16.msra.mxu1 %v6029_v17 }
0x2cf2   :  { %6032 = vmatprep.subr.bf16.mxu1 %v6031_v18 }
0x2cf5   :  { %6034 = vmatpush3.bf16.msra.mxu1 %v6033_v29 }
0x2cf6   :  { %6036 = vmatprep.subr.bf16.mxu1 %v6035_v20 }
0x2cf9   :  { %6038 = vmatpush3.bf16.msra.mxu1 %v6037_v33 }
0x2cfa   :  { %6040 = vmatprep.subr.bf16.mxu1 %v6039_v39 }
0x2d6e   :  { %v4910_v31 = vpop.xlane.xlu1 %4909 }
0x2d6f   :  { %v4914_v25 = vmul.f32 %v4910_v31, %v7435_v40  ;;  %v4657_v40 = vld [vmem:[#allocation23 + $0x70] sm:$0xff] }
0x2d70   :  { %v6041_v44 = vpack.c.bf16 %v4658_v42, %v4657_v40 }
0x2d71   :  { %5454 = vmatmul.mubr.msk.f32.vlgmr.msra.gmra.mrb[56].mxu0 %vm4757_vm4, %v4914_v25 }
0x2d72   :  { %v4913_v35 = vpop.xlane.xlu1 %4912  ;;  %5105 = vmatprep.mubr.f32.mxu0 %v6528_v8  ;;  %5947 = vmatpush3.msk.msra.mxu0 %vm5028_vm1, %v7454_v49  ;;  %v4919_v8 = vsub.s32 0, %v7375_v1 }
0x2d73   :  { %v4915_v34 = vmul.f32 %v4913_v35, %v7432_v38  ;;  %6042 = vmatpush3.bf16.msra.mxu1 %v6041_v44  ;;  %v4642_v38 = vld [vmem:[%s7525_s23] sm:$0x3] }
0x2d74   :  { %v4920_v48 = vrot.slane %v4642_v38, %v4919_v8  ;;  %v4924_v49 = vrot.slane %v4642_v38, %v4923_v45  ;;  %v5460_v35 = vld [vmem:[%s7563_s21] ss:$0 sm:$0xff] }
0x2d75   :  { %5455 = vmatmul.mubr.msk.f32.gmra.mrb[58].mxu0 %vm4757_vm4, %v4915_v34 }
0x2d76   :  { %5948 = vmatprep.mubr.msk.f32.mxu0 %vm4757_vm4, %v4914_v25  ;;  %v4994_v11 = vadd.f32 %v7437_v41, %v4920_v48  ;;  %v4996_v50 = vadd.f32 %v7441_v5, %v4924_v49  ;;  %v5000_v52 = vadd.f32 %v7446_v46, %v4920_v48  ;;  %v5002_v55 = vadd.f32 %v7448_v47, %v4924_v49 }
0x2d78   :  { %v5004_v51 = vmax.f32 %v4994_v11, 0.0  ;;  %v5005_v53 = vmax.f32 %v4996_v50, 0.0  ;;  %v5006_v59 = vmax.f32 %v5000_v52, 0.0  ;;  %v5007_v60 = vmax.f32 %v5002_v55, 0.0 }
0x2d79   :  { %5949 = vmatmul.mubr.msk.f32.vlgmr.msra.gmra.mrb[60].mxu0 %vm4757_vm4, %v4915_v34  ;;  %vm5326_vm4 = vcmask 0  }
0x2e44   :  { %v5101_v19 = vpop.f32.mrb[56].mxu0 }
0x2e45   :  { %v5112_v56 = vmul.f32 %v5101_v19, %v5004_v51  ;;  %v5103_v57 = vpop.f32.mrb[57].mxu0 }
0x2e46   :  { %v5113_v58 = vmul.f32 %v5103_v57, %v5005_v53 }
0x2e48   :  { %v5107_v61 = vpop.f32.mrb[58].mxu0  ;;  %5258 = vmatprep.mubr.f32.mxu1 %v5113_v58 }
0x2e49   :  { %v5114_v1 = vmul.f32 %v5107_v61, %v5006_v59  ;;  %v5109_v62 = vpop.f32.mrb[59].mxu0  ;;  %5259 = vmatmul.mubr.f32.vlgmr.msra.gmra.mrb[56].mxu1 %v5112_v56 }
0x2e4a   :  { %v5115_v41 = vmul.f32 %v5109_v62, %v5007_v60 }
0x2e4c   :  { %v5950_v63 = vpop.f32.mrb[60].mxu0  ;;  %5263 = vmatprep.mubr.f32.mxu1 %v5115_v41 }
0x2e4d   :  { %v5185_v5 = vpop.f32.mrb[61].mxu0  ;;  %5264 = vmatmul.mubr.f32.gmra.mrb[58].mxu1 %v5114_v1 }
0x2f1c   :  { %v5630_v46 = vpop.f32.mrb[56].mxu1 }
0x2f1d   :  { %v5631_v24 = vpop.f32.mrb[57].mxu1 }
0x2f1e   :  { %v5632_v0 = vadd.f32 %v5631_v24, %v5630_v46 }
0x2f20   :  { %v5261_v47 = vadd.f32 %v5632_v0, %v5185_v5  ;;  %v5633_v2 = vpop.f32.mrb[58].mxu1 }
0x2f21   :  { %v5634_v43 = vpop.f32.mrb[59].mxu1 }
0x2f22   :  { %v5635_v7 = vadd.f32 %v5634_v43, %v5633_v2  ;;  %v5269_v3 = vadd.f32 %v5261_v47, %v7346_v23 }
0x2f24   :  { %v5266_v4 = vadd.f32 %v5950_v63, %v5635_v7  ;;  %v5271_v9 = vsel %vm286_vm0, %v5269_v3, 0.0 }
0x2f25   :  { %5272 = vadd.xlane.f32.xlu0 %v5271_v9 }
0x2f26   :  { %v5270_v10 = vadd.f32 %v5266_v4, %v7350_v36 }
0x2f28   :  { %v5274_v12 = vsel %vm286_vm0, %v5270_v10, 0.0 }
0x2f29   :  { %5275 = vadd.xlane.f32.xlu1 %v5274_v12 }
0x2fb2   :  { %v5273_v14 = vpop.xlane.xlu0 %5272 }
0x2fb3   :  { %v5277_v15 = vmul.f32 0.03125, %v5273_v14 }
0x2fb5   :  { %v5279_v16 = vsub.f32 %v5269_v3, %v5277_v15 }
0x2fb6   :  { %v5276_v6 = vpop.xlane.xlu1 %5275 }
0x2fb7   :  { %v5278_v54 = vmul.f32 0.03125, %v5276_v6  ;;  %v5281_v21 = vmul.f32 %v5279_v16, %v5279_v16 }
0x2fb9   :  { %v5280_v17 = vsub.f32 %v5270_v10, %v5278_v54  ;;  %v5283_v18 = vsel %vm286_vm0, %v5281_v21, 0.0 }
0x2fba   :  { %5284 = vadd.xlane.f32.xlu0 %v5283_v18 }
0x2fbb   :  { %v5282_v23 = vmul.f32 %v5280_v17, %v5280_v17 }
0x2fbd   :  { %v5286_v13 = vsel %vm286_vm0, %v5282_v23, 0.0 }
0x2fbe   :  { %5287 = vadd.xlane.f32.xlu1 %v5286_v13 }
0x3047   :  { %v5285_v22 = vpop.xlane.xlu0 %5284 }
0x3048   :  { %v5289_v26 = vmul.f32 0.03125, %v5285_v22 }
0x304a   :  { %v5291_v36 = vadd.f32 1e-05, %v5289_v26 }
0x304b   :  { %v5288_v27 = vpop.xlane.xlu1 %5287 }
0x304c   :  { %6160 = vrsqrt.f32 %v5291_v36  ;;  %v5290_v29 = vmul.f32 0.03125, %v5288_v27 }
0x304e   :  { %v5292_v20 = vadd.f32 1e-05, %v5290_v29 }
0x3050   :  { %6162 = vrsqrt.f32 %v5292_v20 }
0x3056   :  { %v6161_v30 = vpop.eup %6160 }
0x3057   :  { %v5295_v33 = vmul.f32 %v6161_v30, %v5279_v16 }
0x3059   :  { %v5303_v31 = vmul.f32 %v5459_v32, %v5295_v33 }
0x305a   :  { %v6163_v25 = vpop.eup %6162 }
0x305b   :  { %v5296_v34 = vmul.f32 %v6163_v25, %v5280_v17  ;;  %v5311_v37 = vadd.f32 %v5460_v35, %v5303_v31 }
0x305d   :  { %v5304_v28 = vmul.f32 %v5459_v32, %v5296_v34  ;;  %v5313_v40 = vsel %vm286_vm0, %v5311_v37, 0.0 }
0x305f   :  { %v5312_v39 = vadd.f32 %v5460_v35, %v5304_v28 }
0x3061   :  { %v5314_v42 = vsel %vm286_vm0, %v5312_v39, 0.0 }
0x3062   :  { %v5315_v44 = vadd.f32 %v5314_v42, %v5313_v40 }
0x3064   :  { %5316 = vadd.xlane.f32.xlu0 %v5315_v44 }
0x30f1   :  { %v5317_v8 = vpop.xlane.xlu0 %5316 }
0x30f2   :  { %v5318_v38 = vrot.slane %v5317_v8, 4 }
0x30f4   :  { %v5319_v45 = vadd.f32 %v5318_v38, %v5317_v8 }
0x30f6   :  { %v5320_v48 = vrot.slane %v5319_v45, 2 }
0x30f8   :  { %v5321_v49 = vadd.f32 %v5320_v48, %v5319_v45 }
0x30fa   :  { %v5322_v11 = vrot.slane %v5321_v49, 1 }
0x30fc   :  { %v5323_v50 = vadd.f32 %v5322_v11, %v5321_v49 }
0x30fe   :  { %6043 = vpush %v5323_v50 }
0x312f   :  { %s6044_s24 = spop %6043 }
0x3130   :  { %v5325_v51 = vstv %s6044_s24 }
0x3131   :  { %5327 = vst.msk [vmem:[#allocation25] sm:$0x1] %vm5326_vm4, %v5325_v51 }
0x3132   :  { %6483 = shalt.err (!%p6480_p4)
}
0x3133   :  { %s7564_s28 = sld [smem:[#allocation48_spill]] }
0x3139   :  { %s6484_s0 = scalar_lea.hbm %s7564_s28, 16 }
0x313a   :  { %p6485_p5 = scmp.ne.s32.totalorder %s7564_s28, %s6484_s0  ;;  %p6488_p6 = scmp.lt.u32.totalorder %s6484_s0, %s7564_s28 }
0x313c   :  { %p6490_p7 = pnand %p6488_p6, %p6485_p5 }
0x313e   :  { %6493 = shalt.err (!%p6490_p7)
}
0x313f   :  { %5337 = dma.vmem_to_hbm [thread:$0]  %s5335_s16, 16, %s7564_s28, [#allocation4]  }
0x3140   :  { %6510 = dma.done.wait [#allocation4], 16  }
0x3141   :  { %6511 = vsyncadd [#allocation4], 4294967280 }
0x3142   :  { %5341 = vsyncpa [#allocation3], 1 }
0x3143   :  { %5342 = vsyncpa [#allocation6], 1 }
0x3144   :  { %5343 = vsyncpa [#allocation9], 1 }
0x3145   :  { %5344 = vsyncpa [#allocation12], 1 }
0x3146   :  { %5345 = vsyncpa [#allocation15], 1 }
0x3147   :  { %5346 = vsyncpa [#allocation18], 1 }
0x3148   :  { %5347 = vsyncpa [#allocation21], 1 }
0x3149   :  { %5348 = vsyncpa [#allocation24], 1 }
0x314a   :  { %5349 = vsyncpa [#allocation4], 1 }

</bundles_post_ra>
